<compile_context>
chip_gen: v6e
topology: v6e:2x2x1
jax: 0.10.0
libtpu: 0.0.40
codegen_flags: <defaults>
</compile_context>

<pallas_src>
import jax
import jax.numpy as jnp
from jax import lax
from jax.experimental import pallas as pl
from jax.experimental.pallas import tpu as pltpu

EPS = 1e-5


# --------------------------------------------------------------------------
# Kernels (grid = (N,), one image per grid step)
# --------------------------------------------------------------------------
def _conv1_shortcut_kernel(x_ref, w_ref, y1_ref, ys_ref, st_ref, xpad_ref):
    """conv1 (3x3) + 1x1 shortcut as a single im2col matmul + partial BN stats.

    x_ref    : (1, H, W, Cin)  f32   input image (NHWC)
    w_ref    : (9*Cin, 2*F)    bf16  [ conv1 im2col | shortcut (centre-tap rows) ]
    y1_ref   : (1, H, W, F)    f32   raw conv1 output
    ys_ref   : (1, H, W, F)    f32   raw shortcut output
    st_ref   : (1, 2, 2*F)     f32   per-image [sum ; sum_of_squares]
    xpad_ref : (H+2, W+2, Cin) f32   scratch: zero-padded image
    """
    _, H, W, Cin = x_ref.shape
    F = y1_ref.shape[-1]
    M = H * W

    # padding folded into the kernel (small per-image scratch)
    xpad_ref[...] = jnp.zeros_like(xpad_ref)
    xpad_ref[1:H + 1, 1:W + 1, :] = x_ref[0]

    # im2col built once -> one big-K matmul on the MXU (bf16 in, f32 acc)
    cols = [xpad_ref[dy:dy + H, dx:dx + W, :].reshape(M, Cin)
            for dy in range(3) for dx in range(3)]
    patch = jnp.concatenate(cols, axis=1).astype(jnp.bfloat16)      # (M, 9*Cin)

    y = jnp.dot(patch, w_ref[...], preferred_element_type=jnp.float32)  # (M, 2F)

    y1_ref[...] = y[:, :F].reshape(1, H, W, F)
    ys_ref[...] = y[:, F:].reshape(1, H, W, F)

    # fused partial BatchNorm statistics (finalized across the batch outside)
    st_ref[0, 0:1, :] = jnp.sum(y, axis=0, keepdims=True)
    st_ref[0, 1:2, :] = jnp.sum(y * y, axis=0, keepdims=True)


def _conv2_kernel(y1_ref, aff1_ref, w2_ref, y2_ref, st_ref, hpad_ref):
    """BN1 (precomputed scale/shift) + ReLU + conv2 (3x3) im2col matmul + stats.

    y1_ref   : (1, H, W, F)   f32   raw conv1 output
    aff1_ref : (2, F)         f32   row0 = scale, row1 = shift (global BN1 stats)
    w2_ref   : (9*F, F)       bf16  conv2 im2col weights
    y2_ref   : (1, H, W, F)   f32   raw conv2 output
    st_ref   : (1, 2, F)      f32   per-image [sum ; sum_of_squares]
    hpad_ref : (H+2, W+2, F)  f32   scratch: zero-padded BN1+ReLU activation
    """
    _, H, W, F = y1_ref.shape
    M = H * W

    scale = aff1_ref[0:1, :]
    shift = aff1_ref[1:2, :]
    h = jnp.maximum(y1_ref[0].reshape(M, F) * scale + shift, 0.0)   # BN1 + ReLU

    hpad_ref[...] = jnp.zeros_like(hpad_ref)
    hpad_ref[1:H + 1, 1:W + 1, :] = h.reshape(H, W, F)

    cols = [hpad_ref[dy:dy + H, dx:dx + W, :].reshape(M, F)
            for dy in range(3) for dx in range(3)]
    patch = jnp.concatenate(cols, axis=1).astype(jnp.bfloat16)      # (M, 9*F)

    y2 = jnp.dot(patch, w2_ref[...], preferred_element_type=jnp.float32)  # (M, F)

    y2_ref[...] = y2.reshape(1, H, W, F)
    st_ref[0, 0:1, :] = jnp.sum(y2, axis=0, keepdims=True)
    st_ref[0, 1:2, :] = jnp.sum(y2 * y2, axis=0, keepdims=True)


def _finalize_kernel(y2_ref, ys_ref, aff2_ref, affs_ref, out_ref):
    """out = BN2(y2_raw) + BNs(ys_raw)  (elementwise, scale/shift precomputed)."""
    F = out_ref.shape[-1]
    s2 = aff2_ref[0:1, :].reshape(1, 1, 1, F)
    b2 = aff2_ref[1:2, :].reshape(1, 1, 1, F)
    ss = affs_ref[0:1, :].reshape(1, 1, 1, F)
    bs = affs_ref[1:2, :].reshape(1, 1, 1, F)
    out_ref[...] = y2_ref[...] * s2 + b2 + ys_ref[...] * ss + bs


# --------------------------------------------------------------------------
# Wrapper
# --------------------------------------------------------------------------
def _compiler_params(per_step_bytes):
    limit = int(min(32 * 1024 * 1024, max(8 * 1024 * 1024, 6 * per_step_bytes)))
    return pltpu.CompilerParams(dimension_semantics=("parallel",),
                                vmem_limit_bytes=limit)


def _finalize_stats(st, gamma, beta, count):
    """st: (N, 2, C) per-image [sum; sumsq] -> (2, C) [scale; shift]."""
    ssum = jnp.sum(st[:, 0, :], axis=0)
    ssq = jnp.sum(st[:, 1, :], axis=0)
    mean = ssum / count
    var = jnp.maximum(ssq / count - mean * mean, 0.0)
    scale = gamma * lax.rsqrt(var + EPS)
    shift = beta - mean * scale
    return jnp.stack([scale, shift], axis=0)


@jax.jit
def residual_block(x_nchw, params):
    """Forward pass. x_nchw: (N, Cin, H, W) f32 -> (N, F, H, W) f32."""
    N, Cin, H, W = x_nchw.shape
    F = params["g1"].shape[0]
    M = N * H * W

    x = jnp.transpose(x_nchw, (0, 2, 3, 1)).astype(jnp.float32)     # NHWC

    # ---------------- phase 1: conv1 + shortcut (raw) + partial stats --------
    bb1 = (H * W * Cin * 4 + 9 * Cin * 2 * F * 2 + 2 * H * W * F * 4
           + (H + 2) * (W + 2) * Cin * 4 + H * W * 9 * Cin * 6)
    y1_raw, ys_raw, st1 = pl.pallas_call(
        _conv1_shortcut_kernel,
        grid=(N,),
        in_specs=[
            pl.BlockSpec((1, H, W, Cin), lambda n: (n, 0, 0, 0)),
            pl.BlockSpec((9 * Cin, 2 * F), lambda n: (0, 0)),
        ],
        out_specs=[
            pl.BlockSpec((1, H, W, F), lambda n: (n, 0, 0, 0)),
            pl.BlockSpec((1, H, W, F), lambda n: (n, 0, 0, 0)),
            pl.BlockSpec((1, 2, 2 * F), lambda n: (n, 0, 0)),
        ],
        out_shape=(
            jax.ShapeDtypeStruct((N, H, W, F), jnp.float32),
            jax.ShapeDtypeStruct((N, H, W, F), jnp.float32),
            jax.ShapeDtypeStruct((N, 2, 2 * F), jnp.float32),
        ),
        scratch_shapes=[pltpu.VMEM((H + 2, W + 2, Cin), jnp.float32)],
        compiler_params=_compiler_params(bb1),
        cost_estimate=pl.CostEstimate(
            flops=2 * M * 9 * Cin * 2 * F,
            transcendentals=0,
            bytes_accessed=M * Cin * 4 + 2 * M * F * 4 + 9 * Cin * 2 * F * 2),
    )(x, params["w1s"])

    # finalize global BN stats for conv1 and shortcut (tiny per-channel math)
    gam = jnp.concatenate([params["g1"], params["gs"]])
    bet = jnp.concatenate([params["b1"], params["bs"]])
    aff_1s = _finalize_stats(st1, gam, bet, M)                      # (2, 2F)
    aff1, affs = aff_1s[:, :F], aff_1s[:, F:]

    # ---------------- phase 2: BN1 + ReLU + conv2 (raw) + partial stats ------
    bb2 = (2 * H * W * F * 4 + 9 * F * F * 2 + (H + 2) * (W + 2) * F * 4
           + H * W * 9 * F * 6 + 4 * F * 4)
    y2_raw, st2 = pl.pallas_call(
        _conv2_kernel,
        grid=(N,),
        in_specs=[
            pl.BlockSpec((1, H, W, F), lambda n: (n, 0, 0, 0)),
            pl.BlockSpec((2, F), lambda n: (0, 0)),
            pl.BlockSpec((9 * F, F), lambda n: (0, 0)),
        ],
        out_specs=[
            pl.BlockSpec((1, H, W, F), lambda n: (n, 0, 0, 0)),
            pl.BlockSpec((1, 2, F), lambda n: (n, 0, 0)),
        ],
        out_shape=(
            jax.ShapeDtypeStruct((N, H, W, F), jnp.float32),
            jax.ShapeDtypeStruct((N, 2, F), jnp.float32),
        ),
        scratch_shapes=[pltpu.VMEM((H + 2, W + 2, F), jnp.float32)],
        compiler_params=_compiler_params(bb2),
        cost_estimate=pl.CostEstimate(
            flops=2 * M * 9 * F * F,
            transcendentals=0,
            bytes_accessed=2 * M * F * 4 + 9 * F * F * 2),
    )(y1_raw, aff1, params["w2"])

    aff2 = _finalize_stats(st2, params["g2"], params["b2"], M)      # (2, F)

    # ---------------- phase 3: apply BN2 / BNs and add ------------------------
    bb3 = 3 * H * W * F * 4 + 4 * F * 4
    out_nhwc = pl.pallas_call(
        _finalize_kernel,
        grid=(N,),
        in_specs=[
            pl.BlockSpec((1, H, W, F), lambda n: (n, 0, 0, 0)),
            pl.BlockSpec((1, H, W, F), lambda n: (n, 0, 0, 0)),
            pl.BlockSpec((2, F), lambda n: (0, 0)),
            pl.BlockSpec((2, F), lambda n: (0, 0)),
        ],
        out_specs=pl.BlockSpec((1, H, W, F), lambda n: (n, 0, 0, 0)),
        out_shape=jax.ShapeDtypeStruct((N, H, W, F), jnp.float32),
        compiler_params=_compiler_params(bb3),
        cost_estimate=pl.CostEstimate(
            flops=4 * M * F, transcendentals=0, bytes_accessed=3 * M * F * 4),
    )(y2_raw, ys_raw, aff2, affs)

    return jnp.transpose(out_nhwc, (0, 3, 1, 2))                    # back to NCHW


# --------------------------------------------------------------------------
# Parameters
# --------------------------------------------------------------------------
def init_raw_params(key, in_channels, filters):
    """PyTorch-layout weights (out, in, kh, kw) and per-channel affine params."""
    k1, k2, k3 = jax.random.split(key, 3)
    w1 = jax.random.normal(k1, (filters, in_channels, 3, 3), jnp.float32) * 0.1
    w2 = jax.random.normal(k2, (filters, filters, 3, 3), jnp.float32) * 0.1
    ws = jax.random.normal(k3, (filters, in_channels, 1, 1), jnp.float32) * 0.1

    def gamma(off):
        return 1.0 + 0.01 * (jnp.arange(filters, dtype=jnp.float32) + off)

    def beta(off):
        return 0.01 * (jnp.arange(filters, dtype=jnp.float32) - off)

    return {"w1": w1, "w2": w2, "ws": ws,
            "g1": gamma(0.0), "b1": beta(0.0),
            "g2": gamma(1.0), "b2": beta(1.0),
            "gs": gamma(2.0), "bs": beta(2.0)}


def pack_params(raw):
    """Convert PyTorch-layout weights to kernel layout (im2col, bf16)."""
    F, Cin = raw["w1"].shape[0], raw["w1"].shape[1]
    # (out, in, kh, kw) -> (kh, kw, in, out) -> (9*in, out), tap-major rows.
    w1col = jnp.transpose(raw["w1"], (2, 3, 1, 0)).reshape(9 * Cin, F)
    wsmat = raw["ws"][:, :, 0, 0].T                                  # (Cin, F)
    wscol = jnp.zeros((9 * Cin, F), jnp.float32).at[4 * Cin:5 * Cin, :].set(wsmat)
    w1s = jnp.concatenate([w1col, wscol], axis=1).astype(jnp.bfloat16)  # (9Cin, 2F)
    w2col = jnp.transpose(raw["w2"], (2, 3, 1, 0)).reshape(9 * F, F).astype(jnp.bfloat16)
    return {"w1s": w1s, "w2": w2col,
            "g1": raw["g1"], "b1": raw["b1"],
            "g2": raw["g2"], "b2": raw["b2"],
            "gs": raw["gs"], "bs": raw["bs"]}


# --------------------------------------------------------------------------
# Pure-JAX reference (same bf16 matmul inputs, f32 accumulation + f32 BN)
# --------------------------------------------------------------------------
def residual_block_ref(x_nchw, raw):
    x = jnp.transpose(x_nchw, (0, 2, 3, 1)).astype(jnp.float32)
    dn = ("NHWC", "HWIO", "NHWC")

    def conv(v, w_oihw):
        w = jnp.transpose(w_oihw, (2, 3, 1, 0))                      # HWIO
        return lax.conv_general_dilated(
            v.astype(jnp.bfloat16), w.astype(jnp.bfloat16), (1, 1), "SAME",
            dimension_numbers=dn, preferred_element_type=jnp.float32)

    def bn(v, g, b):
        mean = jnp.mean(v, axis=(0, 1, 2), keepdims=True)
        var = jnp.mean((v - mean) ** 2, axis=(0, 1, 2), keepdims=True)
        return (v - mean) * lax.rsqrt(var + EPS) * g.reshape(1, 1, 1, -1) \
            + b.reshape(1, 1, 1, -1)

    h = jnp.maximum(bn(conv(x, raw["w1"]), raw["g1"], raw["b1"]), 0.0)
    h = bn(conv(h, raw["w2"]), raw["g2"], raw["b2"])
    s = bn(conv(x, raw["ws"]), raw["gs"], raw["bs"])
    return jnp.transpose(h + s, (0, 3, 1, 2))


if __name__ == "__main__":
    key = jax.random.PRNGKey(0)
    kx, kp = jax.random.split(key)

    N, Cin, H, W = 2, 4, 16, 16
    FILTERS = 32  # in_channels != filters -> conv shortcut path is exercised

    x = jax.random.normal(kx, (N, Cin, H, W), jnp.float32)
    raw = init_raw_params(kp, Cin, FILTERS)
    packed = pack_params(raw)

    out = jax.block_until_ready(residual_block(x, packed))
    ref = jax.block_until_ready(residual_block_ref(x, raw))

    assert out.shape == (N, FILTERS, H, W)
    err = jnp.max(jnp.abs(out - ref))
    assert jnp.allclose(out, ref, atol=2e-3, rtol=2e-3), f"max abs err {err}"

    print("KERNEL_OK")
</pallas_src>

<mosaic_0001>
module attributes {stable_mosaic.version = 11 : i64} {
  func.func @_conv1_shortcut_kernel(%arg0: i32, %arg1: memref<1x16x16x4xf32, #tpu.memory_space<vmem>>, %arg2: memref<36x64xbf16, #tpu.memory_space<vmem>>, %arg3: memref<1x16x16x32xf32, #tpu.memory_space<vmem>>, %arg4: memref<1x16x16x32xf32, #tpu.memory_space<vmem>>, %arg5: memref<1x2x64xf32, #tpu.memory_space<vmem>>, %arg6: memref<18x18x4xf32, #tpu.memory_space<vmem>>) attributes {dimension_semantics = [#tpu.dimension_semantics<parallel>], iteration_bounds = array<i64: 2>, scalar_prefetch = 0 : i64, scratch_operands = 1 : i64, tpu.core_type = #tpu.core_type<tc>, window_params = [{transform_indices = @transform_0, window_bounds = array<i64: 1, 16, 16, 4>}, {pipeline_mode = #tpu.pipeline_mode<synchronous>, transform_indices = @transform_1, window_bounds = array<i64: 36, 64>}, {transform_indices = @transform_2, window_bounds = array<i64: 1, 16, 16, 32>}, {transform_indices = @transform_3, window_bounds = array<i64: 1, 16, 16, 32>}, {transform_indices = @transform_4, window_bounds = array<i64: 1, 2, 64>}]} {
    %cst = arith.constant 0.000000e+00 : f32
    %0 = vector.broadcast %cst : f32 to vector<18x18x4xf32>
    %c0 = arith.constant 0 : index
    %c0_0 = arith.constant 0 : index
    %c0_1 = arith.constant 0 : index
    %1 = vector.load %arg6[%c0, %c0_0, %c0_1] : memref<18x18x4xf32, #tpu.memory_space<vmem>>, vector<18x18x4xf32>
    tpu.vector_store %arg6[%c0, %c0_0, %c0_1], %0 {strides = array<i32>} : memref<18x18x4xf32, #tpu.memory_space<vmem>>, vector<18x18x4xf32>,
    %c0_2 = arith.constant 0 : index
    %c0_3 = arith.constant 0 : index
    %c0_4 = arith.constant 0 : index
    %c0_5 = arith.constant 0 : index
    %2 = vector.load %arg1[%c0_2, %c0_3, %c0_4, %c0_5] : memref<1x16x16x4xf32, #tpu.memory_space<vmem>>, vector<1x16x16x4xf32>
    %3 = vector.shape_cast %2 : vector<1x16x16x4xf32> to vector<16x16x4xf32>
    %c1 = arith.constant 1 : index
    %c1_6 = arith.constant 1 : index
    %c0_7 = arith.constant 0 : index
    %4 = vector.load %arg6[%c1, %c1_6, %c0_7] : memref<18x18x4xf32, #tpu.memory_space<vmem>>, vector<16x16x4xf32>
    tpu.vector_store %arg6[%c1, %c1_6, %c0_7], %3 {strides = array<i32>} : memref<18x18x4xf32, #tpu.memory_space<vmem>>, vector<16x16x4xf32>,
    %c0_8 = arith.constant 0 : index
    %c0_9 = arith.constant 0 : index
    %c0_10 = arith.constant 0 : index
    %5 = vector.load %arg6[%c0_8, %c0_9, %c0_10] : memref<18x18x4xf32, #tpu.memory_space<vmem>>, vector<16x16x4xf32>
    %6 = vector.shape_cast %5 : vector<16x16x4xf32> to vector<256x4xf32>
    %c0_11 = arith.constant 0 : index
    %c1_12 = arith.constant 1 : index
    %c0_13 = arith.constant 0 : index
    %7 = vector.load %arg6[%c0_11, %c1_12, %c0_13] : memref<18x18x4xf32, #tpu.memory_space<vmem>>, vector<16x16x4xf32>
    %8 = vector.shape_cast %7 : vector<16x16x4xf32> to vector<256x4xf32>
    %c0_14 = arith.constant 0 : index
    %c2 = arith.constant 2 : index
    %c0_15 = arith.constant 0 : index
    %9 = vector.load %arg6[%c0_14, %c2, %c0_15] : memref<18x18x4xf32, #tpu.memory_space<vmem>>, vector<16x16x4xf32>
    %10 = vector.shape_cast %9 : vector<16x16x4xf32> to vector<256x4xf32>
    %c1_16 = arith.constant 1 : index
    %c0_17 = arith.constant 0 : index
    %c0_18 = arith.constant 0 : index
    %11 = vector.load %arg6[%c1_16, %c0_17, %c0_18] : memref<18x18x4xf32, #tpu.memory_space<vmem>>, vector<16x16x4xf32>
    %12 = vector.shape_cast %11 : vector<16x16x4xf32> to vector<256x4xf32>
    %c1_19 = arith.constant 1 : index
    %c1_20 = arith.constant 1 : index
    %c0_21 = arith.constant 0 : index
    %13 = vector.load %arg6[%c1_19, %c1_20, %c0_21] : memref<18x18x4xf32, #tpu.memory_space<vmem>>, vector<16x16x4xf32>
    %14 = vector.shape_cast %13 : vector<16x16x4xf32> to vector<256x4xf32>
    %c1_22 = arith.constant 1 : index
    %c2_23 = arith.constant 2 : index
    %c0_24 = arith.constant 0 : index
    %15 = vector.load %arg6[%c1_22, %c2_23, %c0_24] : memref<18x18x4xf32, #tpu.memory_space<vmem>>, vector<16x16x4xf32>
    %16 = vector.shape_cast %15 : vector<16x16x4xf32> to vector<256x4xf32>
    %c2_25 = arith.constant 2 : index
    %c0_26 = arith.constant 0 : index
    %c0_27 = arith.constant 0 : index
    %17 = vector.load %arg6[%c2_25, %c0_26, %c0_27] : memref<18x18x4xf32, #tpu.memory_space<vmem>>, vector<16x16x4xf32>
    %18 = vector.shape_cast %17 : vector<16x16x4xf32> to vector<256x4xf32>
    %c2_28 = arith.constant 2 : index
    %c1_29 = arith.constant 1 : index
    %c0_30 = arith.constant 0 : index
    %19 = vector.load %arg6[%c2_28, %c1_29, %c0_30] : memref<18x18x4xf32, #tpu.memory_space<vmem>>, vector<16x16x4xf32>
    %20 = vector.shape_cast %19 : vector<16x16x4xf32> to vector<256x4xf32>
    %c2_31 = arith.constant 2 : index
    %c2_32 = arith.constant 2 : index
    %c0_33 = arith.constant 0 : index
    %21 = vector.load %arg6[%c2_31, %c2_32, %c0_33] : memref<18x18x4xf32, #tpu.memory_space<vmem>>, vector<16x16x4xf32>
    %22 = vector.shape_cast %21 : vector<16x16x4xf32> to vector<256x4xf32>
    %23 = tpu.concatenate %6, %8, %10, %12, %14, %16, %18, %20, %22 in 1 : vector<256x4xf32>, vector<256x4xf32>, vector<256x4xf32>, vector<256x4xf32>, vector<256x4xf32>, vector<256x4xf32>, vector<256x4xf32>, vector<256x4xf32>, vector<256x4xf32> -> vector<256x36xf32>
    %24 = arith.truncf %23 : vector<256x36xf32> to vector<256x36xbf16>
    %c0_34 = arith.constant 0 : index
    %c0_35 = arith.constant 0 : index
    %25 = vector.load %arg2[%c0_34, %c0_35] : memref<36x64xbf16, #tpu.memory_space<vmem>>, vector<36x64xbf16>
    %cst_36 = arith.constant dense<0.000000e+00> : vector<256x64xf32>
    %26 = tpu.matmul %24, %25, %cst_36 {dimension_numbers = #tpu.dot_dimension_numbers<[1], [0], [0], [1], [0, 0, 1, 1], [], []>} : vector<256x36xbf16>, vector<36x64xbf16>, vector<256x64xf32> -> vector<256x64xf32>
    %27 = vector.extract_strided_slice %26 {offsets = [0, 0], sizes = [256, 32], strides = [1, 1]} : vector<256x64xf32> to vector<256x32xf32>
    %28 = vector.shape_cast %27 : vector<256x32xf32> to vector<1x16x16x32xf32>
    %c0_37 = arith.constant 0 : index
    %c0_38 = arith.constant 0 : index
    %c0_39 = arith.constant 0 : index
    %c0_40 = arith.constant 0 : index
    %29 = vector.load %arg3[%c0_37, %c0_38, %c0_39, %c0_40] : memref<1x16x16x32xf32, #tpu.memory_space<vmem>>, vector<1x16x16x32xf32>
    tpu.vector_store %arg3[%c0_37, %c0_38, %c0_39, %c0_40], %28 {strides = array<i32>} : memref<1x16x16x32xf32, #tpu.memory_space<vmem>>, vector<1x16x16x32xf32>,
    %30 = vector.extract_strided_slice %26 {offsets = [0, 32], sizes = [256, 32], strides = [1, 1]} : vector<256x64xf32> to vector<256x32xf32>
    %31 = vector.shape_cast %30 : vector<256x32xf32> to vector<1x16x16x32xf32>
    %c0_41 = arith.constant 0 : index
    %c0_42 = arith.constant 0 : index
    %c0_43 = arith.constant 0 : index
    %c0_44 = arith.constant 0 : index
    %32 = vector.load %arg4[%c0_41, %c0_42, %c0_43, %c0_44] : memref<1x16x16x32xf32, #tpu.memory_space<vmem>>, vector<1x16x16x32xf32>
    tpu.vector_store %arg4[%c0_41, %c0_42, %c0_43, %c0_44], %31 {strides = array<i32>} : memref<1x16x16x32xf32, #tpu.memory_space<vmem>>, vector<1x16x16x32xf32>,
    %cst_45 = arith.constant dense<0.000000e+00> : vector<64xf32>
    %33 = vector.multi_reduction <add>, %26, %cst_45 [0] : vector<256x64xf32> to vector<64xf32>
    %34 = vector.shape_cast %33 : vector<64xf32> to vector<1x64xf32>
    %c0_46 = arith.constant 0 : index
    %c0_47 = arith.constant 0 : index
    %c0_48 = arith.constant 0 : index
    %35 = vector.load %arg5[%c0_46, %c0_47, %c0_48] : memref<1x2x64xf32, #tpu.memory_space<vmem>>, vector<1x1x64xf32>
    %36 = vector.shape_cast %35 : vector<1x1x64xf32> to vector<1x64xf32>
    %37 = vector.shape_cast %34 : vector<1x64xf32> to vector<1x1x64xf32>
    tpu.vector_store %arg5[%c0_46, %c0_47, %c0_48], %37 {strides = array<i32>} : memref<1x2x64xf32, #tpu.memory_space<vmem>>, vector<1x1x64xf32>,
    %38 = arith.mulf %26, %26 : vector<256x64xf32>
    %cst_49 = arith.constant dense<0.000000e+00> : vector<64xf32>
    %39 = vector.multi_reduction <add>, %38, %cst_49 [0] : vector<256x64xf32> to vector<64xf32>
    %40 = vector.shape_cast %39 : vector<64xf32> to vector<1x64xf32>
    %c0_50 = arith.constant 0 : index
    %c1_51 = arith.constant 1 : index
    %c0_52 = arith.constant 0 : index
    %41 = vector.load %arg5[%c0_50, %c1_51, %c0_52] : memref<1x2x64xf32, #tpu.memory_space<vmem>>, vector<1x1x64xf32>
    %42 = vector.shape_cast %41 : vector<1x1x64xf32> to vector<1x64xf32>
    %43 = vector.shape_cast %40 : vector<1x64xf32> to vector<1x1x64xf32>
    tpu.vector_store %arg5[%c0_50, %c1_51, %c0_52], %43 {strides = array<i32>} : memref<1x2x64xf32, #tpu.memory_space<vmem>>, vector<1x1x64xf32>,
    return
  }
  func.func @transform_0(%arg0: i32) -> (i32, i32, i32, i32) {
    %c0_i32 = arith.constant 0 : i32
    %c0_i32_0 = arith.constant 0 : i32
    %c0_i32_1 = arith.constant 0 : i32
    %c0_i32_2 = arith.constant 0 : i32
    return %arg0, %c0_i32, %c0_i32_0, %c0_i32_1 : i32, i32, i32, i32
  }
  func.func @transform_1(%arg0: i32) -> (i32, i32) {
    %c0_i32 = arith.constant 0 : i32
    %c0_i32_0 = arith.constant 0 : i32
    %c0_i32_1 = arith.constant 0 : i32
    return %c0_i32, %c0_i32_0 : i32, i32
  }
  func.func @transform_2(%arg0: i32) -> (i32, i32, i32, i32) {
    %c0_i32 = arith.constant 0 : i32
    %c0_i32_0 = arith.constant 0 : i32
    %c0_i32_1 = arith.constant 0 : i32
    %c0_i32_2 = arith.constant 0 : i32
    return %arg0, %c0_i32, %c0_i32_0, %c0_i32_1 : i32, i32, i32, i32
  }
  func.func @transform_3(%arg0: i32) -> (i32, i32, i32, i32) {
    %c0_i32 = arith.constant 0 : i32
    %c0_i32_0 = arith.constant 0 : i32
    %c0_i32_1 = arith.constant 0 : i32
    %c0_i32_2 = arith.constant 0 : i32
    return %arg0, %c0_i32, %c0_i32_0, %c0_i32_1 : i32, i32, i32, i32
  }
  func.func @transform_4(%arg0: i32) -> (i32, i32, i32) {
    %c0_i32 = arith.constant 0 : i32
    %c0_i32_0 = arith.constant 0 : i32
    %c0_i32_1 = arith.constant 0 : i32
    return %arg0, %c0_i32, %c0_i32_0 : i32, i32, i32
  }
}

module attributes {stable_mosaic.version = 11 : i64} {
  func.func @_conv2_kernel(%arg0: i32, %arg1: memref<1x16x16x32xf32, #tpu.memory_space<vmem>>, %arg2: memref<2x32xf32, #tpu.memory_space<vmem>>, %arg3: memref<288x32xbf16, #tpu.memory_space<vmem>>, %arg4: memref<1x16x16x32xf32, #tpu.memory_space<vmem>>, %arg5: memref<1x2x32xf32, #tpu.memory_space<vmem>>, %arg6: memref<18x18x32xf32, #tpu.memory_space<vmem>>) attributes {dimension_semantics = [#tpu.dimension_semantics<parallel>], iteration_bounds = array<i64: 2>, scalar_prefetch = 0 : i64, scratch_operands = 1 : i64, tpu.core_type = #tpu.core_type<tc>, window_params = [{transform_indices = @transform_0, window_bounds = array<i64: 1, 16, 16, 32>}, {pipeline_mode = #tpu.pipeline_mode<synchronous>, transform_indices = @transform_1, window_bounds = array<i64: 2, 32>}, {pipeline_mode = #tpu.pipeline_mode<synchronous>, transform_indices = @transform_2, window_bounds = array<i64: 288, 32>}, {transform_indices = @transform_3, window_bounds = array<i64: 1, 16, 16, 32>}, {transform_indices = @transform_4, window_bounds = array<i64: 1, 2, 32>}]} {
    %c0 = arith.constant 0 : index
    %c0_0 = arith.constant 0 : index
    %0 = vector.load %arg2[%c0, %c0_0] : memref<2x32xf32, #tpu.memory_space<vmem>>, vector<1x32xf32>
    %c1 = arith.constant 1 : index
    %c0_1 = arith.constant 0 : index
    %1 = vector.load %arg2[%c1, %c0_1] : memref<2x32xf32, #tpu.memory_space<vmem>>, vector<1x32xf32>
    %c0_2 = arith.constant 0 : index
    %c0_3 = arith.constant 0 : index
    %c0_4 = arith.constant 0 : index
    %c0_5 = arith.constant 0 : index
    %2 = vector.load %arg1[%c0_2, %c0_3, %c0_4, %c0_5] : memref<1x16x16x32xf32, #tpu.memory_space<vmem>>, vector<1x16x16x32xf32>
    %3 = vector.shape_cast %2 : vector<1x16x16x32xf32> to vector<16x16x32xf32>
    %4 = vector.shape_cast %3 : vector<16x16x32xf32> to vector<256x32xf32>
    %5 = vector.broadcast %0 : vector<1x32xf32> to vector<256x32xf32>
    %6 = arith.mulf %4, %5 : vector<256x32xf32>
    %7 = vector.broadcast %1 : vector<1x32xf32> to vector<256x32xf32>
    %8 = arith.addf %6, %7 : vector<256x32xf32>
    %cst = arith.constant 0.000000e+00 : f32
    %9 = vector.broadcast %cst : f32 to vector<256x32xf32>
    %10 = arith.maximumf %8, %9 : vector<256x32xf32>
    %cst_6 = arith.constant 0.000000e+00 : f32
    %11 = vector.broadcast %cst_6 : f32 to vector<18x18x32xf32>
    %c0_7 = arith.constant 0 : index
    %c0_8 = arith.constant 0 : index
    %c0_9 = arith.constant 0 : index
    %12 = vector.load %arg6[%c0_7, %c0_8, %c0_9] : memref<18x18x32xf32, #tpu.memory_space<vmem>>, vector<18x18x32xf32>
    tpu.vector_store %arg6[%c0_7, %c0_8, %c0_9], %11 {strides = array<i32>} : memref<18x18x32xf32, #tpu.memory_space<vmem>>, vector<18x18x32xf32>,
    %13 = vector.shape_cast %10 : vector<256x32xf32> to vector<16x16x32xf32>
    %c1_10 = arith.constant 1 : index
    %c1_11 = arith.constant 1 : index
    %c0_12 = arith.constant 0 : index
    %14 = vector.load %arg6[%c1_10, %c1_11, %c0_12] : memref<18x18x32xf32, #tpu.memory_space<vmem>>, vector<16x16x32xf32>
    tpu.vector_store %arg6[%c1_10, %c1_11, %c0_12], %13 {strides = array<i32>} : memref<18x18x32xf32, #tpu.memory_space<vmem>>, vector<16x16x32xf32>,
    %c0_13 = arith.constant 0 : index
    %c0_14 = arith.constant 0 : index
    %c0_15 = arith.constant 0 : index
    %15 = vector.load %arg6[%c0_13, %c0_14, %c0_15] : memref<18x18x32xf32, #tpu.memory_space<vmem>>, vector<16x16x32xf32>
    %16 = vector.shape_cast %15 : vector<16x16x32xf32> to vector<256x32xf32>
    %c0_16 = arith.constant 0 : index
    %c1_17 = arith.constant 1 : index
    %c0_18 = arith.constant 0 : index
    %17 = vector.load %arg6[%c0_16, %c1_17, %c0_18] : memref<18x18x32xf32, #tpu.memory_space<vmem>>, vector<16x16x32xf32>
    %18 = vector.shape_cast %17 : vector<16x16x32xf32> to vector<256x32xf32>
    %c0_19 = arith.constant 0 : index
    %c2 = arith.constant 2 : index
    %c0_20 = arith.constant 0 : index
    %19 = vector.load %arg6[%c0_19, %c2, %c0_20] : memref<18x18x32xf32, #tpu.memory_space<vmem>>, vector<16x16x32xf32>
    %20 = vector.shape_cast %19 : vector<16x16x32xf32> to vector<256x32xf32>
    %c1_21 = arith.constant 1 : index
    %c0_22 = arith.constant 0 : index
    %c0_23 = arith.constant 0 : index
    %21 = vector.load %arg6[%c1_21, %c0_22, %c0_23] : memref<18x18x32xf32, #tpu.memory_space<vmem>>, vector<16x16x32xf32>
    %22 = vector.shape_cast %21 : vector<16x16x32xf32> to vector<256x32xf32>
    %c1_24 = arith.constant 1 : index
    %c1_25 = arith.constant 1 : index
    %c0_26 = arith.constant 0 : index
    %23 = vector.load %arg6[%c1_24, %c1_25, %c0_26] : memref<18x18x32xf32, #tpu.memory_space<vmem>>, vector<16x16x32xf32>
    %24 = vector.shape_cast %23 : vector<16x16x32xf32> to vector<256x32xf32>
    %c1_27 = arith.constant 1 : index
    %c2_28 = arith.constant 2 : index
    %c0_29 = arith.constant 0 : index
    %25 = vector.load %arg6[%c1_27, %c2_28, %c0_29] : memref<18x18x32xf32, #tpu.memory_space<vmem>>, vector<16x16x32xf32>
    %26 = vector.shape_cast %25 : vector<16x16x32xf32> to vector<256x32xf32>
    %c2_30 = arith.constant 2 : index
    %c0_31 = arith.constant 0 : index
    %c0_32 = arith.constant 0 : index
    %27 = vector.load %arg6[%c2_30, %c0_31, %c0_32] : memref<18x18x32xf32, #tpu.memory_space<vmem>>, vector<16x16x32xf32>
    %28 = vector.shape_cast %27 : vector<16x16x32xf32> to vector<256x32xf32>
    %c2_33 = arith.constant 2 : index
    %c1_34 = arith.constant 1 : index
    %c0_35 = arith.constant 0 : index
    %29 = vector.load %arg6[%c2_33, %c1_34, %c0_35] : memref<18x18x32xf32, #tpu.memory_space<vmem>>, vector<16x16x32xf32>
    %30 = vector.shape_cast %29 : vector<16x16x32xf32> to vector<256x32xf32>
    %c2_36 = arith.constant 2 : index
    %c2_37 = arith.constant 2 : index
    %c0_38 = arith.constant 0 : index
    %31 = vector.load %arg6[%c2_36, %c2_37, %c0_38] : memref<18x18x32xf32, #tpu.memory_space<vmem>>, vector<16x16x32xf32>
    %32 = vector.shape_cast %31 : vector<16x16x32xf32> to vector<256x32xf32>
    %33 = tpu.concatenate %16, %18, %20, %22, %24, %26, %28, %30, %32 in 1 : vector<256x32xf32>, vector<256x32xf32>, vector<256x32xf32>, vector<256x32xf32>, vector<256x32xf32>, vector<256x32xf32>, vector<256x32xf32>, vector<256x32xf32>, vector<256x32xf32> -> vector<256x288xf32>
    %34 = arith.truncf %33 : vector<256x288xf32> to vector<256x288xbf16>
    %c0_39 = arith.constant 0 : index
    %c0_40 = arith.constant 0 : index
    %35 = vector.load %arg3[%c0_39, %c0_40] : memref<288x32xbf16, #tpu.memory_space<vmem>>, vector<288x32xbf16>
    %cst_41 = arith.constant dense<0.000000e+00> : vector<256x32xf32>
    %36 = tpu.matmul %34, %35, %cst_41 {dimension_numbers = #tpu.dot_dimension_numbers<[1], [0], [0], [1], [0, 0, 1, 1], [], []>} : vector<256x288xbf16>, vector<288x32xbf16>, vector<256x32xf32> -> vector<256x32xf32>
    %37 = vector.shape_cast %36 : vector<256x32xf32> to vector<1x16x16x32xf32>
    %c0_42 = arith.constant 0 : index
    %c0_43 = arith.constant 0 : index
    %c0_44 = arith.constant 0 : index
    %c0_45 = arith.constant 0 : index
    %38 = vector.load %arg4[%c0_42, %c0_43, %c0_44, %c0_45] : memref<1x16x16x32xf32, #tpu.memory_space<vmem>>, vector<1x16x16x32xf32>
    tpu.vector_store %arg4[%c0_42, %c0_43, %c0_44, %c0_45], %37 {strides = array<i32>} : memref<1x16x16x32xf32, #tpu.memory_space<vmem>>, vector<1x16x16x32xf32>,
    %cst_46 = arith.constant dense<0.000000e+00> : vector<32xf32>
    %39 = vector.multi_reduction <add>, %36, %cst_46 [0] : vector<256x32xf32> to vector<32xf32>
    %40 = vector.shape_cast %39 : vector<32xf32> to vector<1x32xf32>
    %c0_47 = arith.constant 0 : index
    %c0_48 = arith.constant 0 : index
    %c0_49 = arith.constant 0 : index
    %41 = vector.load %arg5[%c0_47, %c0_48, %c0_49] : memref<1x2x32xf32, #tpu.memory_space<vmem>>, vector<1x1x32xf32>
    %42 = vector.shape_cast %41 : vector<1x1x32xf32> to vector<1x32xf32>
    %43 = vector.shape_cast %40 : vector<1x32xf32> to vector<1x1x32xf32>
    tpu.vector_store %arg5[%c0_47, %c0_48, %c0_49], %43 {strides = array<i32>} : memref<1x2x32xf32, #tpu.memory_space<vmem>>, vector<1x1x32xf32>,
    %44 = arith.mulf %36, %36 : vector<256x32xf32>
    %cst_50 = arith.constant dense<0.000000e+00> : vector<32xf32>
    %45 = vector.multi_reduction <add>, %44, %cst_50 [0] : vector<256x32xf32> to vector<32xf32>
    %46 = vector.shape_cast %45 : vector<32xf32> to vector<1x32xf32>
    %c0_51 = arith.constant 0 : index
    %c1_52 = arith.constant 1 : index
    %c0_53 = arith.constant 0 : index
    %47 = vector.load %arg5[%c0_51, %c1_52, %c0_53] : memref<1x2x32xf32, #tpu.memory_space<vmem>>, vector<1x1x32xf32>
    %48 = vector.shape_cast %47 : vector<1x1x32xf32> to vector<1x32xf32>
    %49 = vector.shape_cast %46 : vector<1x32xf32> to vector<1x1x32xf32>
    tpu.vector_store %arg5[%c0_51, %c1_52, %c0_53], %49 {strides = array<i32>} : memref<1x2x32xf32, #tpu.memory_space<vmem>>, vector<1x1x32xf32>,
    return
  }
  func.func @transform_0(%arg0: i32) -> (i32, i32, i32, i32) {
    %c0_i32 = arith.constant 0 : i32
    %c0_i32_0 = arith.constant 0 : i32
    %c0_i32_1 = arith.constant 0 : i32
    %c0_i32_2 = arith.constant 0 : i32
    return %arg0, %c0_i32, %c0_i32_0, %c0_i32_1 : i32, i32, i32, i32
  }
  func.func @transform_1(%arg0: i32) -> (i32, i32) {
    %c0_i32 = arith.constant 0 : i32
    %c0_i32_0 = arith.constant 0 : i32
    %c0_i32_1 = arith.constant 0 : i32
    return %c0_i32, %c0_i32_0 : i32, i32
  }
  func.func @transform_2(%arg0: i32) -> (i32, i32) {
    %c0_i32 = arith.constant 0 : i32
    %c0_i32_0 = arith.constant 0 : i32
    %c0_i32_1 = arith.constant 0 : i32
    return %c0_i32, %c0_i32_0 : i32, i32
  }
  func.func @transform_3(%arg0: i32) -> (i32, i32, i32, i32) {
    %c0_i32 = arith.constant 0 : i32
    %c0_i32_0 = arith.constant 0 : i32
    %c0_i32_1 = arith.constant 0 : i32
    %c0_i32_2 = arith.constant 0 : i32
    return %arg0, %c0_i32, %c0_i32_0, %c0_i32_1 : i32, i32, i32, i32
  }
  func.func @transform_4(%arg0: i32) -> (i32, i32, i32) {
    %c0_i32 = arith.constant 0 : i32
    %c0_i32_0 = arith.constant 0 : i32
    %c0_i32_1 = arith.constant 0 : i32
    return %arg0, %c0_i32, %c0_i32_0 : i32, i32, i32
  }
}

module attributes {stable_mosaic.version = 11 : i64} {
  func.func @_finalize_kernel(%arg0: i32, %arg1: memref<1x16x16x32xf32, #tpu.memory_space<vmem>>, %arg2: memref<1x16x16x32xf32, #tpu.memory_space<vmem>>, %arg3: memref<2x32xf32, #tpu.memory_space<vmem>>, %arg4: memref<2x32xf32, #tpu.memory_space<vmem>>, %arg5: memref<1x16x16x32xf32, #tpu.memory_space<vmem>>) attributes {dimension_semantics = [#tpu.dimension_semantics<parallel>], iteration_bounds = array<i64: 2>, scalar_prefetch = 0 : i64, scratch_operands = 0 : i64, tpu.core_type = #tpu.core_type<tc>, window_params = [{transform_indices = @transform_0, window_bounds = array<i64: 1, 16, 16, 32>}, {transform_indices = @transform_1, window_bounds = array<i64: 1, 16, 16, 32>}, {pipeline_mode = #tpu.pipeline_mode<synchronous>, transform_indices = @transform_2, window_bounds = array<i64: 2, 32>}, {pipeline_mode = #tpu.pipeline_mode<synchronous>, transform_indices = @transform_3, window_bounds = array<i64: 2, 32>}, {transform_indices = @transform_4, window_bounds = array<i64: 1, 16, 16, 32>}]} {
    %c0 = arith.constant 0 : index
    %c0_0 = arith.constant 0 : index
    %0 = vector.load %arg3[%c0, %c0_0] : memref<2x32xf32, #tpu.memory_space<vmem>>, vector<1x32xf32>
    %1 = vector.shape_cast %0 : vector<1x32xf32> to vector<1x1x1x32xf32>
    %c1 = arith.constant 1 : index
    %c0_1 = arith.constant 0 : index
    %2 = vector.load %arg3[%c1, %c0_1] : memref<2x32xf32, #tpu.memory_space<vmem>>, vector<1x32xf32>
    %3 = vector.shape_cast %2 : vector<1x32xf32> to vector<1x1x1x32xf32>
    %c0_2 = arith.constant 0 : index
    %c0_3 = arith.constant 0 : index
    %4 = vector.load %arg4[%c0_2, %c0_3] : memref<2x32xf32, #tpu.memory_space<vmem>>, vector<1x32xf32>
    %5 = vector.shape_cast %4 : vector<1x32xf32> to vector<1x1x1x32xf32>
    %c1_4 = arith.constant 1 : index
    %c0_5 = arith.constant 0 : index
    %6 = vector.load %arg4[%c1_4, %c0_5] : memref<2x32xf32, #tpu.memory_space<vmem>>, vector<1x32xf32>
    %7 = vector.shape_cast %6 : vector<1x32xf32> to vector<1x1x1x32xf32>
    %c0_6 = arith.constant 0 : index
    %c0_7 = arith.constant 0 : index
    %c0_8 = arith.constant 0 : index
    %c0_9 = arith.constant 0 : index
    %8 = vector.load %arg1[%c0_6, %c0_7, %c0_8, %c0_9] : memref<1x16x16x32xf32, #tpu.memory_space<vmem>>, vector<1x16x16x32xf32>
    %9 = vector.broadcast %1 : vector<1x1x1x32xf32> to vector<1x16x16x32xf32>
    %10 = arith.mulf %8, %9 : vector<1x16x16x32xf32>
    %11 = vector.broadcast %3 : vector<1x1x1x32xf32> to vector<1x16x16x32xf32>
    %12 = arith.addf %10, %11 : vector<1x16x16x32xf32>
    %c0_10 = arith.constant 0 : index
    %c0_11 = arith.constant 0 : index
    %c0_12 = arith.constant 0 : index
    %c0_13 = arith.constant 0 : index
    %13 = vector.load %arg2[%c0_10, %c0_11, %c0_12, %c0_13] : memref<1x16x16x32xf32, #tpu.memory_space<vmem>>, vector<1x16x16x32xf32>
    %14 = vector.broadcast %5 : vector<1x1x1x32xf32> to vector<1x16x16x32xf32>
    %15 = arith.mulf %13, %14 : vector<1x16x16x32xf32>
    %16 = arith.addf %12, %15 : vector<1x16x16x32xf32>
    %17 = vector.broadcast %7 : vector<1x1x1x32xf32> to vector<1x16x16x32xf32>
    %18 = arith.addf %16, %17 : vector<1x16x16x32xf32>
    %c0_14 = arith.constant 0 : index
    %c0_15 = arith.constant 0 : index
    %c0_16 = arith.constant 0 : index
    %c0_17 = arith.constant 0 : index
    %19 = vector.load %arg5[%c0_14, %c0_15, %c0_16, %c0_17] : memref<1x16x16x32xf32, #tpu.memory_space<vmem>>, vector<1x16x16x32xf32>
    tpu.vector_store %arg5[%c0_14, %c0_15, %c0_16, %c0_17], %18 {strides = array<i32>} : memref<1x16x16x32xf32, #tpu.memory_space<vmem>>, vector<1x16x16x32xf32>,
    return
  }
  func.func @transform_0(%arg0: i32) -> (i32, i32, i32, i32) {
    %c0_i32 = arith.constant 0 : i32
    %c0_i32_0 = arith.constant 0 : i32
    %c0_i32_1 = arith.constant 0 : i32
    %c0_i32_2 = arith.constant 0 : i32
    return %arg0, %c0_i32, %c0_i32_0, %c0_i32_1 : i32, i32, i32, i32
  }
  func.func @transform_1(%arg0: i32) -> (i32, i32, i32, i32) {
    %c0_i32 = arith.constant 0 : i32
    %c0_i32_0 = arith.constant 0 : i32
    %c0_i32_1 = arith.constant 0 : i32
    %c0_i32_2 = arith.constant 0 : i32
    return %arg0, %c0_i32, %c0_i32_0, %c0_i32_1 : i32, i32, i32, i32
  }
  func.func @transform_2(%arg0: i32) -> (i32, i32) {
    %c0_i32 = arith.constant 0 : i32
    %c0_i32_0 = arith.constant 0 : i32
    %c0_i32_1 = arith.constant 0 : i32
    return %c0_i32, %c0_i32_0 : i32, i32
  }
  func.func @transform_3(%arg0: i32) -> (i32, i32) {
    %c0_i32 = arith.constant 0 : i32
    %c0_i32_0 = arith.constant 0 : i32
    %c0_i32_1 = arith.constant 0 : i32
    return %c0_i32, %c0_i32_0 : i32, i32
  }
  func.func @transform_4(%arg0: i32) -> (i32, i32, i32, i32) {
    %c0_i32 = arith.constant 0 : i32
    %c0_i32_0 = arith.constant 0 : i32
    %c0_i32_1 = arith.constant 0 : i32
    %c0_i32_2 = arith.constant 0 : i32
    return %arg0, %c0_i32, %c0_i32_0, %c0_i32_1 : i32, i32, i32, i32
  }
}

</mosaic_0001>

<bundles_post_ra>
// kernel: residual_block.5
= control target key start
LH: loop header
LB: loop body
LE: loop exit
PB: predicated region body
PF: predicated region fallthrough
CT: control target
= control target key end

     0   :  { %9 = vsyncpa [#allocation3], 0  ;;  %s1128_s0 = inlined_call_operand.vmem [shape: f32[2,16,16,32], index: 0, kind: input, shape index: {}]   ;;  %s1129_s1 = inlined_call_operand.vmem [shape: f32[2,16,16,32], index: 1, kind: input, shape index: {}]   ;;  %s1130_s2 = inlined_call_operand.vmem [shape: f32[2,32], index: 2, kind: input, shape index: {}]   ;;  %s1131_s3 = inlined_call_operand.vmem [shape: f32[2,32], index: 3, kind: input, shape index: {}]   ;;  %s1132_s4 = inlined_call_operand.hbm [shape: f32[2,16,16,32], index: 4, kind: output, shape index: {}]  }
   0x1   :  { %11 = vsyncpa [#allocation3 + $0x1], 0  ;;  %s733_s15 = smov 0   ;;  %s735_s16 = smov 0  }
   0x2   :  { %s737_s17 = smov 0   ;;  %s739_s18 = smov 0  }
   0x3 LB: > { %s754_s19 = sadd.s32 4294967295, %s703_s18   ;;  %s581_s20 = sadd.s32 4294967294, %s703_s18   ;;  %s703_s18 = sphi %s739_s18, %s1138_s18   ;;  %s699_s17 = sphi %s737_s17, %s1137_s17   ;;  %s695_s16 = sphi %s735_s16, %s1136_s16   ;;  %s691_s15 = sphi %s733_s15, %s1135_s15  }
   0x4   : > { %s758_s21 = sadd.s32 1, %s703_s18   ;;  %s118_s22 = sadd.s32 1, %s699_s17 }
   0x5   : > { %s115_s23 = ssub.s32 %s703_s18, %s758_s21  ;;  %p128_p0 = scmp.ne.s32.totalorder %s699_s17, %s695_s16 }
   0x6   : > { %p116_p1 = scmp.eq.s32.totalorder %s115_s23, 0  ;;  %p129_p2 = scmp.eq.s32.totalorder %s754_s19, 1 }
   0x7   : > { %p134_p3 = scmp.ne.s32.totalorder %s695_s16, %s691_s15  ;;  %p135_p4 = scmp.eq.s32.totalorder %s581_s20, 1 }
   0x8   : > { %s769_s24 = scalar_select %p116_p1, %s699_s17, %s118_s22  }
   0x9   : > { %p771_p5 = por %p129_p2, %p128_p0  ;;  %p775_p6 = por %p135_p4, %p134_p3 }
   0xa   : > { %p584_p7 = scmp.ge.s32.totalorder %s703_s18, 1  ;;  %p175_p8 = scmp.lt.s32.totalorder %s703_s18, 3 }
   0xc   : > { %p176_p9 = pnand %p584_p7, %p175_p8 }
   0xd   : > { %p206_p10 = scmp.lt.s32.totalorder (!%p176_p9), %s754_s19, 1  ;;  %s203_s20 = sand.u32 (!%p176_p9), 1, %s695_s16  }
   0xe   : > { %179 = sbr.rel (%p176_p9) target bundleno = 84 (0x54), region = 36  ;;  %s826_s22 = sshll.u32 (!%p176_p9), %s203_s20, 8 }
   0xf   : > { %s601_s29 = sshll.u32 (!%p176_p9), %s754_s19, 12 }
  0x10   : > { %s1077_s7 = scalar_lea.hbm (!%p176_p9), %s1132_s4, %s601_s29 }
  0x13   : > { %s207_s27 = scalar_select %p206_p10, %s754_s19, 1  ;;  %v786_v0 = vld [vmem:[%s1130_s2] ss:$0 sm:$0xff]  ;;  %v806_v2 = vld [vmem:[%s1130_s2 + $0x1] ss:$0 sm:$0xff]  ;;  %vm460_vm0 = vcmask 261120  }
  0x14   : > { %v791_v1 = vld [vmem:[%s1131_s3] ss:$0 sm:$0xff]  ;;  %v838_v25 = vld [vmem:[%s1131_s3 + $0x1] ss:$0 sm:$0xff]  ;;  %s1088_s19 = scalar_lea.sflag [#allocation3], %s203_s20 }
  0x15   : > { %s599_s28 = sshll.u32 %s207_s27, 8 }
  0x16   : > { %s796_s9 = scalar_lea.vmem %s1128_s0, %s599_s28  ;;  %s801_s12 = scalar_lea.vmem %s1129_s1, %s599_s28 }
  0x17   : > { %v220_v3 = vld [vmem:[%s796_s9] sm:$0xff]  ;;  %v221_v5 = vld [vmem:[%s796_s9 + $0x8] sm:$0xff]  ;;  %v222_v10 = vld [vmem:[%s796_s9 + $0x10] sm:$0xff]  ;;  %s863_s28 = scalar_lea.vmem [#allocation2], %s826_s22 }
  0x18   : > { %v324_v4 = vld [vmem:[%s801_s12] sm:$0xff]  ;;  %v256_v6 = vmul.f32 %v786_v0, %v220_v3  ;;  %v257_v8 = vmul.f32 %v786_v0, %v221_v5  ;;  %v325_v9 = vld [vmem:[%s801_s12 + $0x8] sm:$0xff]  ;;  %v326_v11 = vld [vmem:[%s801_s12 + $0x10] sm:$0xff]  ;;  %v258_v13 = vmul.f32 %v786_v0, %v222_v10  ;;  %s507_s30 = sshll.u32 %s863_s28, 4  ;;  %s1079_s30 = int_to_ptr.vmem [resolvable:$true] %s507_s30 }
  0x19   : > { %v360_v7 = vmul.f32 %v791_v1, %v324_v4  ;;  %v361_v12 = vmul.f32 %v791_v1, %v325_v9  ;;  %v362_v14 = vmul.f32 %v791_v1, %v326_v11  ;;  %v223_v15 = vld [vmem:[%s796_s9 + $0x18] sm:$0xff]  ;;  %v224_v17 = vld [vmem:[%s796_s9 + $0x20] sm:$0xff]  ;;  %v225_v23 = vld [vmem:[%s796_s9 + $0x28] sm:$0xff]  ;;  %s643_s8 = scalar_lea.vmem %s1079_s30, 4096 }
  0x1a   : > { %v327_v16 = vld [vmem:[%s801_s12 + $0x18] sm:$0xff]  ;;  %v292_v18 = vadd.f32 %v806_v2, %v256_v6  ;;  %v293_v19 = vadd.f32 %v806_v2, %v257_v8  ;;  %v259_v20 = vmul.f32 %v786_v0, %v223_v15  ;;  %v328_v22 = vld [vmem:[%s801_s12 + $0x20] sm:$0xff]  ;;  %v329_v24 = vld [vmem:[%s801_s12 + $0x28] sm:$0xff]  ;;  %v294_v26 = vadd.f32 %v806_v2, %v258_v13  ;;  %p644_p11 = scmp.ne.s32.totalorder %s1079_s30, %s643_s8 }
  0x1b   : > { %v363_v21 = vmul.f32 %v791_v1, %v327_v16  ;;  %v260_v27 = vmul.f32 %v786_v0, %v224_v17  ;;  %v364_v28 = vmul.f32 %v791_v1, %v328_v22  ;;  %v261_v29 = vmul.f32 %v786_v0, %v225_v23  ;;  %v226_v30 = vld [vmem:[%s796_s9 + $0x30] sm:$0xff]  ;;  %v227_v40 = vld [vmem:[%s796_s9 + $0x38] sm:$0xff]  ;;  %v228_v42 = vld [vmem:[%s796_s9 + $0x40] sm:$0xff] }
  0x1c   : > { %v330_v31 = vld [vmem:[%s801_s12 + $0x30] sm:$0xff]  ;;  %v392_v32 = vadd.f32 %v360_v7, %v292_v18  ;;  %v393_v33 = vadd.f32 %v361_v12, %v293_v19  ;;  %v295_v34 = vadd.f32 %v806_v2, %v259_v20  ;;  %v365_v35 = vmul.f32 %v791_v1, %v329_v24  ;;  %v331_v41 = vld [vmem:[%s801_s12 + $0x38] sm:$0xff]  ;;  %v332_v47 = vld [vmem:[%s801_s12 + $0x40] sm:$0xff]  ;;  %p645_p12 = pnand %p644_p11, %p771_p5 }
  0x1d   : > { %v394_v36 = vadd.f32 %v362_v14, %v294_v26  ;;  %v296_v37 = vadd.f32 %v806_v2, %v260_v27  ;;  %v297_v38 = vadd.f32 %v806_v2, %v261_v29  ;;  %v262_v39 = vmul.f32 %v786_v0, %v226_v30  ;;  %v229_v52 = vld [vmem:[%s796_s9 + $0x48] sm:$0xff]  ;;  %v230_v58 = vld [vmem:[%s796_s9 + $0x50] sm:$0xff]  ;;  %v231_v60 = vld [vmem:[%s796_s9 + $0x58] sm:$0xff] }
  0x1e   : > { %v428_v43 = vadd.f32 %v838_v25, %v392_v32  ;;  %v429_v44 = vadd.f32 %v838_v25, %v393_v33  ;;  %v395_v45 = vadd.f32 %v363_v21, %v295_v34  ;;  %v366_v46 = vmul.f32 %v791_v1, %v330_v31  ;;  %v333_v53 = vld [vmem:[%s801_s12 + $0x48] sm:$0xff]  ;;  %v334_v59 = vld [vmem:[%s801_s12 + $0x50] sm:$0xff]  ;;  %v335_v4 = vld [vmem:[%s801_s12 + $0x58] sm:$0xff]  ;;  %p646_p13 = pneg %p645_p12 }
  0x1f   : > { %v430_v48 = vadd.f32 %v838_v25, %v394_v36  ;;  %v396_v49 = vadd.f32 %v364_v28, %v296_v37  ;;  %v397_v50 = vadd.f32 %v365_v35, %v297_v38  ;;  %v298_v51 = vadd.f32 %v806_v2, %v262_v39  ;;  %v232_v9 = vld [vmem:[%s796_s9 + $0x60] sm:$0xff]  ;;  %v233_v15 = vld [vmem:[%s796_s9 + $0x68] sm:$0xff]  ;;  %v234_v26 = vld [vmem:[%s796_s9 + $0x70] sm:$0xff] }
  0x20   : > { %461 = vst.msk [vmem:[%s863_s28] sm:$0xff] %vm460_vm0, %v428_v43  ;;  %462 = vst.msk [vmem:[%s863_s28 + $0x8] sm:$0xff] %vm460_vm0, %v429_v44  ;;  %v431_v54 = vadd.f32 %v838_v25, %v395_v45  ;;  %v263_v55 = vmul.f32 %v786_v0, %v227_v40  ;;  %v367_v56 = vmul.f32 %v791_v1, %v331_v41  ;;  %v336_v10 = vld [vmem:[%s801_s12 + $0x60] sm:$0xff]  ;;  %v337_v20 = vld [vmem:[%s801_s12 + $0x68] sm:$0xff] }
  0x21   : > { %v264_v57 = vmul.f32 %v786_v0, %v228_v42  ;;  %463 = vst.msk [vmem:[%s863_s28 + $0x10] sm:$0xff] %vm460_vm0, %v430_v48  ;;  %v432_v61 = vadd.f32 %v838_v25, %v396_v49  ;;  %v433_v62 = vadd.f32 %v838_v25, %v397_v50  ;;  %v398_v63 = vadd.f32 %v366_v46, %v298_v51  ;;  %v338_v27 = vld [vmem:[%s801_s12 + $0x70] sm:$0xff]  ;;  %v235_v32 = vld [vmem:[%s796_s9 + $0x78] sm:$0xff]  ;;  %v236_v38 = vld [vmem:[%s796_s9 + $0x80] sm:$0xff] }
  0x22   : > { %v368_v3 = vmul.f32 %v791_v1, %v332_v47  ;;  %464 = vst.msk [vmem:[%s863_s28 + $0x18] sm:$0xff] %vm460_vm0, %v431_v54  ;;  %v299_v5 = vadd.f32 %v806_v2, %v263_v55  ;;  %v265_v7 = vmul.f32 %v786_v0, %v229_v52  ;;  %v369_v8 = vmul.f32 %v791_v1, %v333_v53  ;;  %v339_v37 = vld [vmem:[%s801_s12 + $0x78] sm:$0xff]  ;;  %v340_v43 = vld [vmem:[%s801_s12 + $0x80] sm:$0xff]  ;;  %v237_v44 = vld [vmem:[%s796_s9 + $0x88] sm:$0xff] }
  0x23   : > { %v300_v6 = vadd.f32 %v806_v2, %v264_v57  ;;  %465 = vst.msk [vmem:[%s863_s28 + $0x20] sm:$0xff] %vm460_vm0, %v432_v61  ;;  %466 = vst.msk [vmem:[%s863_s28 + $0x28] sm:$0xff] %vm460_vm0, %v433_v62  ;;  %v434_v11 = vadd.f32 %v838_v25, %v398_v63  ;;  %v266_v12 = vmul.f32 %v786_v0, %v230_v58  ;;  %v341_v49 = vld [vmem:[%s801_s12 + $0x88] sm:$0xff]  ;;  %v238_v54 = vld [vmem:[%s796_s9 + $0x90] sm:$0xff] }
  0x24   : > { %v370_v13 = vmul.f32 %v791_v1, %v334_v59  ;;  %v267_v14 = vmul.f32 %v786_v0, %v231_v60  ;;  %v399_v16 = vadd.f32 %v367_v56, %v299_v5  ;;  %v301_v18 = vadd.f32 %v806_v2, %v265_v7  ;;  %v342_v55 = vld [vmem:[%s801_s12 + $0x90] sm:$0xff]  ;;  %v239_v60 = vld [vmem:[%s796_s9 + $0x98] sm:$0xff]  ;;  %v240_v5 = vld [vmem:[%s796_s9 + $0xa0] sm:$0xff] }
  0x25   : > { %v400_v17 = vadd.f32 %v368_v3, %v300_v6  ;;  %v371_v19 = vmul.f32 %v791_v1, %v335_v4  ;;  %467 = vst.msk [vmem:[%s863_s28 + $0x30] sm:$0xff] %vm460_vm0, %v434_v11  ;;  %v302_v21 = vadd.f32 %v806_v2, %v266_v12  ;;  %v268_v23 = vmul.f32 %v786_v0, %v232_v9  ;;  %v343_v61 = vld [vmem:[%s801_s12 + $0x98] sm:$0xff]  ;;  %v241_v11 = vld [vmem:[%s796_s9 + $0xa8] sm:$0xff] }
  0x26   : > { %v303_v22 = vadd.f32 %v806_v2, %v267_v14  ;;  %v372_v24 = vmul.f32 %v791_v1, %v336_v10  ;;  %v435_v28 = vadd.f32 %v838_v25, %v399_v16  ;;  %v401_v30 = vadd.f32 %v369_v8, %v301_v18  ;;  %v344_v10 = vld [vmem:[%s801_s12 + $0xa0] sm:$0xff]  ;;  %v345_v16 = vld [vmem:[%s801_s12 + $0xa8] sm:$0xff] }
  0x27   : > { %v436_v29 = vadd.f32 %v838_v25, %v400_v17  ;;  %v269_v31 = vmul.f32 %v786_v0, %v233_v15  ;;  %v402_v33 = vadd.f32 %v370_v13, %v302_v21  ;;  %v304_v35 = vadd.f32 %v806_v2, %v268_v23  ;;  %v242_v21 = vld [vmem:[%s796_s9 + $0xb0] sm:$0xff] }
  0x28   : > { %v403_v34 = vadd.f32 %v371_v19, %v303_v22  ;;  %v373_v36 = vmul.f32 %v791_v1, %v337_v20  ;;  %468 = vst.msk [vmem:[%s863_s28 + $0x38] sm:$0xff] %vm460_vm0, %v435_v28  ;;  %v437_v39 = vadd.f32 %v838_v25, %v401_v30  ;;  %v270_v41 = vmul.f32 %v786_v0, %v234_v26  ;;  %v346_v22 = vld [vmem:[%s801_s12 + $0xb0] sm:$0xff]  ;;  %v243_v28 = vld [vmem:[%s796_s9 + $0xb8] sm:$0xff] }
  0x29   : > { %469 = vst.msk [vmem:[%s863_s28 + $0x40] sm:$0xff] %vm460_vm0, %v436_v29  ;;  %v305_v40 = vadd.f32 %v806_v2, %v269_v31  ;;  %v374_v42 = vmul.f32 %v791_v1, %v338_v27  ;;  %v438_v45 = vadd.f32 %v838_v25, %v402_v33  ;;  %v404_v47 = vadd.f32 %v372_v24, %v304_v35  ;;  %v347_v29 = vld [vmem:[%s801_s12 + $0xb8] sm:$0xff] }
  0x2a   : > { %v439_v46 = vadd.f32 %v838_v25, %v403_v34  ;;  %v271_v48 = vmul.f32 %v786_v0, %v235_v32  ;;  %470 = vst.msk [vmem:[%s863_s28 + $0x48] sm:$0xff] %vm460_vm0, %v437_v39  ;;  %v306_v51 = vadd.f32 %v806_v2, %v270_v41  ;;  %v375_v52 = vmul.f32 %v791_v1, %v339_v37  ;;  %v244_v34 = vld [vmem:[%s796_s9 + $0xc0] sm:$0xff] }
  0x2b   : > { %v405_v50 = vadd.f32 %v373_v36, %v305_v40  ;;  %v272_v53 = vmul.f32 %v786_v0, %v236_v38  ;;  %471 = vst.msk [vmem:[%s863_s28 + $0x50] sm:$0xff] %vm460_vm0, %v438_v45  ;;  %v440_v56 = vadd.f32 %v838_v25, %v404_v47  ;;  %v376_v58 = vmul.f32 %v791_v1, %v340_v43  ;;  %v348_v39 = vld [vmem:[%s801_s12 + $0xc0] sm:$0xff]  ;;  %v245_v40 = vld [vmem:[%s796_s9 + $0xc8] sm:$0xff] }
  0x2c   : > { %472 = vst.msk [vmem:[%s863_s28 + $0x58] sm:$0xff] %vm460_vm0, %v439_v46  ;;  %v307_v57 = vadd.f32 %v806_v2, %v271_v48  ;;  %v273_v59 = vmul.f32 %v786_v0, %v237_v44  ;;  %v406_v63 = vadd.f32 %v374_v42, %v306_v51  ;;  %v377_v4 = vmul.f32 %v791_v1, %v341_v49  ;;  %v349_v45 = vld [vmem:[%s801_s12 + $0xc8] sm:$0xff]  ;;  %v350_v51 = vld [vmem:[%s801_s12 + $0xd0] sm:$0xff] }
  0x2d   : > { %v441_v62 = vadd.f32 %v838_v25, %v405_v50  ;;  %v308_v3 = vadd.f32 %v806_v2, %v272_v53  ;;  %473 = vst.msk [vmem:[%s863_s28 + $0x60] sm:$0xff] %vm460_vm0, %v440_v56  ;;  %v274_v8 = vmul.f32 %v786_v0, %v238_v54  ;;  %v378_v9 = vmul.f32 %v791_v1, %v342_v55  ;;  %v246_v50 = vld [vmem:[%s796_s9 + $0xd0] sm:$0xff]  ;;  %v247_v56 = vld [vmem:[%s796_s9 + $0xd8] sm:$0xff] }
  0x2e   : > { %v407_v6 = vadd.f32 %v375_v52, %v307_v57  ;;  %v309_v7 = vadd.f32 %v806_v2, %v273_v59  ;;  %v442_v12 = vadd.f32 %v838_v25, %v406_v63  ;;  %v275_v14 = vmul.f32 %v786_v0, %v239_v60  ;;  %v351_v57 = vld [vmem:[%s801_s12 + $0xd8] sm:$0xff] }
  0x2f   : > { %474 = vst.msk [vmem:[%s863_s28 + $0x68] sm:$0xff] %vm460_vm0, %v441_v62  ;;  %v408_v13 = vadd.f32 %v376_v58, %v308_v3  ;;  %v379_v15 = vmul.f32 %v791_v1, %v343_v61  ;;  %v310_v19 = vadd.f32 %v806_v2, %v274_v8  ;;  %v276_v20 = vmul.f32 %v786_v0, %v240_v5  ;;  %v248_v62 = vld [vmem:[%s796_s9 + $0xe0] sm:$0xff] }
  0x30   : > { %v443_v17 = vadd.f32 %v838_v25, %v407_v6  ;;  %v409_v18 = vadd.f32 %v377_v4, %v309_v7  ;;  %475 = vst.msk [vmem:[%s863_s28 + $0x70] sm:$0xff] %vm460_vm0, %v442_v12  ;;  %v311_v24 = vadd.f32 %v806_v2, %v275_v14  ;;  %v380_v26 = vmul.f32 %v791_v1, %v344_v10  ;;  %v352_v6 = vld [vmem:[%s801_s12 + $0xe0] sm:$0xff]  ;;  %v249_v7 = vld [vmem:[%s796_s9 + $0xe8] sm:$0xff] }
  0x31   : > { %v444_v23 = vadd.f32 %v838_v25, %v408_v13  ;;  %v277_v27 = vmul.f32 %v786_v0, %v241_v11  ;;  %v410_v31 = vadd.f32 %v378_v9, %v310_v19  ;;  %v312_v32 = vadd.f32 %v806_v2, %v276_v20  ;;  %v353_v12 = vld [vmem:[%s801_s12 + $0xe8] sm:$0xff] }
  0x32   : > { %476 = vst.msk [vmem:[%s863_s28 + $0x78] sm:$0xff] %vm460_vm0, %v443_v17  ;;  %v445_v30 = vadd.f32 %v838_v25, %v409_v18  ;;  %v381_v33 = vmul.f32 %v791_v1, %v345_v16  ;;  %v411_v35 = vadd.f32 %v379_v15, %v311_v24  ;;  %v278_v37 = vmul.f32 %v786_v0, %v242_v21  ;;  %v250_v17 = vld [vmem:[%s796_s9 + $0xf0] sm:$0xff]  ;;  %v355_v24 = vld [vmem:[%s801_s12 + $0xf8] sm:$0xff] }
  0x33   : > { %477 = vst.msk [vmem:[%s863_s28 + $0x80] sm:$0xff] %vm460_vm0, %v444_v23  ;;  %v313_v36 = vadd.f32 %v806_v2, %v277_v27  ;;  %v382_v38 = vmul.f32 %v791_v1, %v346_v22  ;;  %v446_v41 = vadd.f32 %v838_v25, %v410_v31  ;;  %v412_v42 = vadd.f32 %v380_v26, %v312_v32  ;;  %v354_v18 = vld [vmem:[%s801_s12 + $0xf0] sm:$0xff]  ;;  %v251_v23 = vld [vmem:[%s796_s9 + $0xf8] sm:$0xff]  ;;  %s705_s9 = smov [#allocation2]  }
  0x34   : > { %478 = vst.msk [vmem:[%s863_s28 + $0x88] sm:$0xff] %vm460_vm0, %v445_v30  ;;  %v279_v43 = vmul.f32 %v786_v0, %v243_v28  ;;  %v383_v44 = vmul.f32 %v791_v1, %v347_v29  ;;  %v447_v46 = vadd.f32 %v838_v25, %v411_v35  ;;  %v314_v48 = vadd.f32 %v806_v2, %v278_v37  ;;  %s647_s10 = sshll.u32 %s705_s9, 4  ;;  %s648_s10 = int_to_ptr.vmem [resolvable:$false] %s647_s10 }
  0x35   : > { %v413_v47 = vadd.f32 %v381_v33, %v313_v36  ;;  %v280_v49 = vmul.f32 %v786_v0, %v244_v34  ;;  %479 = vst.msk [vmem:[%s863_s28 + $0x90] sm:$0xff] %vm460_vm0, %v446_v41  ;;  %v448_v52 = vadd.f32 %v838_v25, %v412_v42  ;;  %v384_v54 = vmul.f32 %v791_v1, %v348_v39  ;;  %s649_s11 = scalar_lea.vmem %s648_s10, 8192  ;;  %p650_p0 = scmp.lt.s32.totalorder %s1079_s30, %s648_s10 }
  0x36   : > { %v315_v53 = vadd.f32 %v806_v2, %v279_v43  ;;  %v281_v55 = vmul.f32 %v786_v0, %v245_v40  ;;  %480 = vst.msk [vmem:[%s863_s28 + $0x98] sm:$0xff] %vm460_vm0, %v447_v46  ;;  %v414_v59 = vadd.f32 %v382_v38, %v314_v48  ;;  %v385_v61 = vmul.f32 %v791_v1, %v349_v45  ;;  %p651_p1 = scmp.lt.s32.totalorder %s649_s11, %s643_s8 }
  0x37   : > { %v449_v58 = vadd.f32 %v838_v25, %v413_v47  ;;  %v316_v60 = vadd.f32 %v806_v2, %v280_v49  ;;  %481 = vst.msk [vmem:[%s863_s28 + $0xa0] sm:$0xff] %vm460_vm0, %v448_v52  ;;  %v282_v4 = vmul.f32 %v786_v0, %v246_v50  ;;  %v386_v5 = vmul.f32 %v791_v1, %v350_v51 }
  0x38   : > { %v415_v63 = vadd.f32 %v383_v44, %v315_v53  ;;  %v317_v3 = vadd.f32 %v806_v2, %v281_v55  ;;  %v450_v8 = vadd.f32 %v838_v25, %v414_v59  ;;  %v283_v10 = vmul.f32 %v786_v0, %v247_v56  ;;  %p652_p2 = por %p651_p1, %p650_p0 }
  0x39   : > { %482 = vst.msk [vmem:[%s863_s28 + $0xa8] sm:$0xff] %vm460_vm0, %v449_v58  ;;  %v416_v9 = vadd.f32 %v384_v54, %v316_v60  ;;  %v387_v11 = vmul.f32 %v791_v1, %v351_v57  ;;  %v318_v15 = vadd.f32 %v806_v2, %v282_v4  ;;  %v284_v16 = vmul.f32 %v786_v0, %v248_v62 }
  0x3a   : > { %v451_v13 = vadd.f32 %v838_v25, %v415_v63  ;;  %v417_v14 = vadd.f32 %v385_v61, %v317_v3  ;;  %483 = vst.msk [vmem:[%s863_s28 + $0xb0] sm:$0xff] %vm460_vm0, %v450_v8  ;;  %v319_v20 = vadd.f32 %v806_v2, %v283_v10  ;;  %v388_v21 = vmul.f32 %v791_v1, %v352_v6  ;;  %p653_p3 = pnand %p652_p2, %p646_p13 }
  0x3b   : > { %v452_v19 = vadd.f32 %v838_v25, %v416_v9  ;;  %v285_v22 = vmul.f32 %v786_v0, %v249_v7  ;;  %v418_v27 = vadd.f32 %v386_v5, %v318_v15  ;;  %v320_v28 = vadd.f32 %v806_v2, %v284_v16 }
  0x3c   : > { %484 = vst.msk [vmem:[%s863_s28 + $0xb8] sm:$0xff] %vm460_vm0, %v451_v13  ;;  %v453_v26 = vadd.f32 %v838_v25, %v417_v14  ;;  %v389_v29 = vmul.f32 %v791_v1, %v353_v12  ;;  %v419_v30 = vadd.f32 %v387_v11, %v319_v20  ;;  %v286_v32 = vmul.f32 %v786_v0, %v250_v17 }
  0x3d   : > { %485 = vst.msk [vmem:[%s863_s28 + $0xc0] sm:$0xff] %vm460_vm0, %v452_v19  ;;  %v321_v31 = vadd.f32 %v806_v2, %v285_v22  ;;  %v390_v33 = vmul.f32 %v791_v1, %v354_v18  ;;  %v454_v34 = vadd.f32 %v838_v25, %v418_v27  ;;  %v420_v35 = vadd.f32 %v388_v21, %v320_v28 }
  0x3e   : > { %486 = vst.msk [vmem:[%s863_s28 + $0xc8] sm:$0xff] %vm460_vm0, %v453_v26  ;;  %v287_v36 = vmul.f32 %v786_v0, %v251_v23  ;;  %v391_v37 = vmul.f32 %v791_v1, %v355_v24  ;;  %v455_v38 = vadd.f32 %v838_v25, %v419_v30  ;;  %v322_v40 = vadd.f32 %v806_v2, %v286_v32 }
  0x3f   : > { %v421_v39 = vadd.f32 %v389_v29, %v321_v31  ;;  %487 = vst.msk [vmem:[%s863_s28 + $0xd0] sm:$0xff] %vm460_vm0, %v454_v34  ;;  %v456_v41 = vadd.f32 %v838_v25, %v420_v35 }
  0x40   : > { %v323_v42 = vadd.f32 %v806_v2, %v287_v36  ;;  %488 = vst.msk [vmem:[%s863_s28 + $0xd8] sm:$0xff] %vm460_vm0, %v455_v38  ;;  %v422_v1 = vadd.f32 %v390_v33, %v322_v40 }
  0x41   : > { %v457_v0 = vadd.f32 %v838_v25, %v421_v39  ;;  %489 = vst.msk [vmem:[%s863_s28 + $0xe0] sm:$0xff] %vm460_vm0, %v456_v41 }
  0x42   : > { %v423_v43 = vadd.f32 %v391_v37, %v323_v42  ;;  %v458_v44 = vadd.f32 %v838_v25, %v422_v1 }
  0x43   : > { %490 = vst.msk [vmem:[%s863_s28 + $0xe8] sm:$0xff] %vm460_vm0, %v457_v0 }
  0x44   : > { %v459_v2 = vadd.f32 %v838_v25, %v423_v43  ;;  %491 = vst.msk [vmem:[%s863_s28 + $0xf0] sm:$0xff] %vm460_vm0, %v458_v44 }
  0x46   : > { %492 = vst.msk [vmem:[%s863_s28 + $0xf8] sm:$0xff] %vm460_vm0, %v459_v2 }
  0x47   : > { %656 = shalt.err (!%p653_p3)
}
  0x48   : > { %s657_s12 = scalar_lea.hbm %s1077_s7, 4096  ;;  %s661_s20 = scalar_lea.hbm %s1132_s4, 8192 }
  0x49   : > { %p658_p4 = scmp.ne.s32.totalorder %s1077_s7, %s657_s12  ;;  %p662_p9 = scmp.lt.s32.totalorder %s1077_s7, %s1132_s4 }
  0x4a   : > { %p663_p10 = scmp.lt.s32.totalorder %s661_s20, %s657_s12 }
  0x4b   : > { %p659_p7 = pnand %p658_p4, %p771_p5 }
  0x4c   : > { %p664_p11 = por %p663_p10, %p662_p9 }
  0x4d   : > { %p660_p8 = pneg %p659_p7 }
  0x4f   : > { %p665_p12 = pnand %p664_p11, %p660_p8 }
  0x51   : > { %668 = shalt.err (!%p665_p12)
}
  0x52   : > { %s706_s27 = smov 128   ;;  %s707_s28 = smov 8  }
  0x53   : > { %602 = dma.vmem_to_hbm [thread:$0]  (%p771_p5), %s1079_s30, 4096, %s1077_s7, %s1088_s19, %s706_s27, %s706_s27, %s707_s28  }
  0x54 PF: > { %p608_p13 = scmp.ge.s32.totalorder %s703_s18, 2  ;;  %s522_s29 = sand.u32 1, %s691_s15  }
  0x55   : > { %s523_s5 = scalar_lea.sflag [#allocation3], %s522_s29 }
  0x56   : > { %p605_p0 = pnand %p608_p13, %p775_p6 }
  0x58   : > { %p606_p1 = pneg %p605_p0 }
  0x5a   : > { %686 = dma.done.wait (%p606_p1), %s523_s5, 4096  }
  0x5b   : > { %688 = vsyncadd (%p606_p1), %s523_s5, 4294963200  ;;  %p14_p2 = scmp.ge.s32.totalorder %s758_s21, 4   ;;  %s1135_s15 = smov %s695_s16 }
  0x5c   : > { %s1136_s16 = smov %s699_s17  ;;  %s1137_s17 = smov %s769_s24 }
  0x5d   : > { %s1138_s18 = smov %s758_s21  ;;  %16 = sbr.rel (!%p14_p2) target bundleno = 3 (0x3), region = 74 }
  0x62   :  { %528 = vsyncpa [#allocation3], 1 }
  0x63   :  { %530 = vsyncpa [#allocation3 + $0x1], 1 }

// kernel: residual_block.4
= control target key start
LH: loop header
LB: loop body
LE: loop exit
PB: predicated region body
PF: predicated region fallthrough
CT: control target
= control target key end

     0   :  { %s3320_s15 = smov 0   ;;  %s4391_s0 = inlined_call_operand.vmem [shape: f32[2,16,16,32], index: 0, kind: input, shape index: {}]   ;;  %s4392_s1 = inlined_call_operand.vmem [shape: f32[2,32], index: 1, kind: input, shape index: {}]   ;;  %s4393_s2 = inlined_call_operand.vmem [shape: bf16[288,32], index: 2, kind: input, shape index: {}]   ;;  %s4394_s3 = inlined_call_operand.vmem [shape: f32[2,16,16,32], index: 3, kind: output, shape index: {0}]   ;;  %s4395_s4 = inlined_call_operand.vmem [shape: f32[2,2,32], index: 4, kind: output, shape index: {1}]  }
   0x1 LB: > { %s2541_s16 = sadd.s32 4294967295, %s3289_s15   ;;  %p2545_p0 = scmp.ge.s32.totalorder %s3289_s15, 1  ;;  %s3289_s15 = sphi %s3320_s15, %s15_s15  }
   0x2   : > { %p165_p1 = scmp.lt.s32.totalorder %s3289_s15, 3 }
   0x4   : > { %p166_p2 = pnand %p2545_p0, %p165_p1 }
   0x5   : > { %p195_p3 = scmp.lt.s32.totalorder (!%p166_p2), %s2541_s16, 1  ;;  %s3292_s9 = smov (!%p166_p2), 64  }
   0x6   : > { %169 = sbr.rel (%p166_p2) target bundleno = 594 (0x252), region = 32  ;;  %s3293_s10 = smov (!%p166_p2), 32  }
   0x7   : > { %s3294_s19 = smov (!%p166_p2), 96  }
   0xb   : > { %vm348_vm0 = vcmask 261120   ;;  %vm351_vm1 = vcmask 254976   ;;  %v3265_v0 = vld [vmem:[%s4393_s2 + $0x78] sm:$0xff]   ;;  %v3291_v1 = vmov 0.0   ;;  %s4397_s16 = smov (!%p195_p3, %s2541_s16), 1  ;;  %v3267_v4 = vld [vmem:[%s4393_s2 + $0x70] sm:$0xff]  }
   0xc   : > { %349 = vst.msk [vmem:[#allocation2] sm:$0xff] %vm348_vm0, %v3291_v1  ;;  %350 = vst.msk [vmem:[#allocation2 + $0x8] sm:$0xff] %vm348_vm0, %v3291_v1  ;;  %2591 = vmatprep.subr.bf16.mxu0 %v3265_v0  ;;  %2757 = vmatprep.subr.bf16.mxu1 %v3265_v0  ;;  %v3394_v2 = vld [vmem:[%s4392_s1] ss:$0 sm:$0xff]  ;;  %v3266_v3 = vld [vmem:[%s4393_s2 + $0x38] sm:$0xff]   ;;  %s2589_s25 = sshll.u32 %s4397_s16, 8 }
   0xd   : > { %352 = vst.msk [vmem:[#allocation2 + $0x10] sm:$0x3] %vm351_vm1, %v3291_v1  ;;  %355 = vst.msk [vmem:[#allocation2 + $0x28] sm:$0x3] %vm351_vm1, %v3291_v1  ;;  %v3406_v5 = vld [vmem:[%s4392_s1 + $0x1] ss:$0 sm:$0xff]  ;;  %2592 = vmatpush3.bf16.msra.mxu0 %v3266_v3  ;;  %2765 = vmatpush3.bf16.msra.mxu1 %v3266_v3  ;;  %s3416_s6 = scalar_lea.vmem %s4391_s0, %s2589_s25 }
   0xe   : > { %353 = vst.msk [vmem:[#allocation2 + $0x18] sm:$0xff] %vm348_vm0, %v3291_v1  ;;  %354 = vst.msk [vmem:[#allocation2 + $0x20] sm:$0xff] %vm348_vm0, %v3291_v1  ;;  %v3268_v6 = vld [vmem:[%s4393_s2 + $0x30] sm:$0xff]   ;;  %2593 = vmatprep.subr.bf16.mxu0 %v3267_v4  ;;  %v3269_v7 = vld [vmem:[%s4393_s2 + $0x68] sm:$0xff]   ;;  %2758 = vmatprep.subr.bf16.mxu1 %v3267_v4  ;;  %vm1526_vm2 = vcmask 523264   ;;  %vm1559_vm3 = vcmask 785408  }
   0xf   : > { %356 = vst.msk [vmem:[#allocation2 + $0x30] sm:$0xff] %vm348_vm0, %v3291_v1  ;;  %357 = vst.msk [vmem:[#allocation2 + $0x38] sm:$0xff] %vm348_vm0, %v3291_v1  ;;  %v214_v8 = vld [vmem:[%s3416_s6 + $0x10] sm:$0xff]  ;;  %v215_v9 = vld [vmem:[%s3416_s6 + $0x18] sm:$0xff]  ;;  %vm2351_vm4 = vcmask 253952  }
  0x10   : > { %358 = vst.msk [vmem:[#allocation2 + $0x40] sm:$0x3] %vm351_vm1, %v3291_v1  ;;  %361 = vst.msk [vmem:[#allocation2 + $0x58] sm:$0x3] %vm351_vm1, %v3291_v1  ;;  %v212_v10 = vld [vmem:[%s3416_s6] sm:$0xff]  ;;  %v250_v14 = vmul.f32 %v3394_v2, %v214_v8  ;;  %v251_v15 = vmul.f32 %v3394_v2, %v215_v9  ;;  %v213_v19 = vld [vmem:[%s3416_s6 + $0x8] sm:$0xff] }
  0x11   : > { %359 = vst.msk [vmem:[#allocation2 + $0x48] sm:$0xff] %vm348_vm0, %v3291_v1  ;;  %360 = vst.msk [vmem:[#allocation2 + $0x50] sm:$0xff] %vm348_vm0, %v3291_v1  ;;  %v248_v16 = vmul.f32 %v3394_v2, %v212_v10  ;;  %v216_v20 = vld [vmem:[%s3416_s6 + $0x20] sm:$0xff]  ;;  %2594 = vmatpush3.bf16.msra.mxu0 %v3268_v6  ;;  %2766 = vmatpush3.bf16.msra.mxu1 %v3268_v6  ;;  %v249_v24 = vmul.f32 %v3394_v2, %v213_v19  ;;  %v217_v25 = vld [vmem:[%s3416_s6 + $0x28] sm:$0xff] }
  0x12   : > { %362 = vst.msk [vmem:[#allocation2 + $0x60] sm:$0xff] %vm348_vm0, %v3291_v1  ;;  %363 = vst.msk [vmem:[#allocation2 + $0x68] sm:$0xff] %vm348_vm0, %v3291_v1  ;;  %v286_v22 = vadd.f32 %v3406_v5, %v250_v14  ;;  %v287_v23 = vadd.f32 %v3406_v5, %v251_v15  ;;  %v236_v26 = vld [vmem:[%s3416_s6 + $0xc0] sm:$0xff]  ;;  %v237_v27 = vld [vmem:[%s3416_s6 + $0xc8] sm:$0xff]  ;;  %2595 = vmatprep.subr.bf16.mxu0 %v3269_v7  ;;  %v252_v29 = vmul.f32 %v3394_v2, %v216_v20 }
  0x13   : > { %364 = vst.msk [vmem:[#allocation2 + $0x70] sm:$0x3] %vm351_vm1, %v3291_v1  ;;  %367 = vst.msk [vmem:[#allocation2 + $0x88] sm:$0x3] %vm351_vm1, %v3291_v1  ;;  %v501_v11 = vld [vmem:[#allocation2 + $0x2] sm:$0xff]  ;;  %v284_v28 = vadd.f32 %v3406_v5, %v248_v16  ;;  %v253_v30 = vmul.f32 %v3394_v2, %v217_v25  ;;  %v272_v31 = vmul.f32 %v3394_v2, %v236_v26  ;;  %v234_v32 = vld [vmem:[%s3416_s6 + $0xb0] sm:$0xff]  ;;  %2759 = vmatprep.subr.bf16.mxu1 %v3269_v7 }
  0x14   : > { %365 = vst.msk [vmem:[#allocation2 + $0x78] sm:$0xff] %vm348_vm0, %v3291_v1  ;;  %366 = vst.msk [vmem:[#allocation2 + $0x80] sm:$0xff] %vm348_vm0, %v3291_v1  ;;  %v502_v12 = vld [vmem:[#allocation2 + $0xa] sm:$0xff]  ;;  %v469_v13 = vld [vmem:[#allocation2 + $0x1] sm:$0xff]  ;;  %v318_v34 = vmax.f32 %v286_v22, 0.0  ;;  %v319_v35 = vmax.f32 %v287_v23, 0.0  ;;  %v285_v36 = vadd.f32 %v3406_v5, %v249_v24  ;;  %v273_v37 = vmul.f32 %v3394_v2, %v237_v27 }
  0x15   : > { %368 = vst.msk [vmem:[#allocation2 + $0x90] sm:$0xff] %vm348_vm0, %v3291_v1  ;;  %369 = vst.msk [vmem:[#allocation2 + $0x98] sm:$0xff] %vm348_vm0, %v3291_v1  ;;  %v2790_v17 = vpack.i.bf16 %v502_v12, %v501_v11  ;;  %v470_v18 = vld [vmem:[#allocation2 + $0x9] sm:$0xff]  ;;  %v235_v33 = vld [vmem:[%s3416_s6 + $0xb8] sm:$0xff]  ;;  %v316_v39 = vmax.f32 %v284_v28, 0.0  ;;  %v288_v40 = vadd.f32 %v3406_v5, %v252_v29  ;;  %v289_v41 = vadd.f32 %v3406_v5, %v253_v30 }
  0x16   : > { %370 = vst.msk [vmem:[#allocation2 + $0xa0] sm:$0x3] %vm351_vm1, %v3291_v1  ;;  %373 = vst.msk [vmem:[#allocation2 + $0xb8] sm:$0x3] %vm351_vm1, %v3291_v1  ;;  %v2785_v21 = vpack.i.bf16 %v470_v18, %v469_v13  ;;  %v238_v38 = vld [vmem:[%s3416_s6 + $0xd0] sm:$0xff]  ;;  %v308_v42 = vadd.f32 %v3406_v5, %v272_v31  ;;  %v239_v43 = vld [vmem:[%s3416_s6 + $0xd8] sm:$0xff]  ;;  %v309_v45 = vadd.f32 %v3406_v5, %v273_v37 }
  0x17   : > { %371 = vst.msk [vmem:[#allocation2 + $0xa8] sm:$0xff] %vm348_vm0, %v3291_v1  ;;  %372 = vst.msk [vmem:[#allocation2 + $0xb0] sm:$0xff] %vm348_vm0, %v3291_v1  ;;  %2791 = vrot.lane.b32.xlu1 %v2790_v17, %s3292_s9  ;;  %v317_v44 = vmax.f32 %v285_v36, 0.0  ;;  %v270_v46 = vmul.f32 %v3394_v2, %v234_v32  ;;  %v271_v47 = vmul.f32 %v3394_v2, %v235_v33  ;;  %v218_v48 = vld [vmem:[%s3416_s6 + $0x30] sm:$0xff]  ;;  %v219_v49 = vld [vmem:[%s3416_s6 + $0x38] sm:$0xff]  ;;  %v320_v51 = vmax.f32 %v288_v40, 0.0 }
  0x18   : > { %374 = vst.msk [vmem:[#allocation2 + $0xc0] sm:$0xff] %vm348_vm0, %v3291_v1  ;;  %375 = vst.msk [vmem:[#allocation2 + $0xc8] sm:$0xff] %vm348_vm0, %v3291_v1  ;;  %2786 = vrot.lane.b32.xlu0 %v2785_v21, %s3293_s10  ;;  %v240_v50 = vld [vmem:[%s3416_s6 + $0xe0] sm:$0xff]  ;;  %v321_v52 = vmax.f32 %v289_v41, 0.0  ;;  %v340_v53 = vmax.f32 %v308_v42, 0.0  ;;  %v274_v54 = vmul.f32 %v3394_v2, %v238_v38  ;;  %v241_v55 = vld [vmem:[%s3416_s6 + $0xe8] sm:$0xff]  ;;  %v275_v59 = vmul.f32 %v3394_v2, %v239_v43 }
  0x19   : > { %376 = vst.msk [vmem:[#allocation2 + $0xd0] sm:$0x3] %vm351_vm1, %v3291_v1  ;;  %379 = vst.msk [vmem:[#allocation2 + $0xe8] sm:$0x3] %vm351_vm1, %v3291_v1  ;;  %v341_v56 = vmax.f32 %v309_v45, 0.0  ;;  %v306_v57 = vadd.f32 %v3406_v5, %v270_v46  ;;  %v307_v58 = vadd.f32 %v3406_v5, %v271_v47  ;;  %v220_v60 = vld [vmem:[%s3416_s6 + $0x40] sm:$0xff]  ;;  %v254_v0 = vmul.f32 %v3394_v2, %v218_v48 }
  0x1a   : > { %377 = vst.msk [vmem:[#allocation2 + $0xd8] sm:$0xff] %vm348_vm0, %v3291_v1  ;;  %378 = vst.msk [vmem:[#allocation2 + $0xe0] sm:$0xff] %vm348_vm0, %v3291_v1  ;;  %v221_v61 = vld [vmem:[%s3416_s6 + $0x48] sm:$0xff]  ;;  %v242_v62 = vld [vmem:[%s3416_s6 + $0xf0] sm:$0xff]  ;;  %v310_v63 = vadd.f32 %v3406_v5, %v274_v54  ;;  %v276_v3 = vmul.f32 %v3394_v2, %v240_v50  ;;  %v311_v8 = vadd.f32 %v3406_v5, %v275_v59 }
  0x1b   : > { %380 = vst.msk [vmem:[#allocation2 + $0xf0] sm:$0xff] %vm348_vm0, %v3291_v1  ;;  %381 = vst.msk [vmem:[#allocation2 + $0xf8] sm:$0xff] %vm348_vm0, %v3291_v1  ;;  %v3270_v4 = vld [vmem:[%s4393_s2 + $0x28] sm:$0xff]   ;;  %v338_v6 = vmax.f32 %v306_v57, 0.0  ;;  %v339_v7 = vmax.f32 %v307_v58, 0.0  ;;  %v277_v9 = vmul.f32 %v3394_v2, %v241_v55  ;;  %v243_v10 = vld [vmem:[%s3416_s6 + $0xf8] sm:$0xff]  ;;  %v290_v13 = vadd.f32 %v3406_v5, %v254_v0 }
  0x1c   : > { %382 = vst.msk [vmem:[#allocation2 + $0x100] sm:$0x3] %vm351_vm1, %v3291_v1  ;;  %385 = vst.msk [vmem:[#allocation2 + $0x118] sm:$0x3] %vm351_vm1, %v3291_v1  ;;  %v3271_v11 = vld [vmem:[%s4393_s2 + $0x60] sm:$0xff]   ;;  %v342_v12 = vmax.f32 %v310_v63, 0.0  ;;  %v312_v15 = vadd.f32 %v3406_v5, %v276_v3  ;;  %2596 = vmatpush3.bf16.msra.mxu0 %v3270_v4  ;;  %2767 = vmatpush3.bf16.msra.mxu1 %v3270_v4  ;;  %v256_v19 = vmul.f32 %v3394_v2, %v220_v60 }
  0x1d   : > { %383 = vst.msk [vmem:[#allocation2 + $0x108] sm:$0xff] %vm348_vm0, %v3291_v1  ;;  %384 = vst.msk [vmem:[#allocation2 + $0x110] sm:$0xff] %vm348_vm0, %v3291_v1  ;;  %v3272_v16 = vld [vmem:[%s4393_s2 + $0x20] sm:$0xff]   ;;  %v343_v17 = vmax.f32 %v311_v8, 0.0  ;;  %v313_v18 = vadd.f32 %v3406_v5, %v277_v9  ;;  %v257_v20 = vmul.f32 %v3394_v2, %v221_v61  ;;  %v222_v21 = vld [vmem:[%s3416_s6 + $0x50] sm:$0xff]  ;;  %2597 = vmatprep.subr.bf16.mxu0 %v3271_v11  ;;  %2760 = vmatprep.subr.bf16.mxu1 %v3271_v11 }
  0x1e   : > { %386 = vst.msk [vmem:[#allocation2 + $0x120] sm:$0xff] %vm348_vm0, %v3291_v1  ;;  %387 = vst.msk [vmem:[#allocation2 + $0x128] sm:$0xff] %vm348_vm0, %v3291_v1  ;;  %v322_v24 = vmax.f32 %v290_v13, 0.0  ;;  %v344_v26 = vmax.f32 %v312_v15, 0.0  ;;  %v278_v27 = vmul.f32 %v3394_v2, %v242_v62  ;;  %v223_v28 = vld [vmem:[%s3416_s6 + $0x58] sm:$0xff]  ;;  %v258_v41 = vmul.f32 %v3394_v2, %v222_v21  ;;  %v224_v50 = vld [vmem:[%s3416_s6 + $0x60] sm:$0xff] }
  0x1f   : > { %388 = vst.msk [vmem:[#allocation2 + $0x130] sm:$0x3] %vm351_vm1, %v3291_v1  ;;  %391 = vst.msk [vmem:[#allocation2 + $0x148] sm:$0x3] %vm351_vm1, %v3291_v1  ;;  %v345_v33 = vmax.f32 %v313_v18, 0.0  ;;  %v225_v54 = vld [vmem:[%s3416_s6 + $0x68] sm:$0xff]  ;;  %v260_v61 = vmul.f32 %v3394_v2, %v224_v50 }
  0x20   : > { %389 = vst.msk [vmem:[#allocation2 + $0x138] sm:$0xff] %vm348_vm0, %v3291_v1  ;;  %390 = vst.msk [vmem:[#allocation2 + $0x140] sm:$0xff] %vm348_vm0, %v3291_v1  ;;  %v314_v40 = vadd.f32 %v3406_v5, %v278_v27  ;;  %2598 = vmatpush3.bf16.msra.mxu0 %v3272_v16  ;;  %2768 = vmatpush3.bf16.msra.mxu1 %v3272_v16  ;;  %v261_v62 = vmul.f32 %v3394_v2, %v225_v54  ;;  %v228_v54 = vld [vmem:[%s3416_s6 + $0x80] sm:$0xff] }
  0x21   : > { %392 = vst.msk [vmem:[#allocation2 + $0x150] sm:$0xff] %vm348_vm0, %v3291_v1  ;;  %393 = vst.msk [vmem:[#allocation2 + $0x158] sm:$0xff] %vm348_vm0, %v3291_v1 }
  0x22   : > { %394 = vst.msk [vmem:[#allocation2 + $0x160] sm:$0x3] %vm351_vm1, %v3291_v1  ;;  %397 = vst.msk [vmem:[#allocation2 + $0x178] sm:$0x3] %vm351_vm1, %v3291_v1 }
  0x23   : > { %395 = vst.msk [vmem:[#allocation2 + $0x168] sm:$0xff] %vm348_vm0, %v3291_v1  ;;  %396 = vst.msk [vmem:[#allocation2 + $0x170] sm:$0xff] %vm348_vm0, %v3291_v1 }
  0x24   : > { %398 = vst.msk [vmem:[#allocation2 + $0x180] sm:$0xff] %vm348_vm0, %v3291_v1  ;;  %399 = vst.msk [vmem:[#allocation2 + $0x188] sm:$0xff] %vm348_vm0, %v3291_v1 }
  0x25   : > { %400 = vst.msk [vmem:[#allocation2 + $0x190] sm:$0x3] %vm351_vm1, %v3291_v1  ;;  %403 = vst.msk [vmem:[#allocation2 + $0x1a8] sm:$0x3] %vm351_vm1, %v3291_v1 }
  0x26   : > { %401 = vst.msk [vmem:[#allocation2 + $0x198] sm:$0xff] %vm348_vm0, %v3291_v1  ;;  %402 = vst.msk [vmem:[#allocation2 + $0x1a0] sm:$0xff] %vm348_vm0, %v3291_v1  ;;  %v255_v1 = vmul.f32 %v3394_v2, %v219_v49  ;;  %v346_v49 = vmax.f32 %v314_v40, 0.0  ;;  %v3277_v40 = vld [vmem:[%s4393_s2 + $0x48] sm:$0xff]  }
  0x27   : > { %407 = vst.msk [vmem:[#allocation2 + $0x31] sm:$0xff] %vm348_vm0, %v318_v34  ;;  %408 = vst.msk [vmem:[#allocation2 + $0x39] sm:$0xff] %vm348_vm0, %v319_v35  ;;  %v292_v34 = vadd.f32 %v3406_v5, %v256_v19  ;;  %v293_v35 = vadd.f32 %v3406_v5, %v257_v20 }
  0x28   : > { %405 = vst.msk [vmem:[#allocation2 + $0x19] sm:$0xff] %vm348_vm0, %v316_v39  ;;  %406 = vst.msk [vmem:[#allocation2 + $0x21] sm:$0xff] %vm348_vm0, %v317_v44  ;;  %v291_v14 = vadd.f32 %v3406_v5, %v255_v1  ;;  %v279_v39 = vmul.f32 %v3394_v2, %v243_v10  ;;  %v296_v1 = vadd.f32 %v3406_v5, %v260_v61 }
  0x29   : > { %409 = vst.msk [vmem:[#allocation2 + $0x49] sm:$0xff] %vm348_vm0, %v320_v51  ;;  %410 = vst.msk [vmem:[#allocation2 + $0x51] sm:$0xff] %vm348_vm0, %v321_v52  ;;  %v324_v44 = vmax.f32 %v292_v34, 0.0  ;;  %v325_v45 = vmax.f32 %v293_v35, 0.0  ;;  %v259_v52 = vmul.f32 %v3394_v2, %v223_v28  ;;  %v3275_v34 = vld [vmem:[%s4393_s2 + $0x50] sm:$0xff]  }
  0x2a   : > { %429 = vst.msk [vmem:[#allocation2 + $0x139] sm:$0xff] %vm348_vm0, %v340_v53  ;;  %430 = vst.msk [vmem:[#allocation2 + $0x141] sm:$0xff] %vm348_vm0, %v341_v56  ;;  %v323_v25 = vmax.f32 %v291_v14, 0.0  ;;  %v315_v48 = vadd.f32 %v3406_v5, %v279_v39  ;;  %v294_v53 = vadd.f32 %v3406_v5, %v258_v41 }
  0x2b   : > { %427 = vst.msk [vmem:[#allocation2 + $0x121] sm:$0xff] %vm348_vm0, %v338_v6  ;;  %428 = vst.msk [vmem:[#allocation2 + $0x129] sm:$0xff] %vm348_vm0, %v339_v7  ;;  %v295_v59 = vadd.f32 %v3406_v5, %v259_v52  ;;  %v297_v6 = vadd.f32 %v3406_v5, %v261_v62  ;;  %v328_v7 = vmax.f32 %v296_v1, 0.0  ;;  %v231_v1 = vld [vmem:[%s3416_s6 + $0x98] sm:$0xff] }
  0x2c   : > { %431 = vst.msk [vmem:[#allocation2 + $0x151] sm:$0xff] %vm348_vm0, %v342_v12  ;;  %432 = vst.msk [vmem:[#allocation2 + $0x159] sm:$0xff] %vm348_vm0, %v343_v17  ;;  %v347_v57 = vmax.f32 %v315_v48, 0.0  ;;  %v326_v60 = vmax.f32 %v294_v53, 0.0 }
  0x2d   : > { %411 = vst.msk [vmem:[#allocation2 + $0x61] sm:$0xff] %vm348_vm0, %v322_v24  ;;  %412 = vst.msk [vmem:[#allocation2 + $0x69] sm:$0xff] %vm348_vm0, %v323_v25  ;;  %v327_v0 = vmax.f32 %v295_v59, 0.0  ;;  %v329_v8 = vmax.f32 %v297_v6, 0.0  ;;  %v3274_v25 = vld [vmem:[%s4393_s2 + $0x18] sm:$0xff]   ;;  %v264_v59 = vmul.f32 %v3394_v2, %v228_v54 }
  0x2e   : > { %v630_v22 = vld [vmem:[#allocation2 + $0x30] sm:$0xff]  ;;  %v631_v23 = vld [vmem:[#allocation2 + $0x38] sm:$0xff]  ;;  %433 = vst.msk [vmem:[#allocation2 + $0x169] sm:$0xff] %vm348_vm0, %v344_v26  ;;  %434 = vst.msk [vmem:[#allocation2 + $0x171] sm:$0xff] %vm348_vm0, %v345_v33 }
  0x2f   : > { %v3500_v29 = vpack.i.bf16 %v631_v23, %v630_v22  ;;  %v3502_v30 = vld [vmem:[#allocation2 + $0x31] sm:$0xff]  ;;  %v3504_v31 = vld [vmem:[#allocation2 + $0x39] sm:$0xff]  ;;  %v598_v37 = vld [vmem:[#allocation2 + $0x22] sm:$0xff]  ;;  %413 = vst.msk [vmem:[#allocation2 + $0x79] sm:$0xff] %vm348_vm0, %v324_v44 }
  0x30   : > { %v3506_v32 = vld [vmem:[#allocation2 + $0x18] sm:$0xff]  ;;  %v3511_v38 = vld [vmem:[#allocation2 + $0x20] sm:$0xff]  ;;  %v3533_v51 = vpack.i.bf16 %v3504_v31, %v3502_v30  ;;  %414 = vst.msk [vmem:[#allocation2 + $0x81] sm:$0xff] %vm348_vm0, %v325_v45  ;;  %435 = vst.msk [vmem:[#allocation2 + $0x181] sm:$0xff] %vm348_vm0, %v346_v49 }
  0x31   : > { %v597_v36 = vld [vmem:[#allocation2 + $0x1a] sm:$0xff]  ;;  %2801 = vrot.lane.b32.xlu1 %v3500_v29, %s3292_s9  ;;  %v2810_v43 = vpack.i.bf16 %v3511_v38, %v3506_v32  ;;  %v599_v55 = vld [vmem:[#allocation2 + $0x32] sm:$0xff]  ;;  %436 = vst.msk [vmem:[#allocation2 + $0x189] sm:$0xff] %vm348_vm0, %v347_v57  ;;  %415 = vst.msk [vmem:[#allocation2 + $0x91] sm:$0xff] %vm348_vm0, %v326_v60 }
  0x32   : > { %v2795_v42 = vpack.i.bf16 %v598_v37, %v597_v36  ;;  %v3524_v46 = vld [vmem:[#allocation2 + $0x19] sm:$0xff]  ;;  %v3526_v47 = vld [vmem:[#allocation2 + $0x21] sm:$0xff]  ;;  %v633_v4 = vld [vmem:[#allocation2 + $0x50] sm:$0xff]  ;;  %416 = vst.msk [vmem:[#allocation2 + $0x99] sm:$0xff] %vm348_vm0, %v327_v0 }
  0x33   : > { %v600_v56 = vld [vmem:[#allocation2 + $0x3a] sm:$0xff]  ;;  %v2820_v58 = vpack.i.bf16 %v3526_v47, %v3524_v46  ;;  %v632_v3 = vld [vmem:[#allocation2 + $0x48] sm:$0xff]  ;;  %417 = vst.msk [vmem:[#allocation2 + $0xa9] sm:$0xff] %vm348_vm0, %v328_v7  ;;  %v665_v11 = vld [vmem:[#allocation2 + $0x51] sm:$0xff]  ;;  %v267_v7 = vmul.f32 %v3394_v2, %v231_v1 }
  0x34   : > { %2796 = vrot.lane.b32.xlu0 %v2795_v42, %s3293_s10  ;;  %v3550_v63 = vpack.i.bf16 %v600_v56, %v599_v55  ;;  %v3559_v9 = vpack.i.bf16 %v633_v4, %v632_v3  ;;  %v664_v10 = vld [vmem:[#allocation2 + $0x49] sm:$0xff]  ;;  %418 = vst.msk [vmem:[#allocation2 + $0xb1] sm:$0xff] %vm348_vm0, %v329_v8  ;;  %v493_v12 = vld [vmem:[#allocation2 + $0x121] sm:$0xff]  ;;  %v655_v22 = vld [vmem:[#allocation2 + $0x158] sm:$0xff]  ;;  %v300_v3 = vadd.f32 %v3406_v5, %v264_v59 }
  0x35   : > { %2811 = vrot.lane.b32.xlu1 %v2810_v43, %s3294_s19  ;;  %v494_v13 = vld [vmem:[#allocation2 + $0x129] sm:$0xff]  ;;  %v3566_v14 = vpack.i.bf16 %v665_v11, %v664_v10  ;;  %v621_v15 = vld [vmem:[#allocation2 + $0x13a] sm:$0xff]  ;;  %v602_v27 = vld [vmem:[#allocation2 + $0x52] sm:$0xff] }
  0x36   : > { %v622_v16 = vld [vmem:[#allocation2 + $0x142] sm:$0xff]  ;;  %v2850_v17 = vpack.i.bf16 %v494_v13, %v493_v12  ;;  %v526_v19 = vld [vmem:[#allocation2 + $0x12a] sm:$0xff]  ;;  %v3273_v23 = vld [vmem:[%s4393_s2 + $0x58] sm:$0xff]  }
  0x37   : > { %v525_v18 = vld [vmem:[#allocation2 + $0x122] sm:$0xff]  ;;  %v3572_v20 = vpack.i.bf16 %v622_v16, %v621_v15  ;;  %v654_v21 = vld [vmem:[#allocation2 + $0x150] sm:$0xff]  ;;  %2599 = vmatprep.subr.bf16.mxu0 %v3273_v23  ;;  %2761 = vmatprep.subr.bf16.mxu1 %v3273_v23  ;;  %v557_v35 = vld [vmem:[#allocation2 + $0x138] sm:$0xff]  ;;  %v332_v15 = vmax.f32 %v300_v3, 0.0 }
  0x38   : > { %2806 = vrot.lane.b32.xlu0 %v3533_v51, %s3294_s19  ;;  %v2860_v24 = vpack.i.bf16 %v526_v19, %v525_v18  ;;  %v601_v26 = vld [vmem:[#allocation2 + $0x4a] sm:$0xff]  ;;  %v3583_v33 = vpack.i.bf16 %v655_v22, %v654_v21  ;;  %2600 = vmatpush3.bf16.msra.mxu0 %v3274_v25  ;;  %v558_v39 = vld [vmem:[#allocation2 + $0x140] sm:$0xff]  ;;  %v227_v44 = vld [vmem:[%s3416_s6 + $0x78] sm:$0xff]  ;;  %v303_v18 = vadd.f32 %v3406_v5, %v267_v7 }
  0x39   : > { %2821 = vrot.lane.b32.xlu1 %v2820_v58, %s3293_s10  ;;  %v686_v28 = vld [vmem:[#allocation2 + $0x151] sm:$0xff]  ;;  %2769 = vmatpush3.bf16.msra.mxu1 %v3274_v25  ;;  %v3599_v41 = vpack.i.bf16 %v602_v27, %v601_v26  ;;  %v263_v48 = vmul.f32 %v3394_v2, %v227_v44  ;;  %v3279_v49 = vld [vmem:[%s4393_s2 + $0x40] sm:$0xff]   ;;  %v2880_v50 = vpack.i.bf16 %v558_v39, %v557_v35  ;;  %v229_v55 = vld [vmem:[%s3416_s6 + $0x88] sm:$0xff] }
  0x3a   : > { %v3276_v36 = vld [vmem:[%s4393_s2 + $0x10] sm:$0xff]   ;;  %2601 = vmatprep.subr.bf16.mxu0 %v3275_v34  ;;  %2762 = vmatprep.subr.bf16.mxu1 %v3275_v34  ;;  %v634_v56 = vld [vmem:[#allocation2 + $0x60] sm:$0xff]  ;;  %v635_v57 = vld [vmem:[#allocation2 + $0x68] sm:$0xff]  ;;  %v265_v60 = vmul.f32 %v3394_v2, %v229_v55  ;;  %421 = vst.msk [vmem:[#allocation2 + $0xd9] sm:$0xff] %vm348_vm0, %v332_v15 }
  0x3b   : > { %v226_v43 = vld [vmem:[%s3416_s6 + $0x70] sm:$0xff]  ;;  %v299_v53 = vadd.f32 %v3406_v5, %v263_v48  ;;  %v3280_v58 = vld [vmem:[%s4393_s2] sm:$0xff]   ;;  %v233_v10 = vld [vmem:[%s3416_s6 + $0xa8] sm:$0xff]  ;;  %v3633_v11 = vpack.i.bf16 %v635_v57, %v634_v56 }
  0x3c   : > { %2816 = vrot.lane.b32.xlu0 %v3550_v63, %s3293_s10  ;;  %2602 = vmatpush3.bf16.msra.mxu0 %v3276_v36  ;;  %v262_v45 = vmul.f32 %v3394_v2, %v226_v43  ;;  %v230_v0 = vld [vmem:[%s3416_s6 + $0x90] sm:$0xff]  ;;  %v301_v4 = vadd.f32 %v3406_v5, %v265_v60  ;;  %v232_v8 = vld [vmem:[%s3416_s6 + $0xa0] sm:$0xff]  ;;  %v269_v13 = vmul.f32 %v3394_v2, %v233_v10  ;;  %v656_v35 = vld [vmem:[#allocation2 + $0x168] sm:$0xff] }
  0x3d   : > { %2831 = vrot.lane.b32.xlu1 %v2795_v42, %s3292_s9  ;;  %v3278_v42 = vld [vmem:[%s4393_s2 + $0x8] sm:$0xff]   ;;  %2603 = vmatprep.subr.bf16.mxu0 %v3277_v40  ;;  %v331_v62 = vmax.f32 %v299_v53, 0.0  ;;  %v266_v6 = vmul.f32 %v3394_v2, %v230_v0  ;;  %v268_v12 = vmul.f32 %v3394_v2, %v232_v8  ;;  %v636_v48 = vld [vmem:[#allocation2 + $0x78] sm:$0xff]  ;;  %v658_v56 = vld [vmem:[#allocation2 + $0x180] sm:$0xff] }
  0x3e   : > { %2770 = vmatpush3.bf16.msra.mxu1 %v3276_v36  ;;  %v298_v52 = vadd.f32 %v3406_v5, %v262_v45  ;;  %v333_v16 = vmax.f32 %v301_v4, 0.0  ;;  %v666_v19 = vld [vmem:[#allocation2 + $0x61] sm:$0xff]  ;;  %v667_v21 = vld [vmem:[#allocation2 + $0x69] sm:$0xff]  ;;  %v305_v23 = vadd.f32 %v3406_v5, %v269_v13  ;;  %v626_v55 = vld [vmem:[#allocation2 + $0x172] sm:$0xff] }
  0x3f   : > { %2763 = vmatprep.subr.bf16.mxu1 %v3277_v40  ;;  %420 = vst.msk [vmem:[#allocation2 + $0xc9] sm:$0xff] %vm348_vm0, %v331_v62  ;;  %v304_v22 = vadd.f32 %v3406_v5, %v268_v12  ;;  %v3651_v25 = vld [vmem:[#allocation2 + $0x141] sm:$0xff]  ;;  %v657_v36 = vld [vmem:[#allocation2 + $0x170] sm:$0xff]  ;;  %v639_v1 = vld [vmem:[#allocation2 + $0x98] sm:$0xff] }
  0x40   : > { %2826 = vrot.lane.b32.xlu0 %v3559_v9, %s3292_s9  ;;  %2604 = vmatpush3.bf16.msra.mxu0 %v3278_v42  ;;  %v330_v61 = vmax.f32 %v298_v52, 0.0  ;;  %422 = vst.msk [vmem:[#allocation2 + $0xe1] sm:$0xff] %vm348_vm0, %v333_v16  ;;  %v337_v27 = vmax.f32 %v305_v23, 0.0  ;;  %v688_v39 = vld [vmem:[#allocation2 + $0x169] sm:$0xff]  ;;  %v689_v40 = vld [vmem:[#allocation2 + $0x171] sm:$0xff]  ;;  %v668_v52 = vld [vmem:[#allocation2 + $0x79] sm:$0xff] }
  0x41   : > { %2841 = vrot.lane.b32.xlu1 %v3500_v29, %s3294_s19  ;;  %v687_v29 = vld [vmem:[#allocation2 + $0x159] sm:$0xff]  ;;  %2605 = vmatprep.subr.bf16.mxu0 %v3279_v49  ;;  %v336_v26 = vmax.f32 %v304_v22, 0.0  ;;  %v603_v43 = vld [vmem:[#allocation2 + $0x62] sm:$0xff]  ;;  %v604_v44 = vld [vmem:[#allocation2 + $0x6a] sm:$0xff] }
  0x42   : > { %v3592_v37 = vpack.i.bf16 %v687_v29, %v686_v28  ;;  %2771 = vmatpush3.bf16.msra.mxu1 %v3278_v42  ;;  %419 = vst.msk [vmem:[#allocation2 + $0xc1] sm:$0xff] %vm348_vm0, %v330_v61  ;;  %v2895_v28 = vpack.i.bf16 %v667_v21, %v666_v19  ;;  %426 = vst.msk [vmem:[#allocation2 + $0x111] sm:$0xff] %vm348_vm0, %v337_v27  ;;  %v2915_v42 = vpack.i.bf16 %v657_v36, %v656_v35  ;;  %v669_v53 = vld [vmem:[#allocation2 + $0x81] sm:$0xff]  ;;  %v625_v54 = vld [vmem:[#allocation2 + $0x16a] sm:$0xff] }
  0x43   : > { %2764 = vmatprep.subr.bf16.mxu1 %v3279_v49  ;;  %425 = vst.msk [vmem:[#allocation2 + $0x109] sm:$0xff] %vm348_vm0, %v336_v26  ;;  %v2925_v45 = vpack.i.bf16 %v604_v44, %v603_v43  ;;  %v637_v49 = vld [vmem:[#allocation2 + $0x80] sm:$0xff]  ;;  %v659_v57 = vld [vmem:[#allocation2 + $0x188] sm:$0xff]  ;;  %v638_v0 = vld [vmem:[#allocation2 + $0x90] sm:$0xff] }
  0x44   : > { %2836 = vrot.lane.b32.xlu0 %v3566_v14, %s3294_s19  ;;  %2606 = vmatpush3.bf16.msra.mxu0 %v3280_v58  ;;  %v605_v59 = vld [vmem:[#allocation2 + $0x7a] sm:$0xff]  ;;  %v606_v60 = vld [vmem:[#allocation2 + $0x82] sm:$0xff]  ;;  %v670_v3 = vld [vmem:[#allocation2 + $0x91] sm:$0xff] }
  0x45   : > { %2851 = vrot.lane.b32.xlu1 %v2850_v17, %s3293_s10  ;;  %v302_v17 = vadd.f32 %v3406_v5, %v266_v6  ;;  %v623_v5 = vld [vmem:[#allocation2 + $0x152] sm:$0xff]  ;;  %v2985_v62 = vpack.i.bf16 %v606_v60, %v605_v59  ;;  %v627_v7 = vld [vmem:[#allocation2 + $0x182] sm:$0xff]  ;;  %v628_v8 = vld [vmem:[#allocation2 + $0x18a] sm:$0xff] }
  0x46   : > { %2772 = vmatpush3.bf16.msra.mxu1 %v3280_v58  ;;  %v691_v58 = vld [vmem:[#allocation2 + $0x189] sm:$0xff]  ;;  %v671_v4 = vld [vmem:[#allocation2 + $0x99] sm:$0xff]  ;;  %v3025_v10 = vpack.i.bf16 %v628_v8, %v627_v7  ;;  %v693_v15 = vld [vmem:[#allocation2 + $0x1a1] sm:$0xff] }
  0x47   : > { %v334_v2 = vmax.f32 %v302_v17, 0.0  ;;  %v3015_v6 = vpack.i.bf16 %v671_v4, %v670_v3  ;;  %v661_v12 = vld [vmem:[#allocation2 + $0x1a0] sm:$0xff]  ;;  %v607_v17 = vld [vmem:[#allocation2 + $0x92] sm:$0xff]  ;;  %v3700_v21 = vld [vmem:[%s4393_s2 + $0x88] sm:$0xff]  }
  0x48   : > { %2846 = vrot.lane.b32.xlu0 %v3572_v20, %s3293_s10  ;;  %v692_v13 = vld [vmem:[#allocation2 + $0x199] sm:$0xff]  ;;  %2721 = vmatprep.subr.bf16.mxu1 %v3700_v21  ;;  %v640_v23 = vld [vmem:[#allocation2 + $0xa8] sm:$0xff]  ;;  %v673_v27 = vld [vmem:[#allocation2 + $0xb1] sm:$0xff] }
  0x49   : > { %2861 = vrot.lane.b32.xlu1 %v2860_v24, %s3292_s9  ;;  %v3649_v24 = vld [vmem:[#allocation2 + $0x139] sm:$0xff]  ;;  %423 = vst.msk [vmem:[#allocation2 + $0xf1] sm:$0xff] %vm348_vm0, %v334_v2  ;;  %v3050_v19 = vpack.i.bf16 %v693_v15, %v692_v13  ;;  %v641_v2 = vld [vmem:[#allocation2 + $0xb0] sm:$0xff] }
  0x4a   : > { %v2910_v29 = vpack.i.bf16 %v3651_v25, %v3649_v24  ;;  %v672_v26 = vld [vmem:[#allocation2 + $0xa9] sm:$0xff]  ;;  %v642_v44 = vld [vmem:[#allocation2 + $0xc0] sm:$0xff] }
  0x4b   : > { %v612_v13 = vld [vmem:[#allocation2 + $0xca] sm:$0xff] }
  0x4c   : > { %2856 = vrot.lane.b32.xlu0 %v3583_v33, %s3292_s9 }
  0x4d   : > { %2871 = vrot.lane.b32.xlu1 %v3592_v37, %s3294_s19 }
  0x50   : > { %2866 = vrot.lane.b32.xlu0 %v3599_v41, %s3293_s10 }
  0x51   : > { %2881 = vrot.lane.b32.xlu1 %v2880_v50, %s3294_s19  ;;  %v2945_v50 = vpack.i.bf16 %v637_v49, %v636_v48 }
  0x54   : > { %2876 = vrot.lane.b32.xlu0 %v3533_v51, %s3293_s10  ;;  %v335_v51 = vmax.f32 %v303_v18, 0.0  ;;  %v608_v18 = vld [vmem:[#allocation2 + $0x9a] sm:$0xff] }
  0x55   : > { %2891 = vrot.lane.b32.xlu1 %v3550_v63, %s3292_s9  ;;  %v624_v63 = vld [vmem:[#allocation2 + $0x15a] sm:$0xff]  ;;  %v3045_v22 = vpack.i.bf16 %v608_v18, %v607_v17 }
  0x56   : > { %424 = vst.msk [vmem:[#allocation2 + $0xf9] sm:$0xff] %vm348_vm0, %v335_v51  ;;  %v2905_v34 = vpack.i.bf16 %v624_v63, %v623_v5  ;;  %v3065_v51 = vpack.i.bf16 %v641_v2, %v640_v23  ;;  %v3710_v63 = vpack.i.bf16 %v673_v27, %v672_v26  ;;  %v644_v23 = vld [vmem:[#allocation2 + $0xd8] sm:$0xff]  ;;  %v645_v2 = vld [vmem:[#allocation2 + $0xe0] sm:$0xff] }
  0x58   : > { %2886 = vrot.lane.b32.xlu0 %v3633_v11, %s3292_s9 }
  0x59   : > { %2901 = vrot.lane.b32.xlu1 %v3559_v9, %s3294_s19  ;;  %v2930_v9 = vpack.i.bf16 %v689_v40, %v688_v39  ;;  %v438_v39 = vld [vmem:[#allocation2 + $0x8] sm:$0xff]  ;;  %v437_v40 = vld [vmem:[#allocation2] sm:$0xff] }
  0x5c   : > { %2896 = vrot.lane.b32.xlu0 %v2895_v28, %s3294_s19 }
  0x5d   : > { %2911 = vrot.lane.b32.xlu1 %v2910_v29, %s3293_s10  ;;  %v609_v29 = vld [vmem:[#allocation2 + $0xaa] sm:$0xff] }
  0x60   : > { %2906 = vrot.lane.b32.xlu0 %v2905_v34, %s3293_s10 }
  0x61   : > { %2921 = vrot.lane.b32.xlu1 %v3572_v20, %s3292_s9  ;;  %v2955_v20 = vpack.i.bf16 %v669_v53, %v668_v52 }
  0x64   : > { %2916 = vrot.lane.b32.xlu0 %v2915_v42, %s3292_s9 }
  0x65   : > { %2931 = vrot.lane.b32.xlu1 %v2930_v9, %s3294_s19 }
  0x68   : > { %2926 = vrot.lane.b32.xlu0 %v2925_v45, %s3293_s10 }
  0x69   : > { %2941 = vrot.lane.b32.xlu1 %v3583_v33, %s3294_s19  ;;  %v2965_v33 = vpack.i.bf16 %v626_v55, %v625_v54 }
  0x6c   : > { %2936 = vrot.lane.b32.xlu0 %v3566_v14, %s3293_s10  ;;  %v690_v14 = vld [vmem:[#allocation2 + $0x181] sm:$0xff] }
  0x6d   : > { %2951 = vrot.lane.b32.xlu1 %v3599_v41, %s3292_s9  ;;  %v2975_v41 = vpack.i.bf16 %v659_v57, %v658_v56  ;;  %v2990_v61 = vpack.i.bf16 %v691_v58, %v690_v14  ;;  %v674_v58 = vld [vmem:[#allocation2 + $0xc1] sm:$0xff] }
  0x70   : > { %2946 = vrot.lane.b32.xlu0 %v2945_v50, %s3292_s9 }
  0x71   : > { %2961 = vrot.lane.b32.xlu1 %v3633_v11, %s3294_s19  ;;  %v660_v11 = vld [vmem:[#allocation2 + $0x198] sm:$0xff] }
  0x72   : > { %v3035_v16 = vpack.i.bf16 %v661_v12, %v660_v11  ;;  %v611_v12 = vld [vmem:[#allocation2 + $0xc2] sm:$0xff] }
  0x73   : > { %v3744_v18 = vpack.i.bf16 %v612_v13, %v611_v12  ;;  %v678_v12 = vld [vmem:[#allocation2 + $0xf1] sm:$0xff]  ;;  %v679_v13 = vld [vmem:[#allocation2 + $0xf9] sm:$0xff] }
  0x74   : > { %2956 = vrot.lane.b32.xlu0 %v2955_v20, %s3294_s19 }
  0x75   : > { %2971 = vrot.lane.b32.xlu1 %v3592_v37, %s3293_s10  ;;  %v3005_v37 = vpack.i.bf16 %v639_v1, %v638_v0 }
  0x78   : > { %2966 = vrot.lane.b32.xlu0 %v2965_v33, %s3293_s10 }
  0x79   : > { %2981 = vrot.lane.b32.xlu1 %v2905_v34, %s3292_s9  ;;  %v610_v34 = vld [vmem:[#allocation2 + $0xb2] sm:$0xff] }
  0x7a   : > { %v3715_v43 = vpack.i.bf16 %v610_v34, %v609_v29 }
  0x7c   : > { %2976 = vrot.lane.b32.xlu0 %v2975_v41, %s3292_s9 }
  0x7d   : > { %2991 = vrot.lane.b32.xlu1 %v2990_v61, %s3294_s19 }
  0x80   : > { %2986 = vrot.lane.b32.xlu0 %v2985_v62, %s3293_s10 }
  0x81   : > { %3001 = vrot.lane.b32.xlu1 %v2915_v42, %s3294_s19 }
  0x84   : > { %2996 = vrot.lane.b32.xlu0 %v2895_v28, %s3293_s10 }
  0x85   : > { %3011 = vrot.lane.b32.xlu1 %v2925_v45, %s3292_s9 }
  0x88   : > { %3006 = vrot.lane.b32.xlu0 %v3005_v37, %s3292_s9 }
  0x89   : > { %3021 = vrot.lane.b32.xlu1 %v2945_v50, %s3294_s19  ;;  %v2792_v28 = vpop.permute.xlu1 %2791 }
  0x8a   : > { %v2787_v5 = vpop.permute.xlu0 %2786  ;;  %v2794_v45 = vunpack.i.h.bf16 %v2792_v28  ;;  %v2793_v48 = vunpack.i.l.bf16 %v2792_v28 }
  0x8b   : > { %v2789_v35 = vunpack.i.h.bf16 %v2787_v5  ;;  %v2788_v36 = vunpack.i.l.bf16 %v2787_v5 }
  0x8c   : > { %3016 = vrot.lane.b32.xlu0 %v3015_v6, %s3294_s19 }
  0x8d   : > { %3031 = vrot.lane.b32.xlu1 %v2930_v9, %s3293_s10  ;;  %v643_v9 = vld [vmem:[#allocation2 + $0xc8] sm:$0xff]  ;;  %v1495_v50 = vsel %vm348_vm0, %v438_v39, %v2789_v35  ;;  %v1494_v52 = vsel %vm348_vm0, %v437_v40, %v2788_v36  ;;  %v3750_v36 = vpack.i.bf16 %v645_v2, %v644_v23 }
  0x8e   : > { %v3722_v56 = vpack.i.bf16 %v643_v9, %v642_v44  ;;  %v1528_v0 = vsel %vm1526_vm2, %v1495_v50, %v2794_v45  ;;  %v676_v9 = vld [vmem:[#allocation2 + $0xd9] sm:$0xff]  ;;  %v677_v45 = vld [vmem:[#allocation2 + $0xe1] sm:$0xff] }
  0x90   : > { %3026 = vrot.lane.b32.xlu0 %v3025_v10, %s3293_s10 }
  0x91   : > { %3041 = vrot.lane.b32.xlu1 %v2965_v33, %s3292_s9 }
  0x94   : > { %3036 = vrot.lane.b32.xlu0 %v3035_v16, %s3292_s9 }
  0x95   : > { %3051 = vrot.lane.b32.xlu1 %v3050_v19, %s3294_s19 }
  0x98   : > { %3046 = vrot.lane.b32.xlu0 %v3045_v22, %s3293_s10 }
  0x99   : > { %3061 = vrot.lane.b32.xlu1 %v2975_v41, %s3294_s19  ;;  %v675_v41 = vld [vmem:[#allocation2 + $0xc9] sm:$0xff] }
  0x9c   : > { %3056 = vrot.lane.b32.xlu0 %v2955_v20, %s3293_s10 }
  0x9d   : > { %3071 = vrot.lane.b32.xlu1 %v2985_v62, %s3292_s9  ;;  %v1527_v62 = vsel %vm1526_vm2, %v1494_v52, %v2793_v48 }
  0xa0   : > { %3066 = vrot.lane.b32.xlu0 %v3065_v51, %s3292_s9 }
  0xa1   : > { %3081 = vrot.lane.b32.xlu1 %v3005_v37, %s3294_s19 }
  0xa3   : > { %v2802_v42 = vpop.permute.xlu1 %2801 }
  0xa4   : > { %3076 = vrot.lane.b32.xlu0 %v3710_v63, %s3294_s19  ;;  %v2804_v54 = vunpack.i.h.bf16 %v2802_v42  ;;  %v2803_v55 = vunpack.i.l.bf16 %v2802_v42 }
  0xa5   : > { %3091 = vrot.lane.b32.xlu1 %v3015_v6, %s3293_s10  ;;  %v3735_v6 = vpack.i.bf16 %v675_v41, %v674_v58  ;;  %v614_v58 = vld [vmem:[#allocation2 + $0xe2] sm:$0xff] }
  0xa6   : > { %v2797_v49 = vpop.permute.xlu0 %2796 }
  0xa7   : > { %v2799_v53 = vunpack.i.h.bf16 %v2797_v49  ;;  %v2798_v20 = vunpack.i.l.bf16 %v2797_v49  ;;  %v2812_v33 = vpop.permute.xlu1 %2811 }
  0xa8   : > { %3086 = vrot.lane.b32.xlu0 %v3715_v43, %s3293_s10  ;;  %v2814_v57 = vunpack.i.h.bf16 %v2812_v33  ;;  %v2813_v14 = vunpack.i.l.bf16 %v2812_v33 }
  0xa9   : > { %v1592_v59 = vsel %vm348_vm0, %v3524_v46, %v2798_v20  ;;  %v1593_v60 = vsel %vm348_vm0, %v3526_v47, %v2799_v53  ;;  %3101 = vrot.lane.b32.xlu1 %v3045_v22, %s3292_s9 }
  0xaa   : > { %v2807_v61 = vpop.permute.xlu0 %2806  ;;  %v1560_v3 = vsel %vm1559_vm3, %v1527_v62, %v2813_v14  ;;  %v1561_v4 = vsel %vm1559_vm3, %v1528_v0, %v2814_v57  ;;  %v1624_v47 = vsel %vm1526_vm2, %v1592_v59, %v2803_v55  ;;  %v1625_v7 = vsel %vm1526_vm2, %v1593_v60, %v2804_v54  ;;  %v613_v14 = vld [vmem:[#allocation2 + $0xda] sm:$0xff] }
  0xab   : > { %v2809_v1 = vunpack.i.h.bf16 %v2807_v61  ;;  %v2808_v37 = vunpack.i.l.bf16 %v2807_v61  ;;  %v2822_v46 = vpop.permute.xlu1 %2821  ;;  %v1688_v11 = vpack.c.bf16 %v1561_v4, %v1560_v3  ;;  %v3770_v55 = vpack.i.bf16 %v677_v45, %v676_v9 }
  0xac   : > { %3096 = vrot.lane.b32.xlu0 %v3722_v56, %s3292_s9  ;;  %v2824_v19 = vunpack.i.h.bf16 %v2822_v46  ;;  %v2823_v22 = vunpack.i.l.bf16 %v2822_v46  ;;  %v3778_v61 = vpack.i.bf16 %v614_v58, %v613_v14  ;;  %v570_v14 = vld [vmem:[#allocation2 + $0x51] sm:$0xff] }
  0xad   : > { %v1656_v8 = vsel %vm1559_vm3, %v1624_v47, %v2808_v37  ;;  %v1657_v10 = vsel %vm1559_vm3, %v1625_v7, %v2809_v1  ;;  %3111 = vrot.lane.b32.xlu1 %v3065_v51, %s3294_s19  ;;  %v646_v1 = vld [vmem:[#allocation2 + $0xf0] sm:$0xff]  ;;  %v647_v37 = vld [vmem:[#allocation2 + $0xf8] sm:$0xff] }
  0xae   : > { %v2817_v15 = vpop.permute.xlu0 %2816  ;;  %v1689_v16 = vpack.c.bf16 %v1657_v10, %v1656_v8  ;;  %v1496_v39 = vsel %vm348_vm0, %v3506_v32, %v2823_v22  ;;  %v1497_v40 = vsel %vm348_vm0, %v3511_v38, %v2824_v19  ;;  %v3784_v8 = vpack.i.bf16 %v647_v37, %v646_v1  ;;  %v3836_v37 = vld [vmem:[#allocation2 + $0x109] sm:$0xff] }
  0xaf   : > { %v2832_v17 = vpop.permute.xlu1 %2831  ;;  %v2819_v26 = vunpack.i.h.bf16 %v2817_v15  ;;  %v2818_v27 = vunpack.i.l.bf16 %v2817_v15 }
  0xb0   : > { %3106 = vrot.lane.b32.xlu0 %v3735_v6, %s3294_s19  ;;  %1960 = vmatprep.mubr.bf16.mxu0 %v1689_v16  ;;  %v2834_v5 = vunpack.i.h.bf16 %v2832_v17  ;;  %v2833_v29 = vunpack.i.l.bf16 %v2832_v17  ;;  %v3790_v16 = vld [vmem:[#allocation2 + $0x120] sm:$0xff]  ;;  %v3792_v17 = vld [vmem:[#allocation2 + $0x128] sm:$0xff] }
  0xb1   : > { %1961 = vmatmul.mubr.bf16.vlgmr.msra.gmra.mxu0 %v1688_v11  ;;  %3121 = vrot.lane.b32.xlu1 %v3710_v63, %s3293_s10  ;;  %v1595_v63 = vsel %vm348_vm0, %v3504_v31, %v2819_v26  ;;  %v1594_v48 = vsel %vm348_vm0, %v3502_v30, %v2818_v27 }
  0xb2   : > { %v2827_v28 = vpop.permute.xlu0 %2826  ;;  %v1529_v49 = vsel %vm1526_vm2, %v1496_v39, %v2833_v29  ;;  %v1530_v50 = vsel %vm1526_vm2, %v1497_v40, %v2834_v5  ;;  %v3810_v39 = vld [vmem:[#allocation2 + $0xfa] sm:$0xff] }
  0xb3   : > { %v2829_v51 = vunpack.i.h.bf16 %v2827_v28  ;;  %v2828_v34 = vunpack.i.l.bf16 %v2827_v28  ;;  %v2842_v35 = vpop.permute.xlu1 %2841  ;;  %v3802_v28 = vpack.i.bf16 %v679_v13, %v678_v12 }
  0xb4   : > { %3116 = vrot.lane.b32.xlu0 %v3744_v18, %s3293_s10  ;;  %v2844_v42 = vunpack.i.h.bf16 %v2842_v35  ;;  %v2843_v44 = vunpack.i.l.bf16 %v2842_v35  ;;  %v3808_v35 = vld [vmem:[#allocation2 + $0xf2] sm:$0xff] }
  0xb5   : > { %3131 = vrot.lane.b32.xlu1 %v3715_v43, %s3292_s9  ;;  %v1626_v54 = vsel %vm1526_vm2, %v1594_v48, %v2828_v34  ;;  %v1627_v31 = vsel %vm1526_vm2, %v1595_v63, %v2829_v51  ;;  %v3822_v48 = vpack.i.bf16 %v3810_v39, %v3808_v35 }
  0xb6   : > { %v2837_v52 = vpop.permute.xlu0 %2836  ;;  %v1562_v53 = vsel %vm1559_vm3, %v1529_v49, %v2843_v44  ;;  %v1563_v20 = vsel %vm1559_vm3, %v1530_v50, %v2844_v42  ;;  %v3282_v50 = vld [vmem:[%s4393_s2 + $0x80] sm:$0xff]  }
  0xb7   : > { %v2839_v32 = vunpack.i.h.bf16 %v2837_v52  ;;  %v2838_v38 = vunpack.i.l.bf16 %v2837_v52  ;;  %v2852_v30 = vpop.permute.xlu1 %2851  ;;  %v1691_v57 = vpack.c.bf16 %v1563_v20, %v1562_v53 }
  0xb8   : > { %3126 = vrot.lane.b32.xlu0 %v3750_v36, %s3292_s9  ;;  %v2854_v47 = vunpack.i.h.bf16 %v2852_v30 }
  0xb9   : > { %v1658_v33 = vsel %vm1559_vm3, %v1626_v54, %v2838_v38  ;;  %v1659_v43 = vsel %vm1559_vm3, %v1627_v31, %v2839_v32  ;;  %3141 = vrot.lane.b32.xlu1 %v3722_v56, %s3294_s19  ;;  %v2853_v56 = vunpack.i.l.bf16 %v2852_v30  ;;  %v648_v32 = vld [vmem:[#allocation2 + $0x108] sm:$0xff]  ;;  %v649_v38 = vld [vmem:[#allocation2 + $0x110] sm:$0xff]  ;;  %v442_v31 = vld [vmem:[#allocation2 + $0x38] sm:$0xff] }
  0xba   : > { %v2847_v41 = vpop.permute.xlu0 %2846  ;;  %v1692_v59 = vpack.c.bf16 %v1659_v43, %v1658_v33  ;;  %v1519_v29 = vsel %vm348_vm0, %v3792_v17, %v2854_v47  ;;  %v441_v54 = vld [vmem:[#allocation2 + $0x30] sm:$0xff] }
  0xbb   : > { %v2862_v60 = vpop.permute.xlu1 %2861  ;;  %v2849_v62 = vunpack.i.h.bf16 %v2847_v41  ;;  %v2848_v0 = vunpack.i.l.bf16 %v2847_v41 }
  0xbc   : > { %3136 = vrot.lane.b32.xlu0 %v3770_v55, %s3294_s19  ;;  %1968 = vmatprep.mubr.bf16.mxu0 %v1692_v59  ;;  %v2864_v19 = vunpack.i.h.bf16 %v2862_v60  ;;  %v2863_v22 = vunpack.i.l.bf16 %v2862_v60  ;;  %v3832_v60 = vpack.i.bf16 %v649_v38, %v648_v32  ;;  %v3880_v32 = vld [vmem:[#allocation2 + $0x121] sm:$0xff]  ;;  %v3884_v38 = vld [vmem:[#allocation2 + $0x138] sm:$0xff] }
  0xbd   : > { %1969 = vmatmul.mubr.bf16.gmra.mxu0 %v1691_v57  ;;  %3151 = vrot.lane.b32.xlu1 %v3735_v6, %s3293_s10  ;;  %v1616_v15 = vsel %vm348_vm0, %v3649_v24, %v2848_v0  ;;  %v1617_v6 = vsel %vm348_vm0, %v3651_v25, %v2849_v62  ;;  %v569_v57 = vld [vmem:[#allocation2 + $0x49] sm:$0xff] }
  0xbe   : > { %v2857_v3 = vpop.permute.xlu0 %2856  ;;  %v1552_v42 = vsel %vm1526_vm2, %v1519_v29, %v2864_v19 }
  0xbf   : > { %v2859_v4 = vunpack.i.h.bf16 %v2857_v3  ;;  %v2858_v46 = vunpack.i.l.bf16 %v2857_v3  ;;  %v2872_v7 = vpop.permute.xlu1 %2871  ;;  %v3838_v3 = vld [vmem:[#allocation2 + $0x111] sm:$0xff] }
  0xc0   : > { %3146 = vrot.lane.b32.xlu0 %v3778_v61, %s3293_s10  ;;  %v2874_v10 = vunpack.i.h.bf16 %v2872_v7  ;;  %v2873_v11 = vunpack.i.l.bf16 %v2872_v7  ;;  %v3854_v19 = vpack.i.bf16 %v3838_v3, %v3836_v37 }
  0xc1   : > { %3161 = vrot.lane.b32.xlu1 %v3744_v18, %s3292_s9  ;;  %v1648_v2 = vsel %vm1526_vm2, %v1616_v15, %v2858_v46  ;;  %v1649_v26 = vsel %vm1526_vm2, %v1617_v6, %v2859_v4  ;;  %v1518_v18 = vsel %vm348_vm0, %v3790_v16, %v2853_v56 }
  0xc2   : > { %v2867_v23 = vpop.permute.xlu0 %2866  ;;  %v1680_v27 = vsel %vm1559_vm3, %v1648_v2, %v2873_v11  ;;  %v1681_v24 = vsel %vm1559_vm3, %v1649_v26, %v2874_v10  ;;  %v1551_v40 = vsel %vm1526_vm2, %v1518_v18, %v2863_v22  ;;  %v3858_v2 = vld [vmem:[#allocation2 + $0x10a] sm:$0xff]  ;;  %v3860_v26 = vld [vmem:[#allocation2 + $0x112] sm:$0xff] }
  0xc3   : > { %v2882_v25 = vpop.permute.xlu1 %2881  ;;  %v1725_v5 = vpack.c.bf16 %v1681_v24, %v1680_v27  ;;  %v2869_v53 = vunpack.i.h.bf16 %v2867_v23  ;;  %v2868_v20 = vunpack.i.l.bf16 %v2867_v23 }
  0xc4   : > { %3156 = vrot.lane.b32.xlu0 %v3784_v8, %s3292_s9  ;;  %v2884_v51 = vunpack.i.h.bf16 %v2882_v25  ;;  %v2883_v34 = vunpack.i.l.bf16 %v2882_v25 }
  0xc5   : > { %3171 = vrot.lane.b32.xlu1 %v3750_v36, %s3294_s19  ;;  %2056 = vmatprep.mubr.bf16.mxu1 %v1725_v5  ;;  %v1596_v4 = vsel %vm348_vm0, %v569_v57, %v2868_v20  ;;  %v3868_v5 = vpack.i.bf16 %v3860_v26, %v3858_v2 }
  0xc6   : > { %v2877_v44 = vpop.permute.xlu0 %2876  ;;  %v1584_v9 = vsel %vm1559_vm3, %v1551_v40, %v2883_v34  ;;  %v1585_v45 = vsel %vm1559_vm3, %v1552_v42, %v2884_v51  ;;  %v591_v51 = vld [vmem:[#allocation2 + $0x151] sm:$0xff]  ;;  %v592_v34 = vld [vmem:[#allocation2 + $0x159] sm:$0xff] }
  0xc7   : > { %v2892_v63 = vpop.permute.xlu1 %2891  ;;  %v1724_v49 = vpack.c.bf16 %v1585_v45, %v1584_v9  ;;  %v2879_v52 = vunpack.i.h.bf16 %v2877_v44  ;;  %v2878_v36 = vunpack.i.l.bf16 %v2877_v44 }
  0xc8   : > { %3166 = vrot.lane.b32.xlu0 %v3802_v28, %s3294_s19  ;;  %v2894_v33 = vunpack.i.h.bf16 %v2892_v63  ;;  %v2893_v43 = vunpack.i.l.bf16 %v2892_v63  ;;  %v3876_v63 = vpack.i.bf16 %v3792_v17, %v3790_v16 }
  0xc9   : > { %3181 = vrot.lane.b32.xlu1 %v3770_v55, %s3293_s10  ;;  %2057 = vmatmul.mubr.bf16.vlgmr.msra.gmra.mxu1 %v1724_v49  ;;  %v1499_v62 = vsel %vm348_vm0, %v442_v31, %v2879_v52  ;;  %v1498_v0 = vsel %vm348_vm0, %v441_v54, %v2878_v36 }
  0xca   : > { %v2887_v30 = vpop.permute.xlu0 %2886  ;;  %2722 = vmatpush3.bf16.msra.mxu1 %v3700_v21  ;;  %v1597_v21 = vsel %vm348_vm0, %v570_v14, %v2869_v53  ;;  %v1532_v46 = vsel %vm1526_vm2, %v1499_v62, %v2894_v33  ;;  %v1531_v47 = vsel %vm1526_vm2, %v1498_v0, %v2893_v43  ;;  %v3886_v53 = vld [vmem:[#allocation2 + $0x140] sm:$0xff]  ;;  %v3904_v0 = vld [vmem:[#allocation2 + $0x12a] sm:$0xff] }
  0xcb   : > { %v2889_v58 = vunpack.i.h.bf16 %v2887_v30  ;;  %v2888_v41 = vunpack.i.l.bf16 %v2887_v30  ;;  %v2902_v59 = vpop.permute.xlu1 %2901  ;;  %2723 = vmatprep.subr.bf16.mxu1 %v3282_v50  ;;  %v3902_v62 = vld [vmem:[#allocation2 + $0x122] sm:$0xff] }
  0xcc   : > { %3176 = vrot.lane.b32.xlu0 %v3822_v48, %s3293_s10  ;;  %v2904_v1 = vunpack.i.h.bf16 %v2902_v59  ;;  %v2903_v55 = vunpack.i.l.bf16 %v2902_v59 }
  0xcd   : > { %3191 = vrot.lane.b32.xlu1 %v3778_v61, %s3292_s9  ;;  %v1628_v13 = vsel %vm1526_vm2, %v1596_v4, %v2888_v41  ;;  %v1629_v15 = vsel %vm1526_vm2, %v1597_v21, %v2889_v58 }
  0xce   : > { %v2897_v56 = vpop.permute.xlu0 %2896  ;;  %v1564_v11 = vsel %vm1559_vm3, %v1531_v47, %v2903_v55  ;;  %v1565_v12 = vsel %vm1559_vm3, %v1532_v46, %v2904_v1  ;;  %2724 = vmatpush3.bf16.msra.mxu1 %v3282_v50 }
  0xcf   : > { %v2899_v7 = vunpack.i.h.bf16 %v2897_v56  ;;  %v2898_v10 = vunpack.i.l.bf16 %v2897_v56  ;;  %v2912_v6 = vpop.permute.xlu1 %2911  ;;  %v1694_v23 = vpack.c.bf16 %v1565_v12, %v1564_v11  ;;  %v3235_v56 = vpack.i.bf16 %v3904_v0, %v3902_v62 }
  0xd0   : > { %3186 = vrot.lane.b32.xlu0 %v3832_v60, %s3292_s9  ;;  %v2914_v44 = vunpack.i.h.bf16 %v2912_v6  ;;  %v2913_v9 = vunpack.i.l.bf16 %v2912_v6  ;;  %v444_v6 = vld [vmem:[#allocation2 + $0x50] sm:$0xff] }
  0xd1   : > { %v1660_v61 = vsel %vm1559_vm3, %v1628_v13, %v2898_v10  ;;  %v1661_v22 = vsel %vm1559_vm3, %v1629_v15, %v2899_v7  ;;  %3201 = vrot.lane.b32.xlu1 %v3784_v8, %s3294_s19  ;;  %v443_v15 = vld [vmem:[#allocation2 + $0x48] sm:$0xff] }
  0xd2   : > { %v2907_v27 = vpop.permute.xlu0 %2906  ;;  %v1695_v24 = vpack.c.bf16 %v1661_v22, %v1660_v61  ;;  %v1521_v58 = vsel %vm348_vm0, %v3886_v53, %v2914_v44  ;;  %v1520_v41 = vsel %vm348_vm0, %v3884_v38, %v2913_v9  ;;  %v685_v44 = vld [vmem:[#allocation2 + $0x141] sm:$0xff] }
  0xd3   : > { %v2922_v25 = vpop.permute.xlu1 %2921  ;;  %v2909_v29 = vunpack.i.h.bf16 %v2907_v27  ;;  %v2908_v18 = vunpack.i.l.bf16 %v2907_v27  ;;  %v572_v27 = vld [vmem:[#allocation2 + $0x69] sm:$0xff] }
  0xd4   : > { %3196 = vrot.lane.b32.xlu0 %v3854_v19, %s3294_s19  ;;  %1976 = vmatprep.mubr.bf16.mxu0 %v1695_v24  ;;  %v2924_v16 = vunpack.i.h.bf16 %v2922_v25  ;;  %v2923_v17 = vunpack.i.l.bf16 %v2922_v25 }
  0xd5   : > { %1977 = vmatmul.mubr.bf16.gmra.mxu0 %v1694_v23  ;;  %3211 = vrot.lane.b32.xlu1 %v3802_v28, %s3293_s10  ;;  %v1619_v49 = vsel %vm348_vm0, %v592_v34, %v2909_v29  ;;  %v1618_v50 = vsel %vm348_vm0, %v591_v51, %v2908_v18  ;;  %v3882_v28 = vld [vmem:[#allocation2 + $0x129] sm:$0xff]  ;;  %v571_v23 = vld [vmem:[#allocation2 + $0x61] sm:$0xff]  ;;  %v3245_v18 = vpack.i.bf16 %v3886_v53, %v3884_v38 }
  0xd6   : > { %v2917_v40 = vpop.permute.xlu0 %2916  ;;  %v3225_v57 = vpack.i.bf16 %v3882_v28, %v3880_v32  ;;  %v1553_v1 = vsel %vm1526_vm2, %v1520_v41, %v2923_v17  ;;  %v1554_v55 = vsel %vm1526_vm2, %v1521_v58, %v2924_v16  ;;  %v593_v41 = vld [vmem:[#allocation2 + $0x169] sm:$0xff] }
  0xd7   : > { %v2919_v8 = vunpack.i.h.bf16 %v2917_v40  ;;  %v2918_v42 = vunpack.i.l.bf16 %v2917_v40  ;;  %v2932_v45 = vpop.permute.xlu1 %2931 }
  0xd8   : > { %3206 = vrot.lane.b32.xlu0 %v3868_v5, %s3293_s10  ;;  %v2934_v52 = vunpack.i.h.bf16 %v2932_v45  ;;  %v2933_v36 = vunpack.i.l.bf16 %v2932_v45 }
  0xd9   : > { %v1650_v20 = vsel %vm1526_vm2, %v1618_v50, %v2918_v42  ;;  %v1651_v54 = vsel %vm1526_vm2, %v1619_v49, %v2919_v8  ;;  %3221 = vrot.lane.b32.xlu1 %v3822_v48, %s3292_s9  ;;  %v684_v42 = vld [vmem:[#allocation2 + $0x139] sm:$0xff] }
  0xda   : > { %v2927_v31 = vpop.permute.xlu0 %2926  ;;  %v1682_v30 = vsel %vm1559_vm3, %v1650_v20, %v2933_v36  ;;  %v1683_v33 = vsel %vm1559_vm3, %v1651_v54, %v2934_v52  ;;  %v3255_v17 = vpack.i.bf16 %v685_v44, %v684_v42 }
  0xdb   : > { %v2942_v43 = vpop.permute.xlu1 %2941  ;;  %v1728_v14 = vpack.c.bf16 %v1683_v33, %v1682_v30  ;;  %v2929_v12 = vunpack.i.h.bf16 %v2927_v31  ;;  %v2928_v13 = vunpack.i.l.bf16 %v2927_v31 }
  0xdc   : > { %3216 = vrot.lane.b32.xlu0 %v3876_v63, %s3292_s9  ;;  %v2944_v59 = vunpack.i.h.bf16 %v2942_v43  ;;  %v2943_v48 = vunpack.i.l.bf16 %v2942_v43 }
  0xdd   : > { %3231 = vrot.lane.b32.xlu1 %v3832_v60, %s3294_s19  ;;  %2064 = vmatprep.mubr.bf16.mxu1 %v1728_v14  ;;  %v1598_v9 = vsel %vm348_vm0, %v571_v23, %v2928_v13 }
  0xde   : > { %v2937_v21 = vpop.permute.xlu0 %2936  ;;  %v1586_v4 = vsel %vm1559_vm3, %v1553_v1, %v2943_v48  ;;  %v1587_v46 = vsel %vm1559_vm3, %v1554_v55, %v2944_v59  ;;  %v594_v59 = vld [vmem:[#allocation2 + $0x171] sm:$0xff] }
  0xdf   : > { %v2952_v47 = vpop.permute.xlu1 %2951  ;;  %v1727_v7 = vpack.c.bf16 %v1587_v46, %v1586_v4  ;;  %v2939_v10 = vunpack.i.h.bf16 %v2937_v21  ;;  %v2938_v11 = vunpack.i.l.bf16 %v2937_v21 }
  0xe0   : > { %3226 = vrot.lane.b32.xlu0 %v3225_v57, %s3294_s19  ;;  %v2954_v60 = vunpack.i.h.bf16 %v2952_v47  ;;  %v2953_v22 = vunpack.i.l.bf16 %v2952_v47 }
  0xe1   : > { %3241 = vrot.lane.b32.xlu1 %v3854_v19, %s3293_s10  ;;  %2065 = vmatmul.mubr.bf16.gmra.mxu1 %v1727_v7  ;;  %v1501_v51 = vsel %vm348_vm0, %v444_v6, %v2939_v10  ;;  %v1500_v34 = vsel %vm348_vm0, %v443_v15, %v2938_v11  ;;  %v1599_v19 = vsel %vm348_vm0, %v572_v27, %v2929_v12  ;;  %v465_v10 = vld [vmem:[#allocation2 + $0x150] sm:$0xff]  ;;  %v466_v11 = vld [vmem:[#allocation2 + $0x158] sm:$0xff] }
  0xe2   : > { %v2947_v61 = vpop.permute.xlu0 %2946  ;;  %v1534_v45 = vsel %vm1526_vm2, %v1501_v51, %v2954_v60  ;;  %v1533_v49 = vsel %vm1526_vm2, %v1500_v34, %v2953_v22 }
  0xe3   : > { %v2949_v24 = vunpack.i.h.bf16 %v2947_v61  ;;  %v2948_v25 = vunpack.i.l.bf16 %v2947_v61  ;;  %v2962_v29 = vpop.permute.xlu1 %2961 }
  0xe4   : > { %3236 = vrot.lane.b32.xlu0 %v3235_v56, %s3293_s10  ;;  %v2964_v40 = vunpack.i.h.bf16 %v2962_v29  ;;  %v2963_v8 = vunpack.i.l.bf16 %v2962_v29 }
  0xe5   : > { %3251 = vrot.lane.b32.xlu1 %v3868_v5, %s3292_s9  ;;  %v1630_v20 = vsel %vm1526_vm2, %v1598_v9, %v2948_v25  ;;  %v1631_v54 = vsel %vm1526_vm2, %v1599_v19, %v2949_v24 }
  0xe6   : > { %v2957_v50 = vpop.permute.xlu0 %2956  ;;  %v1566_v38 = vsel %vm1559_vm3, %v1533_v49, %v2963_v8  ;;  %v1567_v53 = vsel %vm1559_vm3, %v1534_v45, %v2964_v40 }
  0xe7   : > { %v2959_v52 = vunpack.i.h.bf16 %v2957_v50  ;;  %v2958_v36 = vunpack.i.l.bf16 %v2957_v50  ;;  %v2972_v16 = vpop.permute.xlu1 %2971  ;;  %v1697_v33 = vpack.c.bf16 %v1567_v53, %v1566_v38 }
  0xe8   : > { %3246 = vrot.lane.b32.xlu0 %v3245_v18, %s3292_s9  ;;  %v2974_v21 = vunpack.i.h.bf16 %v2972_v16  ;;  %v2973_v4 = vunpack.i.l.bf16 %v2972_v16  ;;  %v574_v16 = vld [vmem:[#allocation2 + $0x81] sm:$0xff] }
  0xe9   : > { %v1662_v31 = vsel %vm1559_vm3, %v1630_v20, %v2958_v36  ;;  %v1663_v30 = vsel %vm1559_vm3, %v1631_v54, %v2959_v52  ;;  %3261 = vrot.lane.b32.xlu1 %v3876_v63, %s3294_s19  ;;  %v445_v52 = vld [vmem:[#allocation2 + $0x60] sm:$0xff]  ;;  %v446_v36 = vld [vmem:[#allocation2 + $0x68] sm:$0xff] }
  0xea   : > { %v2967_v5 = vpop.permute.xlu0 %2966  ;;  %v1698_v43 = vpack.c.bf16 %v1663_v30, %v1662_v31  ;;  %v1523_v24 = vsel %vm348_vm0, %v466_v11, %v2974_v21  ;;  %v1522_v25 = vsel %vm348_vm0, %v465_v10, %v2973_v4  ;;  %v573_v54 = vld [vmem:[#allocation2 + $0x79] sm:$0xff] }
  0xeb   : > { %v2982_v57 = vpop.permute.xlu1 %2981  ;;  %v2969_v14 = vunpack.i.h.bf16 %v2967_v5  ;;  %v2968_v58 = vunpack.i.l.bf16 %v2967_v5 }
  0xec   : > { %3256 = vrot.lane.b32.xlu0 %v3255_v17, %s3294_s19  ;;  %1984 = vmatprep.mubr.bf16.mxu0 %v1698_v43  ;;  %v2984_v15 = vunpack.i.h.bf16 %v2982_v57  ;;  %v2983_v6 = vunpack.i.l.bf16 %v2982_v57  ;;  %s4111_s19 = scalar_lea.vmem %s4394_s3, %s2589_s25  ;;  %s2550_s25 = sshll.u32 %s4397_s16, 1 }
  0xed   : > { %1985 = vmatmul.mubr.bf16.gmra.mxu0 %v1697_v33  ;;  %v1621_v47 = vsel %vm348_vm0, %v594_v59, %v2969_v14  ;;  %v1620_v63 = vsel %vm348_vm0, %v593_v41, %v2968_v58  ;;  %s208_s22 = scalar_lea.vmem %s4395_s4, %s2550_s25 }
  0xee   : > { %v2977_v48 = vpop.permute.xlu0 %2976  ;;  %v1555_v51 = vsel %vm1526_vm2, %v1522_v25, %v2983_v6  ;;  %v1556_v34 = vsel %vm1526_vm2, %v1523_v24, %v2984_v15 }
  0xef   : > { %v2979_v1 = vunpack.i.h.bf16 %v2977_v48  ;;  %v2978_v55 = vunpack.i.l.bf16 %v2977_v48  ;;  %v2992_v46 = vpop.permute.xlu1 %2991 }
  0xf0   : > { %v2994_v56 = vunpack.i.h.bf16 %v2992_v46  ;;  %v2993_v7 = vunpack.i.l.bf16 %v2992_v46 }
  0xf1   : > { %v1652_v12 = vsel %vm1526_vm2, %v1620_v63, %v2978_v55  ;;  %v1653_v13 = vsel %vm1526_vm2, %v1621_v47, %v2979_v1 }
  0xf2   : > { %v2987_v61 = vpop.permute.xlu0 %2986  ;;  %v1684_v60 = vsel %vm1559_vm3, %v1652_v12, %v2993_v7  ;;  %v1685_v22 = vsel %vm1559_vm3, %v1653_v13, %v2994_v56 }
  0xf3   : > { %v3002_v23 = vpop.permute.xlu1 %3001  ;;  %v1731_v27 = vpack.c.bf16 %v1685_v22, %v1684_v60  ;;  %v2989_v49 = vunpack.i.h.bf16 %v2987_v61  ;;  %v2988_v50 = vunpack.i.l.bf16 %v2987_v61  ;;  %v595_v61 = vld [vmem:[#allocation2 + $0x181] sm:$0xff]  ;;  %v596_v60 = vld [vmem:[#allocation2 + $0x189] sm:$0xff] }
  0xf4   : > { %v3004_v29 = vunpack.i.h.bf16 %v3002_v23  ;;  %v3003_v18 = vunpack.i.l.bf16 %v3002_v23 }
  0xf5   : > { %2072 = vmatprep.mubr.bf16.mxu1 %v1731_v27  ;;  %v1601_v14 = vsel %vm348_vm0, %v574_v16, %v2989_v49  ;;  %v1600_v58 = vsel %vm348_vm0, %v573_v54, %v2988_v50 }
  0xf6   : > { %v2997_v40 = vpop.permute.xlu0 %2996  ;;  %v1588_v8 = vsel %vm1559_vm3, %v1555_v51, %v3003_v18  ;;  %v1589_v42 = vsel %vm1559_vm3, %v1556_v34, %v3004_v29 }
  0xf7   : > { %v3012_v44 = vpop.permute.xlu1 %3011  ;;  %v1730_v19 = vpack.c.bf16 %v1589_v42, %v1588_v8  ;;  %v2999_v9 = vunpack.i.h.bf16 %v2997_v40  ;;  %v2998_v45 = vunpack.i.l.bf16 %v2997_v40  ;;  %v467_v8 = vld [vmem:[#allocation2 + $0x168] sm:$0xff]  ;;  %v468_v42 = vld [vmem:[#allocation2 + $0x170] sm:$0xff] }
  0xf8   : > { %v3014_v53 = vunpack.i.h.bf16 %v3012_v44  ;;  %v3013_v20 = vunpack.i.l.bf16 %v3012_v44 }
  0xf9   : > { %2073 = vmatmul.mubr.bf16.gmra.mxu1 %v1730_v19  ;;  %v1503_v33 = vsel %vm348_vm0, %v446_v36, %v2999_v9  ;;  %v1502_v5 = vsel %vm348_vm0, %v445_v52, %v2998_v45 }
  0xfa   : > { %v3007_v38 = vpop.permute.xlu0 %3006  ;;  %v1536_v41 = vsel %vm1526_vm2, %v1503_v33, %v3014_v53  ;;  %v1535_v59 = vsel %vm1526_vm2, %v1502_v5, %v3013_v20  ;;  %v694_v53 = vld [vmem:[#allocation2 + $0x32] sm:$0xff]  ;;  %v695_v20 = vld [vmem:[#allocation2 + $0x3a] sm:$0xff] }
  0xfb   : > { %v3009_v17 = vunpack.i.h.bf16 %v3007_v38  ;;  %v3008_v31 = vunpack.i.l.bf16 %v3007_v38  ;;  %v3022_v30 = vpop.permute.xlu1 %3021 }
  0xfc   : > { %v3024_v43 = vunpack.i.h.bf16 %v3022_v30  ;;  %v3023_v57 = vunpack.i.l.bf16 %v3022_v30 }
  0xfd   : > { %v1632_v46 = vsel %vm1526_vm2, %v1600_v58, %v3008_v31  ;;  %v1633_v47 = vsel %vm1526_vm2, %v1601_v14, %v3009_v17  ;;  %v1690_v14 = vpack.c.bf16 %v695_v20, %v694_v53  ;;  %v700_v20 = vld [vmem:[#allocation2 + $0x7a] sm:$0xff] }
  0xfe   : > { %v3017_v48 = vpop.permute.xlu0 %3016  ;;  %v1568_v21 = vsel %vm1559_vm3, %v1535_v59, %v3023_v57  ;;  %v1569_v4 = vsel %vm1559_vm3, %v1536_v41, %v3024_v43  ;;  %v696_v59 = vld [vmem:[#allocation2 + $0x4a] sm:$0xff] }
  0xff   : > { %v3019_v1 = vunpack.i.h.bf16 %v3017_v48  ;;  %v3018_v55 = vunpack.i.l.bf16 %v3017_v48  ;;  %v3032_v63 = vpop.permute.xlu1 %3031  ;;  %v1700_v10 = vpack.c.bf16 %v1569_v4, %v1568_v21  ;;  %v698_v21 = vld [vmem:[#allocation2 + $0x62] sm:$0xff]  ;;  %v699_v4 = vld [vmem:[#allocation2 + $0x6a] sm:$0xff] }
 0x100   : > { %v3034_v24 = vunpack.i.h.bf16 %v3032_v63  ;;  %v3033_v25 = vunpack.i.l.bf16 %v3032_v63  ;;  %v447_v63 = vld [vmem:[#allocation2 + $0x78] sm:$0xff] }
 0x101   : > { %v1664_v56 = vsel %vm1559_vm3, %v1632_v46, %v3018_v55  ;;  %v1665_v7 = vsel %vm1559_vm3, %v1633_v47, %v3019_v1  ;;  %v697_v55 = vld [vmem:[#allocation2 + $0x52] sm:$0xff] }
 0x102   : > { %v3027_v11 = vpop.permute.xlu0 %3026  ;;  %v1701_v12 = vpack.c.bf16 %v1665_v7, %v1664_v56  ;;  %v1525_v54 = vsel %vm348_vm0, %v468_v42, %v3034_v24  ;;  %v1524_v16 = vsel %vm348_vm0, %v467_v8, %v3033_v25  ;;  %v448_v56 = vld [vmem:[#allocation2 + $0x80] sm:$0xff] }
 0x103   : > { %v3042_v13 = vpop.permute.xlu1 %3041  ;;  %v3029_v15 = vunpack.i.h.bf16 %v3027_v11  ;;  %v3028_v6 = vunpack.i.l.bf16 %v3027_v11 }
 0x104   : > { %1992 = vmatprep.mubr.bf16.mxu0 %v1701_v12  ;;  %v3044_v9 = vunpack.i.h.bf16 %v3042_v13  ;;  %v3043_v45 = vunpack.i.l.bf16 %v3042_v13  ;;  %v575_v12 = vld [vmem:[#allocation2 + $0x91] sm:$0xff]  ;;  %v576_v13 = vld [vmem:[#allocation2 + $0x99] sm:$0xff] }
 0x105   : > { %1993 = vmatmul.mubr.bf16.gmra.mxu0 %v1700_v10  ;;  %v1623_v18 = vsel %vm348_vm0, %v596_v60, %v3029_v15  ;;  %v1622_v51 = vsel %vm348_vm0, %v595_v61, %v3028_v6  ;;  %v1693_v60 = vpack.c.bf16 %v697_v55, %v696_v59  ;;  %v578_v55 = vld [vmem:[#allocation2 + $0xb1] sm:$0xff] }
 0x106   : > { %v3037_v22 = vpop.permute.xlu0 %3036  ;;  %v1557_v30 = vsel %vm1526_vm2, %v1524_v16, %v3043_v45  ;;  %v1558_v33 = vsel %vm1526_vm2, %v1525_v54, %v3044_v9  ;;  %v701_v54 = vld [vmem:[#allocation2 + $0x82] sm:$0xff] }
 0x107   : > { %v3039_v23 = vunpack.i.h.bf16 %v3037_v22  ;;  %v3038_v27 = vunpack.i.l.bf16 %v3037_v22  ;;  %v3052_v29 = vpop.permute.xlu1 %3051  ;;  %v1696_v22 = vpack.c.bf16 %v699_v4, %v698_v21 }
 0x108   : > { %v3054_v34 = vunpack.i.h.bf16 %v3052_v29  ;;  %v3053_v40 = vunpack.i.l.bf16 %v3052_v29 }
 0x109   : > { %v1654_v44 = vsel %vm1526_vm2, %v1622_v51, %v3038_v27  ;;  %v1655_v19 = vsel %vm1526_vm2, %v1623_v18, %v3039_v23 }
 0x10a   : > { %v3047_v49 = vpop.permute.xlu0 %3046  ;;  %v1686_v50 = vsel %vm1559_vm3, %v1654_v44, %v3053_v40  ;;  %v1687_v52 = vsel %vm1559_vm3, %v1655_v19, %v3054_v34 }
 0x10b   : > { %v3062_v36 = vpop.permute.xlu1 %3061  ;;  %v1734_v38 = vpack.c.bf16 %v1687_v52, %v1686_v50  ;;  %v3049_v46 = vunpack.i.h.bf16 %v3047_v49  ;;  %v3048_v47 = vunpack.i.l.bf16 %v3047_v49 }
 0x10c   : > { %v3064_v17 = vunpack.i.h.bf16 %v3062_v36  ;;  %v3063_v31 = vunpack.i.l.bf16 %v3062_v36 }
 0x10d   : > { %2080 = vmatprep.mubr.bf16.mxu1 %v1734_v38  ;;  %v1603_v29 = vsel %vm348_vm0, %v576_v13, %v3049_v46  ;;  %v1602_v18 = vsel %vm348_vm0, %v575_v12, %v3048_v47 }
 0x10e   : > { %v3057_v5 = vpop.permute.xlu0 %3056  ;;  %v1590_v43 = vsel %vm1559_vm3, %v1557_v30, %v3063_v31  ;;  %v1591_v57 = vsel %vm1559_vm3, %v1558_v33, %v3064_v17  ;;  %v702_v17 = vld [vmem:[#allocation2 + $0x92] sm:$0xff]  ;;  %v703_v31 = vld [vmem:[#allocation2 + $0x9a] sm:$0xff] }
 0x10f   : > { %v3072_v58 = vpop.permute.xlu1 %3071  ;;  %v1733_v41 = vpack.c.bf16 %v1591_v57, %v1590_v43  ;;  %v3059_v48 = vunpack.i.h.bf16 %v3057_v5  ;;  %v3058_v1 = vunpack.i.l.bf16 %v3057_v5  ;;  %v1699_v5 = vpack.c.bf16 %v701_v54, %v700_v20  ;;  %v451_v54 = vld [vmem:[#allocation2 + $0xa8] sm:$0xff] }
 0x110   : > { %v3074_v10 = vunpack.i.h.bf16 %v3072_v58  ;;  %v3073_v11 = vunpack.i.l.bf16 %v3072_v58  ;;  %v450_v58 = vld [vmem:[#allocation2 + $0x98] sm:$0xff]  ;;  %v1702_v21 = vpack.c.bf16 %v703_v31, %v702_v17 }
 0x111   : > { %2081 = vmatmul.mubr.bf16.gmra.mxu1 %v1733_v41  ;;  %v1505_v23 = vsel %vm348_vm0, %v448_v56, %v3059_v48  ;;  %v1504_v27 = vsel %vm348_vm0, %v447_v63, %v3058_v1  ;;  %v577_v1 = vld [vmem:[#allocation2 + $0xa9] sm:$0xff] }
 0x112   : > { %v3067_v7 = vpop.permute.xlu0 %3066  ;;  %2725 = vmatprep.mubr.msk.bf16.mxu1 %vm348_vm0, %v1690_v14  ;;  %v1538_v51 = vsel %vm1526_vm2, %v1505_v23, %v3074_v10  ;;  %v1537_v34 = vsel %vm1526_vm2, %v1504_v27, %v3073_v11  ;;  %v449_v14 = vld [vmem:[#allocation2 + $0x90] sm:$0xff] }
 0x113   : > { %v3069_v15 = vunpack.i.h.bf16 %v3067_v7  ;;  %v3068_v6 = vunpack.i.l.bf16 %v3067_v7  ;;  %v3082_v61 = vpop.permute.xlu1 %3081  ;;  %v704_v27 = vld [vmem:[#allocation2 + $0xaa] sm:$0xff] }
 0x114   : > { %v3084_v24 = vunpack.i.h.bf16 %v3082_v61  ;;  %v3083_v25 = vunpack.i.l.bf16 %v3082_v61 }
 0x115   : > { %v1634_v9 = vsel %vm1526_vm2, %v1602_v18, %v3068_v6  ;;  %v1635_v45 = vsel %vm1526_vm2, %v1603_v29, %v3069_v15 }
 0x116   : > { %v3077_v40 = vpop.permute.xlu0 %3076  ;;  %v1570_v44 = vsel %vm1559_vm3, %v1537_v34, %v3083_v25  ;;  %v1571_v19 = vsel %vm1559_vm3, %v1538_v51, %v3084_v24  ;;  %v705_v24 = vld [vmem:[#allocation2 + $0xb2] sm:$0xff]  ;;  %v706_v51 = vld [vmem:[#allocation2 + $0xc2] sm:$0xff]  ;;  %v707_v34 = vld [vmem:[#allocation2 + $0xca] sm:$0xff] }
 0x117   : > { %v3079_v8 = vunpack.i.h.bf16 %v3077_v40  ;;  %v3078_v42 = vunpack.i.l.bf16 %v3077_v40  ;;  %v3092_v49 = vpop.permute.xlu1 %3091  ;;  %v1703_v36 = vpack.c.bf16 %v1571_v19, %v1570_v44 }
 0x118   : > { %v3094_v30 = vunpack.i.h.bf16 %v3092_v49  ;;  %v3093_v33 = vunpack.i.l.bf16 %v3092_v49 }
 0x119   : > { %v1666_v50 = vsel %vm1559_vm3, %v1634_v9, %v3078_v42  ;;  %v1667_v52 = vsel %vm1559_vm3, %v1635_v45, %v3079_v8  ;;  %2726 = vmatmul.mubr.msk.bf16.vlgmr.msra.gmra.mxu1 %vm348_vm0, %v1693_v60  ;;  %v1705_v9 = vpack.c.bf16 %v705_v24, %v704_v27  ;;  %v1708_v45 = vpack.c.bf16 %v707_v34, %v706_v51  ;;  %v454_v51 = vld [vmem:[#allocation2 + $0xc8] sm:$0xff] }
 0x11a   : > { %v3087_v38 = vpop.permute.xlu0 %3086  ;;  %v1704_v53 = vpack.c.bf16 %v1667_v52, %v1666_v50  ;;  %2729 = vmatprep.mubr.msk.bf16.mxu1 %vm348_vm0, %v1696_v22  ;;  %v1507_v63 = vsel %vm348_vm0, %v450_v58, %v3094_v30  ;;  %v1506_v56 = vsel %vm348_vm0, %v449_v14, %v3093_v33  ;;  %v579_v33 = vld [vmem:[#allocation2 + $0xc1] sm:$0xff]  ;;  %v1717_v24 = vpack.c.bf16 %v3860_v26, %v3858_v2 }
 0x11b   : > { %v3102_v16 = vpop.permute.xlu1 %3101  ;;  %v3089_v43 = vunpack.i.h.bf16 %v3087_v38  ;;  %v3088_v57 = vunpack.i.l.bf16 %v3087_v38  ;;  %v709_v38 = vld [vmem:[#allocation2 + $0xe2] sm:$0xff] }
 0x11c   : > { %2000 = vmatprep.mubr.bf16.mxu0 %v1704_v53  ;;  %v3104_v59 = vunpack.i.h.bf16 %v3102_v16  ;;  %v3103_v48 = vunpack.i.l.bf16 %v3102_v16  ;;  %v452_v16 = vld [vmem:[#allocation2 + $0xb0] sm:$0xff] }
 0x11d   : > { %2001 = vmatmul.mubr.bf16.gmra.mxu0 %v1703_v36  ;;  %v1605_v11 = vsel %vm348_vm0, %v578_v55, %v3089_v43  ;;  %v1604_v12 = vsel %vm348_vm0, %v577_v1, %v3088_v57  ;;  %v708_v36 = vld [vmem:[#allocation2 + $0xda] sm:$0xff] }
 0x11e   : > { %v3097_v41 = vpop.permute.xlu0 %3096  ;;  %v1539_v13 = vsel %vm1526_vm2, %v1506_v56, %v3103_v48  ;;  %v1540_v15 = vsel %vm1526_vm2, %v1507_v63, %v3104_v59  ;;  %v1711_v58 = vpack.c.bf16 %v709_v38, %v708_v36 }
 0x11f   : > { %v3099_v4 = vunpack.i.h.bf16 %v3097_v41  ;;  %v3098_v46 = vunpack.i.l.bf16 %v3097_v41  ;;  %v3112_v47 = vpop.permute.xlu1 %3111  ;;  %v1714_v41 = vpack.c.bf16 %v3810_v39, %v3808_v35 }
 0x120   : > { %v3114_v7 = vunpack.i.h.bf16 %v3112_v47  ;;  %v3113_v10 = vunpack.i.l.bf16 %v3112_v47 }
 0x121   : > { %2730 = vmatmul.mubr.msk.bf16.gmra.mxu1 %vm348_vm0, %v1699_v5  ;;  %v1636_v25 = vsel %vm1526_vm2, %v1604_v12, %v3098_v46  ;;  %v1637_v29 = vsel %vm1526_vm2, %v1605_v11, %v3099_v4  ;;  %v580_v5 = vld [vmem:[#allocation2 + $0xc9] sm:$0xff] }
 0x122   : > { %v3107_v6 = vpop.permute.xlu0 %3106  ;;  %v1572_v22 = vsel %vm1559_vm3, %v1539_v13, %v3113_v10  ;;  %v1573_v23 = vsel %vm1559_vm3, %v1540_v15, %v3114_v7  ;;  %2733 = vmatprep.mubr.msk.bf16.mxu1 %vm348_vm0, %v1702_v21 }
 0x123   : > { %v3109_v61 = vunpack.i.h.bf16 %v3107_v6  ;;  %v3108_v60 = vunpack.i.l.bf16 %v3107_v6  ;;  %v3122_v18 = vpop.permute.xlu1 %3121  ;;  %v1706_v42 = vpack.c.bf16 %v1573_v23, %v1572_v22 }
 0x124   : > { %v3124_v50 = vunpack.i.h.bf16 %v3122_v18  ;;  %v3123_v52 = vunpack.i.l.bf16 %v3122_v18  ;;  %v453_v18 = vld [vmem:[#allocation2 + $0xc0] sm:$0xff] }
 0x125   : > { %v1668_v40 = vsel %vm1559_vm3, %v1636_v25, %v3108_v60  ;;  %v1669_v8 = vsel %vm1559_vm3, %v1637_v29, %v3109_v61 }
 0x126   : > { %v3117_v44 = vpop.permute.xlu0 %3116  ;;  %v1707_v19 = vpack.c.bf16 %v1669_v8, %v1668_v40  ;;  %v1509_v59 = vsel %vm348_vm0, %v452_v16, %v3124_v50  ;;  %v1508_v48 = vsel %vm348_vm0, %v451_v54, %v3123_v52 }
 0x127   : > { %v3132_v49 = vpop.permute.xlu1 %3131  ;;  %v3119_v53 = vunpack.i.h.bf16 %v3117_v44  ;;  %v3118_v20 = vunpack.i.l.bf16 %v3117_v44  ;;  %v582_v44 = vld [vmem:[#allocation2 + $0xe1] sm:$0xff] }
 0x128   : > { %2008 = vmatprep.mubr.bf16.mxu0 %v1707_v19  ;;  %v3134_v31 = vunpack.i.h.bf16 %v3132_v49  ;;  %v3133_v30 = vunpack.i.l.bf16 %v3132_v49  ;;  %v1720_v19 = vpack.c.bf16 %v3904_v0, %v3902_v62 }
 0x129   : > { %2009 = vmatmul.mubr.bf16.gmra.mxu0 %v1706_v42  ;;  %2734 = vmatmul.mubr.msk.bf16.gmra.mxu1 %vm348_vm0, %v1705_v9  ;;  %v1607_v21 = vsel %vm348_vm0, %v580_v5, %v3119_v53  ;;  %v1606_v4 = vsel %vm348_vm0, %v579_v33, %v3118_v20  ;;  %v581_v42 = vld [vmem:[#allocation2 + $0xd9] sm:$0xff] }
 0x12a   : > { %v3127_v17 = vpop.permute.xlu0 %3126  ;;  %2737 = vmatprep.mubr.msk.bf16.mxu1 %vm348_vm0, %v1708_v45  ;;  %v1541_v46 = vsel %vm1526_vm2, %v1508_v48, %v3133_v30  ;;  %v1542_v47 = vsel %vm1526_vm2, %v1509_v59, %v3134_v31  ;;  %v716_v31 = vld [vmem:[#allocation2 + $0x13a] sm:$0xff]  ;;  %v717_v30 = vld [vmem:[#allocation2 + $0x142] sm:$0xff] }
 0x12b   : > { %v3129_v43 = vunpack.i.h.bf16 %v3127_v17  ;;  %v3128_v57 = vunpack.i.l.bf16 %v3127_v17  ;;  %v3142_v14 = vpop.permute.xlu1 %3141 }
 0x12c   : > { %v3144_v1 = vunpack.i.h.bf16 %v3142_v14  ;;  %v3143_v55 = vunpack.i.l.bf16 %v3142_v14  ;;  %v719_v14 = vld [vmem:[#allocation2 + $0x15a] sm:$0xff] }
 0x12d   : > { %v1638_v39 = vsel %vm1526_vm2, %v1606_v4, %v3128_v57  ;;  %v1639_v11 = vsel %vm1526_vm2, %v1607_v21, %v3129_v43  ;;  %v718_v57 = vld [vmem:[#allocation2 + $0x152] sm:$0xff] }
 0x12e   : > { %v3137_v63 = vpop.permute.xlu0 %3136  ;;  %v1574_v10 = vsel %vm1559_vm3, %v1541_v46, %v3143_v55  ;;  %v1575_v35 = vsel %vm1559_vm3, %v1542_v47, %v3144_v1  ;;  %v1723_v55 = vpack.c.bf16 %v717_v30, %v716_v31  ;;  %v1726_v21 = vpack.c.bf16 %v719_v14, %v718_v57  ;;  %v720_v46 = vld [vmem:[#allocation2 + $0x16a] sm:$0xff]  ;;  %v458_v57 = vld [vmem:[#allocation2 + $0xf8] sm:$0xff] }
 0x12f   : > { %v3139_v56 = vunpack.i.h.bf16 %v3137_v63  ;;  %v3138_v7 = vunpack.i.l.bf16 %v3137_v63  ;;  %v3152_v12 = vpop.permute.xlu1 %3151  ;;  %v1709_v6 = vpack.c.bf16 %v1575_v35, %v1574_v10  ;;  %v723_v10 = vld [vmem:[#allocation2 + $0x18a] sm:$0xff] }
 0x130   : > { %v3154_v23 = vunpack.i.h.bf16 %v3152_v12  ;;  %v3153_v27 = vunpack.i.l.bf16 %v3152_v12  ;;  %v456_v12 = vld [vmem:[#allocation2 + $0xe0] sm:$0xff] }
 0x131   : > { %v1670_v13 = vsel %vm1559_vm3, %v1638_v39, %v3138_v7  ;;  %v1671_v15 = vsel %vm1559_vm3, %v1639_v11, %v3139_v56  ;;  %2738 = vmatmul.mubr.msk.bf16.gmra.mxu1 %vm348_vm0, %v1711_v58  ;;  %v721_v56 = vld [vmem:[#allocation2 + $0x172] sm:$0xff]  ;;  %v722_v7 = vld [vmem:[#allocation2 + $0x182] sm:$0xff] }
 0x132   : > { %v3147_v61 = vpop.permute.xlu0 %3146  ;;  %v1710_v60 = vpack.c.bf16 %v1671_v15, %v1670_v13  ;;  %2741 = vmatprep.mubr.msk.bf16.mxu1 %vm348_vm0, %v1714_v41  ;;  %v1511_v50 = vsel %vm348_vm0, %v454_v51, %v3154_v23  ;;  %v1510_v52 = vsel %vm348_vm0, %v453_v18, %v3153_v27  ;;  %v455_v11 = vld [vmem:[#allocation2 + $0xd8] sm:$0xff] }
 0x133   : > { %v3162_v22 = vpop.permute.xlu1 %3161  ;;  %v3149_v25 = vunpack.i.h.bf16 %v3147_v61  ;;  %v3148_v29 = vunpack.i.l.bf16 %v3147_v61  ;;  %v583_v61 = vld [vmem:[#allocation2 + $0xf1] sm:$0xff] }
 0x134   : > { %2016 = vmatprep.mubr.bf16.mxu0 %v1710_v60  ;;  %v3164_v40 = vunpack.i.h.bf16 %v3162_v22  ;;  %v3163_v8 = vunpack.i.l.bf16 %v3162_v22  ;;  %v584_v60 = vld [vmem:[#allocation2 + $0xf9] sm:$0xff] }
 0x135   : > { %2017 = vmatmul.mubr.bf16.gmra.mxu0 %v1709_v6  ;;  %v1609_v36 = vsel %vm348_vm0, %v582_v44, %v3149_v25  ;;  %v1608_v38 = vsel %vm348_vm0, %v581_v42, %v3148_v29  ;;  %v1732_v25 = vpack.c.bf16 %v723_v10, %v722_v7 }
 0x136   : > { %v3157_v34 = vpop.permute.xlu0 %3156  ;;  %v1543_v53 = vsel %vm1526_vm2, %v1510_v52, %v3163_v8  ;;  %v1544_v20 = vsel %vm1526_vm2, %v1511_v50, %v3164_v40 }
 0x137   : > { %v3159_v9 = vunpack.i.h.bf16 %v3157_v34  ;;  %v3158_v45 = vunpack.i.l.bf16 %v3157_v34  ;;  %v3172_v49 = vpop.permute.xlu1 %3171 }
 0x138   : > { %v3174_v2 = vunpack.i.h.bf16 %v3172_v49  ;;  %v3173_v26 = vunpack.i.l.bf16 %v3172_v49 }
 0x139   : > { %2742 = vmatmul.mubr.msk.bf16.gmra.mxu1 %vm348_vm0, %v1717_v24  ;;  %v1640_v33 = vsel %vm1526_vm2, %v1608_v38, %v3158_v45  ;;  %v1641_v5 = vsel %vm1526_vm2, %v1609_v36, %v3159_v9  ;;  %v1729_v24 = vpack.c.bf16 %v721_v56, %v720_v46 }
 0x13a   : > { %v3167_v54 = vpop.permute.xlu0 %3166  ;;  %v1576_v16 = vsel %vm1559_vm3, %v1543_v53, %v3173_v26  ;;  %v1577_v17 = vsel %vm1559_vm3, %v1544_v20, %v3174_v2  ;;  %2745 = vmatprep.mubr.msk.bf16.mxu1 %vm348_vm0, %v1720_v19 }
 0x13b   : > { %v3169_v62 = vunpack.i.h.bf16 %v3167_v54  ;;  %v3168_v0 = vunpack.i.l.bf16 %v3167_v54  ;;  %v3182_v43 = vpop.permute.xlu1 %3181  ;;  %v1712_v59 = vpack.c.bf16 %v1577_v17, %v1576_v16 }
 0x13c   : > { %v3184_v47 = vunpack.i.h.bf16 %v3182_v43  ;;  %v3183_v63 = vunpack.i.l.bf16 %v3182_v43  ;;  %v457_v43 = vld [vmem:[#allocation2 + $0xf0] sm:$0xff] }
 0x13d   : > { %v1672_v58 = vsel %vm1559_vm3, %v1640_v33, %v3168_v0  ;;  %v1673_v41 = vsel %vm1559_vm3, %v1641_v5, %v3169_v62  ;;  %v724_v62 = vld [vmem:[#allocation2 + $0x19a] sm:$0xff]  ;;  %v725_v0 = vld [vmem:[#allocation2 + $0x1a2] sm:$0xff] }
 0x13e   : > { %v3177_v48 = vpop.permute.xlu0 %3176  ;;  %v1713_v1 = vpack.c.bf16 %v1673_v41, %v1672_v58  ;;  %v1513_v29 = vsel %vm348_vm0, %v456_v12, %v3184_v47  ;;  %v1512_v18 = vsel %vm348_vm0, %v455_v11, %v3183_v63  ;;  %v1735_v30 = vpack.c.bf16 %v725_v0, %v724_v62 }
 0x13f   : > { %v3192_v4 = vpop.permute.xlu1 %3191  ;;  %v3179_v35 = vunpack.i.h.bf16 %v3177_v48  ;;  %v3178_v39 = vunpack.i.l.bf16 %v3177_v48 }
 0x140   : > { %2024 = vmatprep.mubr.bf16.mxu0 %v1713_v1  ;;  %v3194_v15 = vunpack.i.h.bf16 %v3192_v4  ;;  %v3193_v6 = vunpack.i.l.bf16 %v3192_v4 }
 0x141   : > { %2025 = vmatmul.mubr.bf16.gmra.mxu0 %v1712_v59  ;;  %2746 = vmatmul.mubr.msk.bf16.gmra.mxu1 %vm348_vm0, %v1723_v55  ;;  %v1611_v40 = vsel %vm348_vm0, %v584_v60, %v3179_v35  ;;  %v1610_v8 = vsel %vm348_vm0, %v583_v61, %v3178_v39 }
 0x142   : > { %v3187_v13 = vpop.permute.xlu0 %3186  ;;  %2749 = vmatprep.mubr.msk.bf16.mxu1 %vm348_vm0, %v1726_v21  ;;  %v1545_v42 = vsel %vm1526_vm2, %v1512_v18, %v3193_v6  ;;  %v1546_v44 = vsel %vm1526_vm2, %v1513_v29, %v3194_v15  ;;  %v459_v18 = vld [vmem:[#allocation2 + $0x108] sm:$0xff] }
 0x143   : > { %v3189_v22 = vunpack.i.h.bf16 %v3187_v13  ;;  %v3188_v23 = vunpack.i.l.bf16 %v3187_v13  ;;  %v3202_v27 = vpop.permute.xlu1 %3201 }
 0x144   : > { %v3204_v51 = vunpack.i.h.bf16 %v3202_v27  ;;  %v3203_v34 = vunpack.i.l.bf16 %v3202_v27 }
 0x145   : > { %v1642_v52 = vsel %vm1526_vm2, %v1610_v8, %v3188_v23  ;;  %v1643_v2 = vsel %vm1526_vm2, %v1611_v40, %v3189_v22 }
 0x146   : > { %v3197_v19 = vpop.permute.xlu0 %3196  ;;  %v1578_v49 = vsel %vm1559_vm3, %v1545_v42, %v3203_v34  ;;  %v1579_v50 = vsel %vm1559_vm3, %v1546_v44, %v3204_v51  ;;  %v460_v51 = vld [vmem:[#allocation2 + $0x110] sm:$0xff] }
 0x147   : > { %v3199_v9 = vunpack.i.h.bf16 %v3197_v19  ;;  %v3198_v45 = vunpack.i.l.bf16 %v3197_v19  ;;  %v3212_v26 = vpop.permute.xlu1 %3211  ;;  %v1715_v53 = vpack.c.bf16 %v1579_v50, %v1578_v49 }
 0x148   : > { %v3214_v17 = vunpack.i.h.bf16 %v3212_v26  ;;  %v3213_v31 = vunpack.i.l.bf16 %v3212_v26 }
 0x149   : > { %v1674_v36 = vsel %vm1559_vm3, %v1642_v52, %v3198_v45  ;;  %v1675_v38 = vsel %vm1559_vm3, %v1643_v2, %v3199_v9  ;;  %2750 = vmatmul.mubr.msk.bf16.gmra.mxu1 %vm348_vm0, %v1729_v24 }
 0x14a   : > { %v3207_v20 = vpop.permute.xlu0 %3206  ;;  %v1716_v54 = vpack.c.bf16 %v1675_v38, %v1674_v36  ;;  %2753 = vmatprep.mubr.msk.bf16.mxu1 %vm348_vm0, %v1732_v25  ;;  %v1515_v55 = vsel %vm348_vm0, %v458_v57, %v3214_v17  ;;  %v1514_v21 = vsel %vm348_vm0, %v457_v43, %v3213_v31 }
 0x14b   : > { %v3222_v16 = vpop.permute.xlu1 %3221  ;;  %v3209_v33 = vunpack.i.h.bf16 %v3207_v20  ;;  %v3208_v5 = vunpack.i.l.bf16 %v3207_v20 }
 0x14c   : > { %2032 = vmatprep.mubr.bf16.mxu0 %v1716_v54  ;;  %v3224_v58 = vunpack.i.h.bf16 %v3222_v16  ;;  %v3223_v41 = vunpack.i.l.bf16 %v3222_v16 }
 0x14d   : > { %2033 = vmatmul.mubr.bf16.gmra.mxu0 %v1715_v53  ;;  %v1613_v47 = vsel %vm348_vm0, %v3838_v3, %v3209_v33  ;;  %v1612_v63 = vsel %vm348_vm0, %v3836_v37, %v3208_v5 }
 0x14e   : > { %v3217_v14 = vpop.permute.xlu0 %3216  ;;  %v1547_v56 = vsel %vm1526_vm2, %v1514_v21, %v3223_v41  ;;  %v1548_v7 = vsel %vm1526_vm2, %v1515_v55, %v3224_v58 }
 0x14f   : > { %v3219_v59 = vunpack.i.h.bf16 %v3217_v14  ;;  %v3218_v48 = vunpack.i.l.bf16 %v3217_v14  ;;  %v3232_v1 = vpop.permute.xlu1 %3231 }
 0x150   : > { %v3234_v4 = vunpack.i.h.bf16 %v3232_v1  ;;  %v3233_v46 = vunpack.i.l.bf16 %v3232_v1 }
 0x151   : > { %2754 = vmatmul.mubr.msk.bf16.gmra.mxu1 %vm348_vm0, %v1735_v30  ;;  %v1644_v13 = vsel %vm1526_vm2, %v1612_v63, %v3218_v48  ;;  %v1645_v3 = vsel %vm1526_vm2, %v1613_v47, %v3219_v59 }
 0x152   : > { %v3227_v10 = vpop.permute.xlu0 %3226  ;;  %v1580_v11 = vsel %vm1559_vm3, %v1547_v56, %v3233_v46  ;;  %v1581_v12 = vsel %vm1559_vm3, %v1548_v7, %v3234_v4 }
 0x153   : > { %v3229_v35 = vunpack.i.h.bf16 %v3227_v10  ;;  %v3228_v39 = vunpack.i.l.bf16 %v3227_v10  ;;  %v3242_v15 = vpop.permute.xlu1 %3241  ;;  %v1718_v61 = vpack.c.bf16 %v1581_v12, %v1580_v11 }
 0x154   : > { %v3244_v27 = vunpack.i.h.bf16 %v3242_v15  ;;  %v3243_v24 = vunpack.i.l.bf16 %v3242_v15 }
 0x155   : > { %v1676_v37 = vsel %vm1559_vm3, %v1644_v13, %v3228_v39  ;;  %v1677_v6 = vsel %vm1559_vm3, %v1645_v3, %v3229_v35 }
 0x156   : > { %v3237_v60 = vpop.permute.xlu0 %3236  ;;  %v1719_v22 = vpack.c.bf16 %v1677_v6, %v1676_v37  ;;  %v1517_v9 = vsel %vm348_vm0, %v460_v51, %v3244_v27  ;;  %v1516_v45 = vsel %vm348_vm0, %v459_v18, %v3243_v24 }
 0x157   : > { %v3252_v23 = vpop.permute.xlu1 %3251  ;;  %v3239_v25 = vunpack.i.h.bf16 %v3237_v60  ;;  %v3238_v29 = vunpack.i.l.bf16 %v3237_v60 }
 0x158   : > { %2040 = vmatprep.mubr.bf16.mxu0 %v1719_v22  ;;  %v3254_v40 = vunpack.i.h.bf16 %v3252_v23  ;;  %v3253_v8 = vunpack.i.l.bf16 %v3252_v23 }
 0x159   : > { %2041 = vmatmul.mubr.bf16.gmra.mxu0 %v1718_v61  ;;  %v1615_v52 = vsel %vm348_vm0, %v3882_v28, %v3239_v25  ;;  %v1614_v2 = vsel %vm348_vm0, %v3880_v32, %v3238_v29 }
 0x15a   : > { %v3247_v34 = vpop.permute.xlu0 %3246  ;;  %v1549_v26 = vsel %vm1526_vm2, %v1516_v45, %v3253_v8  ;;  %v1550_v36 = vsel %vm1526_vm2, %v1517_v9, %v3254_v40 }
 0x15b   : > { %v3249_v42 = vunpack.i.h.bf16 %v3247_v34  ;;  %v3248_v44 = vunpack.i.l.bf16 %v3247_v34  ;;  %v3262_v19 = vpop.permute.xlu1 %3261 }
 0x15c   : > { %v3264_v49 = vunpack.i.h.bf16 %v3262_v19  ;;  %v3263_v50 = vunpack.i.l.bf16 %v3262_v19 }
 0x15d   : > { %v1646_v0 = vsel %vm1526_vm2, %v1614_v2, %v3248_v44  ;;  %v1647_v16 = vsel %vm1526_vm2, %v1615_v52, %v3249_v42 }
 0x15e   : > { %v3257_v38 = vpop.permute.xlu0 %3256  ;;  %v1582_v54 = vsel %vm1559_vm3, %v1549_v26, %v3263_v50  ;;  %v1583_v62 = vsel %vm1559_vm3, %v1550_v36, %v3264_v49 }
 0x15f   : > { %v3259_v53 = vunpack.i.h.bf16 %v3257_v38  ;;  %v3258_v20 = vunpack.i.l.bf16 %v3257_v38  ;;  %v1721_v32 = vpack.c.bf16 %v1583_v62, %v1582_v54 }
 0x161   : > { %v1678_v28 = vsel %vm1559_vm3, %v1646_v0, %v3258_v20  ;;  %v1679_v17 = vsel %vm1559_vm3, %v1647_v16, %v3259_v53 }
 0x162   : > { %v1722_v31 = vpack.c.bf16 %v1679_v17, %v1678_v28 }
 0x164   : > { %2048 = vmatprep.mubr.bf16.mxu0 %v1722_v31 }
 0x165   : > { %2049 = vmatmul.mubr.bf16.gmra.mxu0 %v1721_v32 }
 0x171   : > { %v2607_v58 = vpop.f32.mrf.mxu0 }
 0x173   : > { %v2608_v41 = vpop.f32.mrf.mxu0 }
 0x174   : > { %v2609_v44 = vadd.f32 %v2608_v41, %v2607_v58 }
 0x175   : > { %v2610_v59 = vpop.f32.mrf.mxu0 }
 0x177   : > { %v2611_v1 = vpop.f32.mrf.mxu0 }
 0x178   : > { %v2612_v26 = vadd.f32 %v2611_v1, %v2610_v59 }
 0x17d   : > { %v2613_v21 = vpop.f32.mrf.mxu0 }
 0x17f   : > { %v2614_v63 = vpop.f32.mrf.mxu0 }
 0x180   : > { %v2615_v8 = vadd.f32 %v2614_v63, %v2613_v21 }
 0x181   : > { %v2616_v7 = vpop.f32.mrf.mxu0 }
 0x183   : > { %v2617_v10 = vpop.f32.mrf.mxu0 }
 0x184   : > { %v2618_v49 = vadd.f32 %v2617_v10, %v2616_v7 }
 0x189   : > { %v2679_v30 = vpop.f32.mrf.mxu1 }
 0x18b   : > { %v2680_v33 = vpop.f32.mrf.mxu1 }
 0x18c   : > { %v4084_v5 = vadd.f32 %v2680_v33, %v2679_v30 }
 0x18d   : > { %v2682_v43 = vpop.f32.mrf.mxu1 }
 0x18f   : > { %v2683_v57 = vpop.f32.mrf.mxu1 }
 0x190   : > { %v4086_v14 = vadd.f32 %v2683_v57, %v2682_v43 }
 0x195   : > { %v2619_v35 = vpop.f32.mrf.mxu0 }
 0x197   : > { %v2620_v39 = vpop.f32.mrf.mxu0 }
 0x198   : > { %v2621_v0 = vadd.f32 %v2620_v39, %v2619_v35 }
 0x199   : > { %v2622_v12 = vpop.f32.mrf.mxu0 }
 0x19b   : > { %v2623_v37 = vpop.f32.mrf.mxu0 }
 0x19c   : > { %v2624_v58 = vadd.f32 %v2623_v37, %v2622_v12 }
 0x1a1   : > { %v2685_v48 = vpop.f32.mrf.mxu1 }
 0x1a3   : > { %v2686_v55 = vpop.f32.mrf.mxu1 }
 0x1a4   : > { %v4088_v4 = vadd.f32 %v2686_v55, %v2685_v48 }
 0x1a5   : > { %v2688_v46 = vpop.f32.mrf.mxu1 }
 0x1a7   : > { %v2689_v47 = vpop.f32.mrf.mxu1 }
 0x1a8   : > { %v4090_v56 = vadd.f32 %v2689_v47, %v2688_v46 }
 0x1ad   : > { %v2625_v61 = vpop.f32.mrf.mxu0 }
 0x1af   : > { %v2626_v22 = vpop.f32.mrf.mxu0 }
 0x1b0   : > { %v2627_v20 = vadd.f32 %v2626_v22, %v2625_v61 }
 0x1b1   : > { %v2628_v23 = vpop.f32.mrf.mxu0 }
 0x1b3   : > { %v2629_v27 = vpop.f32.mrf.mxu0 }
 0x1b4   : > { %v2630_v31 = vadd.f32 %v2629_v27, %v2628_v23 }
 0x1b9   : > { %v2691_v11 = vpop.f32.mrf.mxu1 }
 0x1bb   : > { %v2692_v13 = vpop.f32.mrf.mxu1 }
 0x1bc   : > { %v4092_v3 = vadd.f32 %v2692_v13, %v2691_v11 }
 0x1bd   : > { %v2694_v15 = vpop.f32.mrf.mxu1 }
 0x1bf   : > { %v2695_v6 = vpop.f32.mrf.mxu1 }
 0x1c0   : > { %v4094_v60 = vadd.f32 %v2695_v6, %v2694_v15 }
 0x1c5   : > { %v2631_v24 = vpop.f32.mrf.mxu0 }
 0x1c7   : > { %v2632_v29 = vpop.f32.mrf.mxu0 }
 0x1c8   : > { %v2633_v39 = vadd.f32 %v2632_v29, %v2631_v24 }
 0x1c9   : > { %v4102_v34 = vpop.f32.mrf.mxu0 }
 0x1cb   : > { %v2635_v19 = vpop.f32.mrf.mxu0 }
 0x1cc   : > { %v2636_v29 = vadd.f32 %v2635_v19, %v4102_v34 }
 0x1d1   : > { %v4096_v25 = vpop.f32.mrf.mxu1 }
 0x1d3   : > { %v4098_v18 = vpop.f32.mrf.mxu1 }
 0x1d5   : > { %v4100_v51 = vpop.f32.mrf.mxu1 }
 0x1d7   : > { %v4104_v40 = vpop.f32.mrf.mxu1 }
 0x1d9   : > { %v2727_v42 = vpop.f32.mrf.mxu1 }
 0x1da   : > { %v2132_v9 = vadd.f32 %v2727_v42, %v2615_v8 }
 0x1db   : > { %v2123_v45 = vpop.f32.mrf.mxu1 }
 0x1dc   : > { %2252 = vst.msk [vmem:[%s4111_s19 + $0x10] sm:$0xff] %vm348_vm0, %v2132_v9  ;;  %v2124_v52 = vadd.f32 %v2609_v44, %v2123_v45  ;;  %v2355_v7 = vmul.f32 %v2132_v9, %v2132_v9  ;;  %v2285_v15 = vsel %vm348_vm0, %v2132_v9, 0.0 }
 0x1dd   : > { %v2637_v50 = vpop.f32.mrf.mxu0  ;;  %v2728_v2 = vpop.f32.mrf.mxu1 }
 0x1de   : > { %2250 = vst.msk [vmem:[%s4111_s19] sm:$0xff] %vm348_vm0, %v2124_v52  ;;  %v2135_v38 = vadd.f32 %v2728_v2, %v2618_v49  ;;  %v2353_v33 = vmul.f32 %v2124_v52, %v2124_v52  ;;  %v2282_v48 = vsel %vm348_vm0, %v2124_v52, 0.0  ;;  %v2388_v23 = vsel %vm348_vm0, %v2355_v7, 0.0 }
 0x1df   : > { %v2638_v36 = vpop.f32.mrf.mxu0  ;;  %v2126_v53 = vpop.f32.mrf.mxu1 }
 0x1e0   : > { %2253 = vst.msk [vmem:[%s4111_s19 + $0x18] sm:$0xff] %vm348_vm0, %v2135_v38  ;;  %v2127_v54 = vadd.f32 %v2612_v26, %v2126_v53  ;;  %v2639_v21 = vadd.f32 %v2638_v36, %v2637_v50  ;;  %v2385_v10 = vsel %vm348_vm0, %v2353_v33, 0.0  ;;  %v2356_v27 = vmul.f32 %v2135_v38, %v2135_v38 }
 0x1e1   : > { %v2731_v62 = vpop.f32.mrf.mxu1  ;;  %v2640_v16 = vpop.f32.mrf.mxu0  ;;  %v2287_v9 = vsel %vm348_vm0, %v2135_v38, 0.0 }
 0x1e2   : > { %2251 = vst.msk [vmem:[%s4111_s19 + $0x8] sm:$0xff] %vm348_vm0, %v2127_v54  ;;  %v4121_v28 = vadd.f32 %v2731_v62, %v2627_v20  ;;  %v2354_v17 = vmul.f32 %v2127_v54, %v2127_v54  ;;  %v2283_v43 = vsel %vm348_vm0, %v2127_v54, 0.0  ;;  %v2390_v52 = vsel %vm348_vm0, %v2356_v27, 0.0 }
 0x1e3   : > { %v2139_v32 = vpop.f32.mrf.mxu1  ;;  %v2641_v41 = vpop.f32.mrf.mxu0  ;;  %v2284_v46 = vadd.f32 %v2283_v43, %v2282_v48 }
 0x1e4   : > { %2256 = vst.msk [vmem:[%s4111_s19 + $0x30] sm:$0xff] %vm348_vm0, %v4121_v28  ;;  %v2140_v30 = vadd.f32 %v2621_v0, %v2139_v32  ;;  %v2386_v1 = vsel %vm348_vm0, %v2354_v17, 0.0  ;;  %v2642_v61 = vadd.f32 %v2641_v41, %v2640_v16  ;;  %v2293_v7 = vsel %vm348_vm0, %v4121_v28, 0.0 }
 0x1e5   : > { %v2732_v57 = vpop.f32.mrf.mxu1  ;;  %v2387_v11 = vadd.f32 %v2386_v1, %v2385_v10  ;;  %v2286_v6 = vadd.f32 %v2285_v15, %v2284_v46 }
 0x1e6   : > { %2254 = vst.msk [vmem:[%s4111_s19 + $0x20] sm:$0xff] %vm348_vm0, %v2140_v30  ;;  %v4129_v59 = vadd.f32 %v2732_v57, %v2630_v31  ;;  %v2357_v2 = vmul.f32 %v2140_v30, %v2140_v30  ;;  %v2289_v53 = vsel %vm348_vm0, %v2140_v30, 0.0 }
 0x1e7   : > { %v2142_v55 = vpop.f32.mrf.mxu1  ;;  %v2389_v8 = vadd.f32 %v2388_v23, %v2387_v11  ;;  %v2288_v49 = vadd.f32 %v2287_v9, %v2286_v6 }
 0x1e8   : > { %2257 = vst.msk [vmem:[%s4111_s19 + $0x38] sm:$0xff] %vm348_vm0, %v4129_v59  ;;  %v2143_v63 = vadd.f32 %v2624_v58, %v2142_v55  ;;  %v2392_v16 = vsel %vm348_vm0, %v2357_v2, 0.0  ;;  %v2359_v55 = vmul.f32 %v4121_v28, %v4121_v28 }
 0x1e9   : > { %v2643_v47 = vpop.f32.mrf.mxu0  ;;  %v2735_v35 = vpop.f32.mrf.mxu1  ;;  %v2391_v19 = vadd.f32 %v2390_v52, %v2389_v8  ;;  %v2290_v54 = vadd.f32 %v2289_v53, %v2288_v49 }
 0x1ea   : > { %2255 = vst.msk [vmem:[%s4111_s19 + $0x28] sm:$0xff] %vm348_vm0, %v2143_v63  ;;  %v4139_v13 = vadd.f32 %v2735_v35, %v2639_v21  ;;  %v2358_v20 = vmul.f32 %v2143_v63, %v2143_v63  ;;  %v2291_v17 = vsel %vm348_vm0, %v2143_v63, 0.0  ;;  %v2396_v11 = vsel %vm348_vm0, %v2359_v55, 0.0 }
 0x1eb   : > { %v2644_v12 = vpop.f32.mrf.mxu0  ;;  %v2155_v37 = vpop.f32.mrf.mxu1  ;;  %v2393_v31 = vadd.f32 %v2392_v16, %v2391_v19  ;;  %v2292_v41 = vadd.f32 %v2291_v17, %v2290_v54 }
 0x1ec   : > { %2260 = vst.msk [vmem:[%s4111_s19 + $0x50] sm:$0xff] %vm348_vm0, %v4139_v13  ;;  %v4145_v22 = vadd.f32 %v2633_v39, %v2155_v37  ;;  %v2645_v26 = vadd.f32 %v2644_v12, %v2643_v47  ;;  %v2394_v30 = vsel %vm348_vm0, %v2358_v20, 0.0  ;;  %v2360_v12 = vmul.f32 %v4129_v59, %v4129_v59 }
 0x1ed   : > { %v2736_v24 = vpop.f32.mrf.mxu1  ;;  %v2646_v42 = vpop.f32.mrf.mxu0  ;;  %v2395_v47 = vadd.f32 %v2394_v30, %v2393_v31  ;;  %v2294_v35 = vadd.f32 %v2293_v7, %v2292_v41 }
 0x1ee   : > { %2258 = vst.msk [vmem:[%s4111_s19 + $0x40] sm:$0xff] %vm348_vm0, %v4145_v22  ;;  %v4152_v44 = vadd.f32 %v2736_v24, %v2642_v61  ;;  %v2295_v61 = vsel %vm348_vm0, %v4129_v59, 0.0  ;;  %v2398_v24 = vsel %vm348_vm0, %v2360_v12, 0.0 }
 0x1ef   : > { %v2158_v45 = vpop.f32.mrf.mxu1  ;;  %v2647_v36 = vpop.f32.mrf.mxu0  ;;  %v2397_v37 = vadd.f32 %v2396_v11, %v2395_v47  ;;  %v2296_v23 = vadd.f32 %v2295_v61, %v2294_v35  ;;  %v2699_v35 = vadd.f32 %v4098_v18, %v4096_v25 }
 0x1f0   : > { %2261 = vst.msk [vmem:[%s4111_s19 + $0x58] sm:$0xff] %vm348_vm0, %v4152_v44  ;;  %v2159_v50 = vadd.f32 %v2636_v29, %v2158_v45  ;;  %v2648_v33 = vadd.f32 %v2647_v36, %v2646_v42  ;;  %v2361_v29 = vmul.f32 %v4145_v22, %v4145_v22  ;;  %v2297_v45 = vsel %vm348_vm0, %v4145_v22, 0.0 }
 0x1f1   : > { %v2739_v34 = vpop.f32.mrf.mxu1  ;;  %v2399_v42 = vadd.f32 %v2398_v24, %v2397_v37  ;;  %v2298_v2 = vadd.f32 %v2297_v45, %v2296_v23  ;;  %v2702_v24 = vadd.f32 %v4104_v40, %v4100_v51 }
 0x1f2   : > { %2259 = vst.msk [vmem:[%s4111_s19 + $0x48] sm:$0xff] %vm348_vm0, %v2159_v50  ;;  %v2362_v59 = vmul.f32 %v2159_v50, %v2159_v50  ;;  %v2400_v19 = vsel %vm348_vm0, %v2361_v29, 0.0 }
 0x1f3   : > { %v2171_v38 = vpop.f32.mrf.mxu1  ;;  %v2401_v20 = vadd.f32 %v2400_v19, %v2399_v42 }
 0x1f4   : > { %v4162_v0 = vadd.f32 %v2645_v26, %v2171_v38  ;;  %v2299_v26 = vsel %vm348_vm0, %v2159_v50, 0.0  ;;  %v2402_v22 = vsel %vm348_vm0, %v2362_v59, 0.0  ;;  %v2363_v50 = vmul.f32 %v4139_v13, %v4139_v13 }
 0x1f5   : > { %v2649_v62 = vpop.f32.mrf.mxu0  ;;  %v2740_v32 = vpop.f32.mrf.mxu1  ;;  %v2300_v16 = vadd.f32 %v2299_v26, %v2298_v2  ;;  %v2403_v31 = vadd.f32 %v2402_v22, %v2401_v20 }
 0x1f6   : > { %2262 = vst.msk [vmem:[%s4111_s19 + $0x60] sm:$0xff] %vm348_vm0, %v4162_v0 }
 0x1f7   : > { %v2650_v43 = vpop.f32.mrf.mxu0  ;;  %v2174_v58 = vpop.f32.mrf.mxu1 }
 0x1f8   : > { %v2651_v57 = vadd.f32 %v2650_v43, %v2649_v62  ;;  %v4170_v1 = vadd.f32 %v2648_v33, %v2174_v58  ;;  %v2301_v43 = vsel %vm348_vm0, %v4139_v13, 0.0 }
 0x1f9   : > { %v2652_v48 = vpop.f32.mrf.mxu0  ;;  %v4176_v46 = vpop.f32.mrf.mxu1 }
 0x1fa   : > { %v4174_v21 = vadd.f32 %v2739_v34, %v2651_v57  ;;  %2263 = vst.msk [vmem:[%s4111_s19 + $0x68] sm:$0xff] %vm348_vm0, %v4170_v1  ;;  %v2302_v57 = vadd.f32 %v2301_v43, %v2300_v16  ;;  %v2366_v23 = vmul.f32 %v4170_v1, %v4170_v1 }
 0x1fb   : > { %v2653_v63 = vpop.f32.mrf.mxu0  ;;  %v2187_v10 = vpop.f32.mrf.mxu1 }
 0x1fc   : > { %2264 = vst.msk [vmem:[%s4111_s19 + $0x70] sm:$0xff] %vm348_vm0, %v4174_v21  ;;  %v2654_v39 = vadd.f32 %v2653_v63, %v2652_v48  ;;  %v2404_v48 = vsel %vm348_vm0, %v2363_v50, 0.0  ;;  %v2303_v63 = vsel %vm348_vm0, %v4152_v44, 0.0  ;;  %v2410_v51 = vsel %vm348_vm0, %v2366_v23, 0.0 }
 0x1fd   : > { %v4189_v15 = vpop.f32.mrf.mxu1  ;;  %v2405_v13 = vadd.f32 %v2404_v48, %v2403_v31  ;;  %v2309_v20 = vsel %vm348_vm0, %v4174_v21, 0.0 }
 0x1fe   : > { %v4191_v6 = vadd.f32 %v2740_v32, %v2654_v39  ;;  %v2304_v39 = vadd.f32 %v2303_v63, %v2302_v57 }
 0x1ff   : > { %v2190_v28 = vpop.f32.mrf.mxu1 }
 0x200   : > { %2265 = vst.msk [vmem:[%s4111_s19 + $0x78] sm:$0xff] %vm348_vm0, %v4191_v6  ;;  %v2311_v50 = vsel %vm348_vm0, %v4191_v6, 0.0 }
 0x201   : > { %v2655_v27 = vpop.f32.mrf.mxu0  ;;  %v4201_v8 = vpop.f32.mrf.mxu1 }
 0x203   : > { %v2656_v9 = vpop.f32.mrf.mxu0  ;;  %v4205_v52 = vpop.f32.mrf.mxu1 }
 0x204   : > { %v2657_v49 = vadd.f32 %v2656_v9, %v2655_v27 }
 0x205   : > { %v2658_v34 = vpop.f32.mrf.mxu0  ;;  %v4211_v53 = vpop.f32.mrf.mxu1 }
 0x206   : > { %v4209_v36 = vadd.f32 %v2657_v49, %v2187_v10 }
 0x207   : > { %v2659_v38 = vpop.f32.mrf.mxu0  ;;  %v4217_v62 = vpop.f32.mrf.mxu1 }
 0x208   : > { %2266 = vst.msk [vmem:[%s4111_s19 + $0x80] sm:$0xff] %vm348_vm0, %v4209_v36  ;;  %v2660_v54 = vadd.f32 %v2659_v38, %v2658_v34  ;;  %v2368_v38 = vmul.f32 %v4191_v6, %v4191_v6  ;;  %v2313_v57 = vsel %vm348_vm0, %v4209_v36, 0.0 }
 0x209   : > { %v2751_v32 = vpop.f32.mrf.mxu1 }
 0x20a   : > { %v4221_v17 = vadd.f32 %v2660_v54, %v2190_v28  ;;  %v4224_v33 = vadd.f32 %v2751_v32, %v4088_v4  ;;  %v2364_v4 = vmul.f32 %v4152_v44, %v4152_v44  ;;  %v2365_v44 = vmul.f32 %v4162_v0, %v4162_v0 }
 0x20b   : > { %v2219_v30 = vpop.f32.mrf.mxu1  ;;  %v2369_v32 = vmul.f32 %v4209_v36, %v4209_v36 }
 0x20c   : > { %2267 = vst.msk [vmem:[%s4111_s19 + $0x88] sm:$0xff] %vm348_vm0, %v4221_v17  ;;  %2276 = vst.msk [vmem:[%s4111_s19 + $0xd0] sm:$0xff] %vm348_vm0, %v4224_v33  ;;  %v4235_v41 = vadd.f32 %v4084_v5, %v2219_v30  ;;  %v2406_v37 = vsel %vm348_vm0, %v2364_v4, 0.0  ;;  %v2408_v42 = vsel %vm348_vm0, %v2365_v44, 0.0 }
 0x20d   : > { %v2661_v58 = vpop.f32.mrf.mxu0  ;;  %v2752_v55 = vpop.f32.mrf.mxu1  ;;  %v2407_v28 = vadd.f32 %v2406_v37, %v2405_v13  ;;  %v2416_v4 = vsel %vm348_vm0, %v2369_v32, 0.0 }
 0x20e   : > { %2274 = vst.msk [vmem:[%s4111_s19 + $0xc0] sm:$0xff] %vm348_vm0, %v4235_v41  ;;  %v4246_v5 = vadd.f32 %v2752_v55, %v4090_v56  ;;  %v2329_v32 = vsel %vm348_vm0, %v4235_v41, 0.0 }
 0x20f   : > { %v2662_v47 = vpop.f32.mrf.mxu0  ;;  %v2222_v10 = vpop.f32.mrf.mxu1  ;;  %v2409_v49 = vadd.f32 %v2408_v42, %v2407_v28 }
 0x210   : > { %v2663_v7 = vadd.f32 %v2662_v47, %v2661_v58  ;;  %v4251_v12 = vadd.f32 %v4086_v14, %v2222_v10  ;;  %2277 = vst.msk [vmem:[%s4111_s19 + $0xd8] sm:$0xff] %vm348_vm0, %v4246_v5  ;;  %v2305_v14 = vsel %vm348_vm0, %v4162_v0, 0.0  ;;  %v2307_v0 = vsel %vm348_vm0, %v4170_v1, 0.0 }
 0x211   : > { %v2664_v11 = vpop.f32.mrf.mxu0  ;;  %v2755_v56 = vpop.f32.mrf.mxu1  ;;  %v2306_v29 = vadd.f32 %v2305_v14, %v2304_v39  ;;  %v2411_v19 = vadd.f32 %v2410_v51, %v2409_v49  ;;  %v2370_v58 = vmul.f32 %v4221_v17, %v4221_v17 }
 0x212   : > { %v2196_v61 = vadd.f32 %v4176_v46, %v2663_v7  ;;  %2275 = vst.msk [vmem:[%s4111_s19 + $0xc8] sm:$0xff] %vm348_vm0, %v4251_v12  ;;  %v4263_v18 = vadd.f32 %v2755_v56, %v2699_v35 }
 0x213   : > { %v2665_v25 = vpop.f32.mrf.mxu0  ;;  %v2235_v27 = vpop.f32.mrf.mxu1  ;;  %v2308_v34 = vadd.f32 %v2307_v0, %v2306_v29  ;;  %v2418_v7 = vsel %vm348_vm0, %v2370_v58, 0.0  ;;  %v2331_v58 = vsel %vm348_vm0, %v4251_v12, 0.0 }
 0x214   : > { %2268 = vst.msk [vmem:[%s4111_s19 + $0x90] sm:$0xff] %vm348_vm0, %v2196_v61  ;;  %v2666_v46 = vadd.f32 %v2665_v25, %v2664_v11  ;;  %2280 = vst.msk [vmem:[%s4111_s19 + $0xf0] sm:$0xff] %vm348_vm0, %v4263_v18  ;;  %v4281_v45 = vadd.f32 %v4092_v3, %v2235_v27  ;;  %v2371_v55 = vmul.f32 %v2196_v61, %v2196_v61  ;;  %v2317_v36 = vsel %vm348_vm0, %v2196_v61, 0.0 }
 0x215   : > { %v2756_v59 = vpop.f32.mrf.mxu1  ;;  %v2310_v54 = vadd.f32 %v2309_v20, %v2308_v34 }
 0x216   : > { %v2199_v9 = vadd.f32 %v4189_v15, %v2666_v46  ;;  %v4283_v2 = vadd.f32 %v2756_v59, %v2702_v24  ;;  %2278 = vst.msk [vmem:[%s4111_s19 + $0xe0] sm:$0xff] %vm348_vm0, %v4281_v45  ;;  %v2367_v15 = vmul.f32 %v4174_v21, %v4174_v21  ;;  %v2414_v21 = vsel %vm348_vm0, %v2368_v38, 0.0 }
 0x217   : > { %v2238_v40 = vpop.f32.mrf.mxu1  ;;  %v2312_v6 = vadd.f32 %v2311_v50, %v2310_v54  ;;  %v2420_v37 = vsel %vm348_vm0, %v2371_v55, 0.0 }
 0x218   : > { %2269 = vst.msk [vmem:[%s4111_s19 + $0x98] sm:$0xff] %vm348_vm0, %v2199_v9  ;;  %2281 = vst.msk [vmem:[%s4111_s19 + $0xf8] sm:$0xff] %vm348_vm0, %v4283_v2  ;;  %v4295_v3 = vadd.f32 %v4094_v60, %v2238_v40  ;;  %v2412_v60 = vsel %vm348_vm0, %v2367_v15, 0.0  ;;  %v2372_v10 = vmul.f32 %v2199_v9, %v2199_v9  ;;  %v2319_v44 = vsel %vm348_vm0, %v2199_v9, 0.0 }
 0x219   : > { %v2667_v1 = vpop.f32.mrf.mxu0  ;;  %v2413_v43 = vadd.f32 %v2412_v60, %v2411_v19  ;;  %v2314_v63 = vadd.f32 %v2313_v57, %v2312_v6 }
 0x21a   : > { %2279 = vst.msk [vmem:[%s4111_s19 + $0xe8] sm:$0xff] %vm348_vm0, %v4295_v3  ;;  %v2422_v25 = vsel %vm348_vm0, %v2372_v10, 0.0 }
 0x21b   : > { %v2668_v26 = vpop.f32.mrf.mxu0  ;;  %v2415_v47 = vadd.f32 %v2414_v21, %v2413_v43  ;;  %v2379_v21 = vmul.f32 %v4224_v33, %v4224_v33 }
 0x21c   : > { %v2669_v22 = vadd.f32 %v2668_v26, %v2667_v1 }
 0x21d   : > { %v2670_v16 = vpop.f32.mrf.mxu0  ;;  %v2417_v35 = vadd.f32 %v2416_v4, %v2415_v47  ;;  %v2380_v4 = vmul.f32 %v4246_v5, %v4246_v5  ;;  %v2436_v47 = vsel %vm348_vm0, %v2379_v21, 0.0 }
 0x21e   : > { %v2204_v31 = vadd.f32 %v2669_v22, %v4205_v52  ;;  %v2315_v52 = vsel %vm348_vm0, %v4221_v17, 0.0  ;;  %v2377_v22 = vmul.f32 %v4235_v41, %v4235_v41  ;;  %v2333_v41 = vsel %vm348_vm0, %v4224_v33, 0.0 }
 0x21f   : > { %v2671_v30 = vpop.f32.mrf.mxu0  ;;  %v2316_v39 = vadd.f32 %v2315_v52, %v2314_v63  ;;  %v2419_v56 = vadd.f32 %v2418_v7, %v2417_v35  ;;  %v2335_v63 = vsel %vm348_vm0, %v4246_v5, 0.0  ;;  %v2438_v10 = vsel %vm348_vm0, %v2380_v4, 0.0 }
 0x220   : > { %2270 = vst.msk [vmem:[%s4111_s19 + $0xa0] sm:$0xff] %vm348_vm0, %v2204_v31  ;;  %v2672_v48 = vadd.f32 %v2671_v30, %v2670_v16  ;;  %v2373_v17 = vmul.f32 %v2204_v31, %v2204_v31  ;;  %v2321_v14 = vsel %vm348_vm0, %v2204_v31, 0.0  ;;  %v2378_v31 = vmul.f32 %v4251_v12, %v4251_v12 }
 0x221   : > { %v2318_v28 = vadd.f32 %v2317_v36, %v2316_v39  ;;  %v2421_v46 = vadd.f32 %v2420_v37, %v2419_v56  ;;  %v2432_v57 = vsel %vm348_vm0, %v2377_v22, 0.0  ;;  %v2381_v12 = vmul.f32 %v4281_v45, %v4281_v45 }
 0x222   : > { %v2207_v13 = vadd.f32 %v2672_v48, %v4217_v62  ;;  %v2424_v29 = vsel %vm348_vm0, %v2373_v17, 0.0  ;;  %v2434_v52 = vsel %vm348_vm0, %v2378_v31, 0.0  ;;  %v2337_v33 = vsel %vm348_vm0, %v4281_v45, 0.0 }
 0x223   : > { %v2320_v27 = vadd.f32 %v2319_v44, %v2318_v28  ;;  %v2423_v9 = vadd.f32 %v2422_v25, %v2421_v46  ;;  %v2382_v35 = vmul.f32 %v4295_v3, %v4295_v3  ;;  %v2383_v37 = vmul.f32 %v4263_v18, %v4263_v18 }
 0x224   : > { %2271 = vst.msk [vmem:[%s4111_s19 + $0xa8] sm:$0xff] %vm348_vm0, %v2207_v13  ;;  %v2374_v61 = vmul.f32 %v2207_v13, %v2207_v13  ;;  %v2323_v42 = vsel %vm348_vm0, %v2207_v13, 0.0  ;;  %v2440_v5 = vsel %vm348_vm0, %v2381_v12, 0.0  ;;  %v2339_v44 = vsel %vm348_vm0, %v4295_v3, 0.0 }
 0x225   : > { %v2673_v11 = vpop.f32.mrf.mxu0  ;;  %v2322_v59 = vadd.f32 %v2321_v14, %v2320_v27  ;;  %v2425_v15 = vadd.f32 %v2424_v29, %v2423_v9  ;;  %v2341_v28 = vsel %vm348_vm0, %v4263_v18, 0.0  ;;  %v2384_v45 = vmul.f32 %v4283_v2, %v4283_v2 }
 0x226   : > { %v2426_v51 = vsel %vm348_vm0, %v2374_v61, 0.0  ;;  %v2444_v61 = vsel %vm348_vm0, %v2383_v37, 0.0 }
 0x227   : > { %v2674_v62 = vpop.f32.mrf.mxu0  ;;  %v2324_v19 = vadd.f32 %v2323_v42, %v2322_v59  ;;  %v2427_v38 = vadd.f32 %v2426_v51, %v2425_v15  ;;  %v2446_v27 = vsel %vm348_vm0, %v2384_v45, 0.0 }
 0x228   : > { %v2675_v23 = vadd.f32 %v2674_v62, %v2673_v11  ;;  %v2442_v62 = vsel %vm348_vm0, %v2382_v35, 0.0 }
 0x229   : > { %v2676_v24 = vpop.f32.mrf.mxu0 }
 0x22a   : > { %v2212_v0 = vadd.f32 %v4201_v8, %v2675_v23  ;;  %v2343_v23 = vsel %vm348_vm0, %v4283_v2, 0.0 }
 0x22b   : > { %v2677_v49 = vpop.f32.mrf.mxu0 }
 0x22c   : > { %2272 = vst.msk [vmem:[%s4111_s19 + $0xb0] sm:$0xff] %vm348_vm0, %v2212_v0  ;;  %v2325_v40 = vsel %vm348_vm0, %v2212_v0, 0.0  ;;  %v2375_v34 = vmul.f32 %v2212_v0, %v2212_v0  ;;  %v2678_v1 = vadd.f32 %v2677_v49, %v2676_v24 }
 0x22d   : > { %v2326_v8 = vadd.f32 %v2325_v40, %v2324_v19 }
 0x22e   : > { %v2428_v26 = vsel %vm348_vm0, %v2375_v34, 0.0  ;;  %v2215_v20 = vadd.f32 %v4211_v53, %v2678_v1 }
 0x22f   : > { %v2429_v60 = vadd.f32 %v2428_v26, %v2427_v38 }
 0x230   : > { %2273 = vst.msk [vmem:[%s4111_s19 + $0xb8] sm:$0xff] %vm348_vm0, %v2215_v20  ;;  %v2327_v54 = vsel %vm348_vm0, %v2215_v20, 0.0  ;;  %v2376_v16 = vmul.f32 %v2215_v20, %v2215_v20 }
 0x231   : > { %v2328_v50 = vadd.f32 %v2327_v54, %v2326_v8 }
 0x232   : > { %v2430_v53 = vsel %vm348_vm0, %v2376_v16, 0.0 }
 0x233   : > { %v2330_v43 = vadd.f32 %v2329_v32, %v2328_v50  ;;  %v2431_v30 = vadd.f32 %v2430_v53, %v2429_v60 }
 0x235   : > { %v2332_v48 = vadd.f32 %v2331_v58, %v2330_v43  ;;  %v2433_v6 = vadd.f32 %v2432_v57, %v2431_v30 }
 0x237   : > { %v2334_v55 = vadd.f32 %v2333_v41, %v2332_v48  ;;  %v2435_v13 = vadd.f32 %v2434_v52, %v2433_v6 }
 0x239   : > { %v2336_v7 = vadd.f32 %v2335_v63, %v2334_v55  ;;  %v2437_v36 = vadd.f32 %v2436_v47, %v2435_v13 }
 0x23b   : > { %v2338_v39 = vadd.f32 %v2337_v33, %v2336_v7  ;;  %v2439_v11 = vadd.f32 %v2438_v10, %v2437_v36 }
 0x23d   : > { %v2340_v17 = vadd.f32 %v2339_v44, %v2338_v39  ;;  %v2441_v56 = vadd.f32 %v2440_v5, %v2439_v11 }
 0x23f   : > { %v2342_v25 = vadd.f32 %v2341_v28, %v2340_v17  ;;  %v2443_v14 = vadd.f32 %v2442_v62, %v2441_v56 }
 0x241   : > { %v2344_v46 = vadd.f32 %v2343_v23, %v2342_v25  ;;  %v2445_v3 = vadd.f32 %v2444_v61, %v2443_v14 }
 0x243   : > { %v2345_v24 = vrot.slane %v2344_v46, 4  ;;  %v2447_v29 = vadd.f32 %v2446_v27, %v2445_v3 }
 0x245   : > { %v2346_v18 = vadd.f32 %v2345_v24, %v2344_v46  ;;  %v2448_v42 = vrot.slane %v2447_v29, 4 }
 0x247   : > { %v2347_v0 = vrot.slane %v2346_v18, 2  ;;  %v2449_v9 = vadd.f32 %v2448_v42, %v2447_v29 }
 0x249   : > { %v2348_v59 = vadd.f32 %v2347_v0, %v2346_v18  ;;  %v2450_v49 = vrot.slane %v2449_v9, 2 }
 0x24b   : > { %v2349_v51 = vrot.slane %v2348_v59, 1  ;;  %v2451_v40 = vadd.f32 %v2450_v49, %v2449_v9 }
 0x24d   : > { %v2350_v2 = vadd.f32 %v2349_v51, %v2348_v59  ;;  %v2452_v34 = vrot.slane %v2451_v40, 1 }
 0x24f   : > { %2352 = vst.msk [vmem:[%s208_s22] sm:$0x1] %vm2351_vm4, %v2350_v2  ;;  %v2453_v1 = vadd.f32 %v2452_v34, %v2451_v40 }
 0x251   : > { %2454 = vst.msk [vmem:[%s208_s22 + $0x1] sm:$0x1] %vm2351_vm4, %v2453_v1 }
 0x252 PF: > { %s15_s15 = sadd.s32 1, %s3289_s15  }
 0x253   : > { %p12_p4 = scmp.ge.s32.totalorder %s15_s15, 4  }
 0x255   :  { %14 = sbr.rel (!%p12_p4) target bundleno = 1 (0x1), region = 76 }

// kernel: residual_block.3
= control target key start
LH: loop header
LB: loop body
LE: loop exit
PB: predicated region body
PF: predicated region fallthrough
CT: control target
= control target key end

     0   :  { %s3467_s15 = smov 0   ;;  %s5010_s0 = inlined_call_operand.vmem [shape: f32[2,16,16,4], index: 0, kind: input, shape index: {}]   ;;  %s5011_s1 = inlined_call_operand.vmem [shape: bf16[36,64], index: 1, kind: input, shape index: {}]   ;;  %s5012_s2 = inlined_call_operand.vmem [shape: f32[2,16,16,32], index: 2, kind: output, shape index: {0}]   ;;  %s5013_s3 = inlined_call_operand.vmem [shape: f32[2,16,16,32], index: 3, kind: output, shape index: {1}]   ;;  %s5014_s4 = inlined_call_operand.vmem [shape: f32[2,2,64], index: 4, kind: output, shape index: {2}]  }
   0x1 LB: > { %s2654_s16 = sadd.s32 4294967295, %s3430_s15   ;;  %p2658_p0 = scmp.ge.s32.totalorder %s3430_s15, 1  ;;  %s3430_s15 = sphi %s3467_s15, %s15_s15  }
   0x2   : > { %p167_p1 = scmp.lt.s32.totalorder %s3430_s15, 3 }
   0x4   : > { %p168_p2 = pnand %p2658_p0, %p167_p1 }
   0x6   : > { %171 = sbr.rel (%p168_p2) target bundleno = 743 (0x2e7), region = 28 }
   0xb   : > { %vm222_vm0 = vcmask 31744   ;;  %vm225_vm1 = vcmask 25600   ;;  %p3477_p3 = scmp.lt.s32.totalorder %s2654_s16, 1  ;;  %v3432_v0 = vmov 0.0   ;;  %s3433_s22 = smov 4   ;;  %vm2004_vm2 = vcmask 1041408  }
   0xc   : > { %223 = vst.msk [vmem:[#allocation2] sm:$0xff] %vm222_vm0, %v3432_v0  ;;  %224 = vst.msk [vmem:[#allocation2 + $0x8] sm:$0xff] %vm222_vm0, %v3432_v0  ;;  %s3434_s23 = smov 8   ;;  %s3435_s24 = smov 12   ;;  %vm1688_vm3 = vcmask 64512   ;;  %vm1721_vm4 = vcmask 97280  }
   0xd   : > { %226 = vst.msk [vmem:[#allocation2 + $0x10] sm:$0x3] %vm225_vm1, %v3432_v0  ;;  %229 = vst.msk [vmem:[#allocation2 + $0x28] sm:$0x3] %vm225_vm1, %v3432_v0  ;;  %s5101_s16 = smov (!%p3477_p3, %s2654_s16), 1  ;;  %s3436_s25 = smov 16  }
   0xe   : > { %227 = vst.msk [vmem:[#allocation2 + $0x18] sm:$0xff] %vm222_vm0, %v3432_v0  ;;  %228 = vst.msk [vmem:[#allocation2 + $0x20] sm:$0xff] %vm222_vm0, %v3432_v0  ;;  %s3542_s18 = sshll.u32 %s5101_s16, 8  ;;  %s3437_s26 = smov 20   ;;  %vm1754_vm5 = vcmask 130048   ;;  %vm1787_vm6 = vcmask 162816  }
   0xf   : > { %230 = vst.msk [vmem:[#allocation2 + $0x30] sm:$0xff] %vm222_vm0, %v3432_v0  ;;  %231 = vst.msk [vmem:[#allocation2 + $0x38] sm:$0xff] %vm222_vm0, %v3432_v0  ;;  %s3548_s21 = scalar_lea.vmem %s5010_s0, %s3542_s18  ;;  %s3438_s29 = smov 24   ;;  %vm1820_vm7 = vcmask 195584   ;;  %vm1853_vm8 = vcmask 228352   ;;  %vm1886_vm9 = vcmask 261120  }
  0x10   : > { %232 = vst.msk [vmem:[#allocation2 + $0x40] sm:$0x3] %vm225_vm1, %v3432_v0  ;;  %235 = vst.msk [vmem:[#allocation2 + $0x58] sm:$0x3] %vm225_vm1, %v3432_v0  ;;  %v280_v1 = vld [vmem:[%s3548_s21 + $0x10] sm:$0xff]  ;;  %v281_v2 = vld [vmem:[%s3548_s21 + $0x18] sm:$0xff]  ;;  %s4659_s12 = scalar_lea.vmem %s5012_s2, %s3542_s18  ;;  %s4827_s19 = scalar_lea.vmem %s5013_s3, %s3542_s18 }
  0x11   : > { %233 = vst.msk [vmem:[#allocation2 + $0x48] sm:$0xff] %vm222_vm0, %v3432_v0  ;;  %234 = vst.msk [vmem:[#allocation2 + $0x50] sm:$0xff] %vm222_vm0, %v3432_v0  ;;  %v278_v3 = vld [vmem:[%s3548_s21] sm:$0xff]  ;;  %v279_v4 = vld [vmem:[%s3548_s21 + $0x8] sm:$0xff]  ;;  %s3439_s8 = smov 28   ;;  %s3440_s9 = smov 32  }
  0x12   : > { %236 = vst.msk [vmem:[#allocation2 + $0x60] sm:$0xff] %vm222_vm0, %v3432_v0  ;;  %237 = vst.msk [vmem:[#allocation2 + $0x68] sm:$0xff] %vm222_vm0, %v3432_v0  ;;  %v282_v5 = vld [vmem:[%s3548_s21 + $0x20] sm:$0xff]  ;;  %v283_v6 = vld [vmem:[%s3548_s21 + $0x28] sm:$0xff]  ;;  %vm1955_vm10 = vcmask 293888   ;;  %s3441_s13 = smov 96  }
  0x13   : > { %238 = vst.msk [vmem:[#allocation2 + $0x70] sm:$0x3] %vm225_vm1, %v3432_v0  ;;  %241 = vst.msk [vmem:[#allocation2 + $0x88] sm:$0x3] %vm225_vm1, %v3432_v0  ;;  %v375_v7 = vld [vmem:[#allocation2 + $0x1] sm:$0xff]  ;;  %v284_v9 = vld [vmem:[%s3548_s21 + $0x30] sm:$0xff] }
  0x14   : > { %239 = vst.msk [vmem:[#allocation2 + $0x78] sm:$0xff] %vm222_vm0, %v3432_v0  ;;  %240 = vst.msk [vmem:[#allocation2 + $0x80] sm:$0xff] %vm222_vm0, %v3432_v0  ;;  %v376_v8 = vld [vmem:[#allocation2 + $0x9] sm:$0xff]  ;;  %v285_v11 = vld [vmem:[%s3548_s21 + $0x38] sm:$0xff]  ;;  %vm2361_vm11 = vcmask 523264   ;;  %s2665_s18 = sshll.u32 %s5101_s16, 1 }
  0x15   : > { %242 = vst.msk [vmem:[#allocation2 + $0x90] sm:$0xff] %vm222_vm0, %v3432_v0  ;;  %243 = vst.msk [vmem:[#allocation2 + $0x98] sm:$0xff] %vm222_vm0, %v3432_v0  ;;  %v2773_v10 = vpack.i.bf16 %v376_v8, %v375_v7  ;;  %v286_v12 = vld [vmem:[%s3548_s21 + $0x40] sm:$0xff]  ;;  %v287_v13 = vld [vmem:[%s3548_s21 + $0x48] sm:$0xff]  ;;  %vm2431_vm12 = vcmask 516096  }
  0x16   : > { %244 = vst.msk [vmem:[#allocation2 + $0xa0] sm:$0x3] %vm225_vm1, %v3432_v0  ;;  %247 = vst.msk [vmem:[#allocation2 + $0xb8] sm:$0x3] %vm225_vm1, %v3432_v0  ;;  %v288_v14 = vld [vmem:[%s3548_s21 + $0x50] sm:$0xff]  ;;  %v289_v15 = vld [vmem:[%s3548_s21 + $0x58] sm:$0xff] }
  0x17   : > { %245 = vst.msk [vmem:[#allocation2 + $0xa8] sm:$0xff] %vm222_vm0, %v3432_v0  ;;  %246 = vst.msk [vmem:[#allocation2 + $0xb0] sm:$0xff] %vm222_vm0, %v3432_v0  ;;  %v290_v16 = vld [vmem:[%s3548_s21 + $0x60] sm:$0xff]  ;;  %2774 = vrot.lane.b32.xlu0 %v2773_v10, %s3433_s22  ;;  %v291_v17 = vld [vmem:[%s3548_s21 + $0x68] sm:$0xff] }
  0x18   : > { %248 = vst.msk [vmem:[#allocation2 + $0xc0] sm:$0xff] %vm222_vm0, %v3432_v0  ;;  %249 = vst.msk [vmem:[#allocation2 + $0xc8] sm:$0xff] %vm222_vm0, %v3432_v0  ;;  %v292_v18 = vld [vmem:[%s3548_s21 + $0x70] sm:$0xff]  ;;  %v293_v19 = vld [vmem:[%s3548_s21 + $0x78] sm:$0xff] }
  0x19   : > { %250 = vst.msk [vmem:[#allocation2 + $0xd0] sm:$0x3] %vm225_vm1, %v3432_v0  ;;  %253 = vst.msk [vmem:[#allocation2 + $0xe8] sm:$0x3] %vm225_vm1, %v3432_v0  ;;  %v294_v20 = vld [vmem:[%s3548_s21 + $0x80] sm:$0xff]  ;;  %v295_v21 = vld [vmem:[%s3548_s21 + $0x88] sm:$0xff] }
  0x1a   : > { %251 = vst.msk [vmem:[#allocation2 + $0xd8] sm:$0xff] %vm222_vm0, %v3432_v0  ;;  %252 = vst.msk [vmem:[#allocation2 + $0xe0] sm:$0xff] %vm222_vm0, %v3432_v0  ;;  %v296_v22 = vld [vmem:[%s3548_s21 + $0x90] sm:$0xff]  ;;  %v297_v23 = vld [vmem:[%s3548_s21 + $0x98] sm:$0xff] }
  0x1b   : > { %254 = vst.msk [vmem:[#allocation2 + $0xf0] sm:$0xff] %vm222_vm0, %v3432_v0  ;;  %255 = vst.msk [vmem:[#allocation2 + $0xf8] sm:$0xff] %vm222_vm0, %v3432_v0  ;;  %v298_v24 = vld [vmem:[%s3548_s21 + $0xa0] sm:$0xff]  ;;  %v299_v25 = vld [vmem:[%s3548_s21 + $0xa8] sm:$0xff] }
  0x1c   : > { %256 = vst.msk [vmem:[#allocation2 + $0x100] sm:$0x3] %vm225_vm1, %v3432_v0  ;;  %259 = vst.msk [vmem:[#allocation2 + $0x118] sm:$0x3] %vm225_vm1, %v3432_v0  ;;  %v300_v35 = vld [vmem:[%s3548_s21 + $0xb0] sm:$0xff]  ;;  %v301_v36 = vld [vmem:[%s3548_s21 + $0xb8] sm:$0xff] }
  0x1d   : > { %257 = vst.msk [vmem:[#allocation2 + $0x108] sm:$0xff] %vm222_vm0, %v3432_v0  ;;  %258 = vst.msk [vmem:[#allocation2 + $0x110] sm:$0xff] %vm222_vm0, %v3432_v0  ;;  %v302_v50 = vld [vmem:[%s3548_s21 + $0xc0] sm:$0xff]  ;;  %v303_v51 = vld [vmem:[%s3548_s21 + $0xc8] sm:$0xff] }
  0x1e   : > { %260 = vst.msk [vmem:[#allocation2 + $0x120] sm:$0xff] %vm222_vm0, %v3432_v0  ;;  %261 = vst.msk [vmem:[#allocation2 + $0x128] sm:$0xff] %vm222_vm0, %v3432_v0  ;;  %v304_v52 = vld [vmem:[%s3548_s21 + $0xd0] sm:$0xff]  ;;  %v305_v53 = vld [vmem:[%s3548_s21 + $0xd8] sm:$0xff] }
  0x1f   : > { %262 = vst.msk [vmem:[#allocation2 + $0x130] sm:$0x3] %vm225_vm1, %v3432_v0  ;;  %265 = vst.msk [vmem:[#allocation2 + $0x148] sm:$0x3] %vm225_vm1, %v3432_v0  ;;  %v306_v54 = vld [vmem:[%s3548_s21 + $0xe0] sm:$0xff]  ;;  %v307_v55 = vld [vmem:[%s3548_s21 + $0xe8] sm:$0xff] }
  0x20   : > { %263 = vst.msk [vmem:[#allocation2 + $0x138] sm:$0xff] %vm222_vm0, %v3432_v0  ;;  %264 = vst.msk [vmem:[#allocation2 + $0x140] sm:$0xff] %vm222_vm0, %v3432_v0 }
  0x21   : > { %266 = vst.msk [vmem:[#allocation2 + $0x150] sm:$0xff] %vm222_vm0, %v3432_v0  ;;  %267 = vst.msk [vmem:[#allocation2 + $0x158] sm:$0xff] %vm222_vm0, %v3432_v0 }
  0x22   : > { %268 = vst.msk [vmem:[#allocation2 + $0x160] sm:$0x3] %vm225_vm1, %v3432_v0  ;;  %271 = vst.msk [vmem:[#allocation2 + $0x178] sm:$0x3] %vm225_vm1, %v3432_v0 }
  0x23   : > { %269 = vst.msk [vmem:[#allocation2 + $0x168] sm:$0xff] %vm222_vm0, %v3432_v0  ;;  %270 = vst.msk [vmem:[#allocation2 + $0x170] sm:$0xff] %vm222_vm0, %v3432_v0 }
  0x24   : > { %272 = vst.msk [vmem:[#allocation2 + $0x180] sm:$0xff] %vm222_vm0, %v3432_v0  ;;  %273 = vst.msk [vmem:[#allocation2 + $0x188] sm:$0xff] %vm222_vm0, %v3432_v0 }
  0x25   : > { %274 = vst.msk [vmem:[#allocation2 + $0x190] sm:$0x3] %vm225_vm1, %v3432_v0  ;;  %277 = vst.msk [vmem:[#allocation2 + $0x1a8] sm:$0x3] %vm225_vm1, %v3432_v0 }
  0x26   : > { %275 = vst.msk [vmem:[#allocation2 + $0x198] sm:$0xff] %vm222_vm0, %v3432_v0  ;;  %276 = vst.msk [vmem:[#allocation2 + $0x1a0] sm:$0xff] %vm222_vm0, %v3432_v0 }
  0x27   : > { %313 = vst.msk [vmem:[#allocation2 + $0x31] sm:$0xff] %vm222_vm0, %v280_v1  ;;  %314 = vst.msk [vmem:[#allocation2 + $0x39] sm:$0xff] %vm222_vm0, %v281_v2 }
  0x28   : > { %311 = vst.msk [vmem:[#allocation2 + $0x19] sm:$0xff] %vm222_vm0, %v278_v3  ;;  %312 = vst.msk [vmem:[#allocation2 + $0x21] sm:$0xff] %vm222_vm0, %v279_v4 }
  0x29   : > { %315 = vst.msk [vmem:[#allocation2 + $0x49] sm:$0xff] %vm222_vm0, %v282_v5  ;;  %316 = vst.msk [vmem:[#allocation2 + $0x51] sm:$0xff] %vm222_vm0, %v283_v6 }
  0x2a   : > { %317 = vst.msk [vmem:[#allocation2 + $0x61] sm:$0xff] %vm222_vm0, %v284_v9  ;;  %318 = vst.msk [vmem:[#allocation2 + $0x69] sm:$0xff] %vm222_vm0, %v285_v11 }
  0x2b   : > { %319 = vst.msk [vmem:[#allocation2 + $0x79] sm:$0xff] %vm222_vm0, %v286_v12  ;;  %320 = vst.msk [vmem:[#allocation2 + $0x81] sm:$0xff] %vm222_vm0, %v287_v13 }
  0x2c   : > { %321 = vst.msk [vmem:[#allocation2 + $0x91] sm:$0xff] %vm222_vm0, %v288_v14  ;;  %322 = vst.msk [vmem:[#allocation2 + $0x99] sm:$0xff] %vm222_vm0, %v289_v15  ;;  %v407_v14 = vld [vmem:[#allocation2 + $0x2] sm:$0xff]  ;;  %v408_v15 = vld [vmem:[#allocation2 + $0xa] sm:$0xff] }
  0x2d   : > { %323 = vst.msk [vmem:[#allocation2 + $0xa9] sm:$0xff] %vm222_vm0, %v290_v16  ;;  %324 = vst.msk [vmem:[#allocation2 + $0xb1] sm:$0xff] %vm222_vm0, %v291_v17  ;;  %v2853_v17 = vpack.i.bf16 %v408_v15, %v407_v14 }
  0x2e   : > { %325 = vst.msk [vmem:[#allocation2 + $0xc1] sm:$0xff] %vm222_vm0, %v292_v18  ;;  %326 = vst.msk [vmem:[#allocation2 + $0xc9] sm:$0xff] %vm222_vm0, %v293_v19  ;;  %v379_v26 = vld [vmem:[#allocation2 + $0x31] sm:$0xff]  ;;  %v380_v27 = vld [vmem:[#allocation2 + $0x39] sm:$0xff] }
  0x2f   : > { %327 = vst.msk [vmem:[#allocation2 + $0xd9] sm:$0xff] %vm222_vm0, %v294_v20  ;;  %328 = vst.msk [vmem:[#allocation2 + $0xe1] sm:$0xff] %vm222_vm0, %v295_v21  ;;  %v377_v28 = vld [vmem:[#allocation2 + $0x19] sm:$0xff]  ;;  %v3595_v29 = vpack.i.bf16 %v380_v27, %v379_v26  ;;  %v378_v30 = vld [vmem:[#allocation2 + $0x21] sm:$0xff] }
  0x30   : > { %329 = vst.msk [vmem:[#allocation2 + $0xf1] sm:$0xff] %vm222_vm0, %v296_v22  ;;  %330 = vst.msk [vmem:[#allocation2 + $0xf9] sm:$0xff] %vm222_vm0, %v297_v23  ;;  %v381_v31 = vld [vmem:[#allocation2 + $0x49] sm:$0xff]  ;;  %v382_v32 = vld [vmem:[#allocation2 + $0x51] sm:$0xff]  ;;  %v3597_v33 = vpack.i.bf16 %v378_v30, %v377_v28 }
  0x31   : > { %331 = vst.msk [vmem:[#allocation2 + $0x109] sm:$0xff] %vm222_vm0, %v298_v24  ;;  %332 = vst.msk [vmem:[#allocation2 + $0x111] sm:$0xff] %vm222_vm0, %v299_v25  ;;  %v383_v34 = vld [vmem:[#allocation2 + $0x61] sm:$0xff]  ;;  %2784 = vrot.lane.b32.xlu1 %v3595_v29, %s3433_s22  ;;  %v3603_v37 = vpack.i.bf16 %v382_v32, %v381_v31  ;;  %v384_v38 = vld [vmem:[#allocation2 + $0x69] sm:$0xff] }
  0x32   : > { %333 = vst.msk [vmem:[#allocation2 + $0x121] sm:$0xff] %vm222_vm0, %v300_v35  ;;  %334 = vst.msk [vmem:[#allocation2 + $0x129] sm:$0xff] %vm222_vm0, %v301_v36  ;;  %2779 = vrot.lane.b32.xlu0 %v3597_v33, %s3433_s22  ;;  %v3609_v39 = vpack.i.bf16 %v384_v38, %v383_v34  ;;  %v385_v40 = vld [vmem:[#allocation2 + $0x79] sm:$0xff]  ;;  %v386_v41 = vld [vmem:[#allocation2 + $0x81] sm:$0xff] }
  0x33   : > { %v387_v42 = vld [vmem:[#allocation2 + $0x91] sm:$0xff]  ;;  %v388_v43 = vld [vmem:[#allocation2 + $0x99] sm:$0xff]  ;;  %v3613_v45 = vpack.i.bf16 %v386_v41, %v385_v40  ;;  %335 = vst.msk [vmem:[#allocation2 + $0x139] sm:$0xff] %vm222_vm0, %v302_v50  ;;  %336 = vst.msk [vmem:[#allocation2 + $0x141] sm:$0xff] %vm222_vm0, %v303_v51 }
  0x34   : > { %v389_v44 = vld [vmem:[#allocation2 + $0xa9] sm:$0xff]  ;;  %v390_v46 = vld [vmem:[#allocation2 + $0xb1] sm:$0xff]  ;;  %v3617_v49 = vpack.i.bf16 %v388_v43, %v387_v42  ;;  %337 = vst.msk [vmem:[#allocation2 + $0x151] sm:$0xff] %vm222_vm0, %v304_v52  ;;  %338 = vst.msk [vmem:[#allocation2 + $0x159] sm:$0xff] %vm222_vm0, %v305_v53 }
  0x35   : > { %2789 = vrot.lane.b32.xlu1 %v3603_v37, %s3433_s22  ;;  %v391_v47 = vld [vmem:[#allocation2 + $0xc1] sm:$0xff]  ;;  %v392_v48 = vld [vmem:[#allocation2 + $0xc9] sm:$0xff]  ;;  %339 = vst.msk [vmem:[#allocation2 + $0x169] sm:$0xff] %vm222_vm0, %v306_v54  ;;  %340 = vst.msk [vmem:[#allocation2 + $0x171] sm:$0xff] %vm222_vm0, %v307_v55  ;;  %v3633_v56 = vpack.i.bf16 %v390_v46, %v389_v44 }
  0x36   : > { %2794 = vrot.lane.b32.xlu0 %v3609_v39, %s3433_s22  ;;  %v3637_v57 = vpack.i.bf16 %v392_v48, %v391_v47  ;;  %v393_v58 = vld [vmem:[#allocation2 + $0xd9] sm:$0xff]  ;;  %v394_v59 = vld [vmem:[#allocation2 + $0xe1] sm:$0xff]  ;;  %v413_v24 = vld [vmem:[#allocation2 + $0x4a] sm:$0xff] }
  0x37   : > { %v395_v60 = vld [vmem:[#allocation2 + $0xf1] sm:$0xff]  ;;  %v396_v61 = vld [vmem:[#allocation2 + $0xf9] sm:$0xff]  ;;  %v3641_v62 = vpack.i.bf16 %v394_v59, %v393_v58  ;;  %v410_v19 = vld [vmem:[#allocation2 + $0x22] sm:$0xff] }
  0x38   : > { %v3645_v63 = vpack.i.bf16 %v396_v61, %v395_v60  ;;  %v397_v0 = vld [vmem:[#allocation2 + $0x109] sm:$0xff]  ;;  %v398_v1 = vld [vmem:[#allocation2 + $0x111] sm:$0xff]  ;;  %v409_v18 = vld [vmem:[#allocation2 + $0x1a] sm:$0xff] }
  0x39   : > { %2799 = vrot.lane.b32.xlu1 %v3613_v45, %s3433_s22  ;;  %v399_v2 = vld [vmem:[#allocation2 + $0x121] sm:$0xff]  ;;  %v400_v3 = vld [vmem:[#allocation2 + $0x129] sm:$0xff]  ;;  %v3649_v4 = vpack.i.bf16 %v398_v1, %v397_v0  ;;  %v411_v20 = vld [vmem:[#allocation2 + $0x32] sm:$0xff]  ;;  %v3665_v22 = vpack.i.bf16 %v410_v19, %v409_v18 }
  0x3a   : > { %2804 = vrot.lane.b32.xlu0 %v3617_v49, %s3433_s22  ;;  %v3653_v5 = vpack.i.bf16 %v400_v3, %v399_v2  ;;  %v401_v6 = vld [vmem:[#allocation2 + $0x139] sm:$0xff]  ;;  %v402_v7 = vld [vmem:[#allocation2 + $0x141] sm:$0xff]  ;;  %v416_v27 = vld [vmem:[#allocation2 + $0x6a] sm:$0xff] }
  0x3b   : > { %v403_v8 = vld [vmem:[#allocation2 + $0x151] sm:$0xff]  ;;  %v404_v9 = vld [vmem:[#allocation2 + $0x159] sm:$0xff]  ;;  %v3657_v10 = vpack.i.bf16 %v402_v7, %v401_v6  ;;  %v415_v26 = vld [vmem:[#allocation2 + $0x62] sm:$0xff] }
  0x3c   : > { %v2843_v11 = vpack.i.bf16 %v404_v9, %v403_v8  ;;  %v405_v12 = vld [vmem:[#allocation2 + $0x169] sm:$0xff]  ;;  %v406_v13 = vld [vmem:[#allocation2 + $0x171] sm:$0xff]  ;;  %v412_v21 = vld [vmem:[#allocation2 + $0x3a] sm:$0xff]  ;;  %v3680_v32 = vpack.i.bf16 %v416_v27, %v415_v26 }
  0x3d   : > { %2809 = vrot.lane.b32.xlu1 %v3633_v56, %s3433_s22  ;;  %v2848_v16 = vpack.i.bf16 %v406_v13, %v405_v12  ;;  %v3668_v23 = vpack.i.bf16 %v412_v21, %v411_v20  ;;  %v414_v25 = vld [vmem:[#allocation2 + $0x52] sm:$0xff]  ;;  %v417_v34 = vld [vmem:[#allocation2 + $0x7a] sm:$0xff]  ;;  %v418_v35 = vld [vmem:[#allocation2 + $0x82] sm:$0xff] }
  0x3e   : > { %2814 = vrot.lane.b32.xlu0 %v3637_v57, %s3433_s22  ;;  %v308_v28 = vld [vmem:[%s3548_s21 + $0xf0] sm:$0xff]  ;;  %v309_v30 = vld [vmem:[%s3548_s21 + $0xf8] sm:$0xff]  ;;  %v3676_v31 = vpack.i.bf16 %v414_v25, %v413_v24  ;;  %v3684_v40 = vpack.i.bf16 %v418_v35, %v417_v34  ;;  %v423_v44 = vld [vmem:[#allocation2 + $0xc2] sm:$0xff] }
  0x3f   : > { %341 = vst.msk [vmem:[#allocation2 + $0x181] sm:$0xff] %vm222_vm0, %v308_v28  ;;  %342 = vst.msk [vmem:[#allocation2 + $0x189] sm:$0xff] %vm222_vm0, %v309_v30  ;;  %v419_v36 = vld [vmem:[#allocation2 + $0x92] sm:$0xff]  ;;  %v420_v38 = vld [vmem:[#allocation2 + $0x9a] sm:$0xff] }
  0x40   : > { %v2883_v41 = vpack.i.bf16 %v420_v38, %v419_v36  ;;  %v421_v42 = vld [vmem:[#allocation2 + $0xaa] sm:$0xff]  ;;  %v422_v43 = vld [vmem:[#allocation2 + $0xb2] sm:$0xff]  ;;  %v425_v50 = vld [vmem:[#allocation2 + $0xda] sm:$0xff] }
  0x41   : > { %2819 = vrot.lane.b32.xlu1 %v3641_v62, %s3433_s22  ;;  %v424_v46 = vld [vmem:[#allocation2 + $0xca] sm:$0xff]  ;;  %v2888_v47 = vpack.i.bf16 %v422_v43, %v421_v42  ;;  %v426_v51 = vld [vmem:[#allocation2 + $0xe2] sm:$0xff]  ;;  %v427_v52 = vld [vmem:[#allocation2 + $0xf2] sm:$0xff] }
  0x42   : > { %2824 = vrot.lane.b32.xlu0 %v3645_v63, %s3433_s22  ;;  %v2893_v48 = vpack.i.bf16 %v424_v46, %v423_v44  ;;  %v428_v53 = vld [vmem:[#allocation2 + $0xfa] sm:$0xff]  ;;  %v3692_v54 = vpack.i.bf16 %v426_v51, %v425_v50  ;;  %v429_v58 = vld [vmem:[#allocation2 + $0x10a] sm:$0xff]  ;;  %v430_v59 = vld [vmem:[#allocation2 + $0x112] sm:$0xff] }
  0x43   : > { %v3695_v55 = vpack.i.bf16 %v428_v53, %v427_v52  ;;  %v431_v60 = vld [vmem:[#allocation2 + $0x122] sm:$0xff]  ;;  %v432_v61 = vld [vmem:[#allocation2 + $0x12a] sm:$0xff]  ;;  %v3699_v0 = vpack.i.bf16 %v430_v59, %v429_v58  ;;  %v433_v2 = vld [vmem:[#allocation2 + $0x13a] sm:$0xff] }
  0x44   : > { %v3703_v1 = vpack.i.bf16 %v432_v61, %v431_v60  ;;  %v434_v3 = vld [vmem:[#allocation2 + $0x142] sm:$0xff]  ;;  %v435_v6 = vld [vmem:[#allocation2 + $0x152] sm:$0xff]  ;;  %v436_v7 = vld [vmem:[#allocation2 + $0x15a] sm:$0xff] }
  0x45   : > { %2829 = vrot.lane.b32.xlu1 %v3649_v4, %s3433_s22  ;;  %v3707_v8 = vpack.i.bf16 %v434_v3, %v433_v2  ;;  %v2923_v9 = vpack.i.bf16 %v436_v7, %v435_v6  ;;  %v438_v12 = vld [vmem:[#allocation2 + $0x172] sm:$0xff]  ;;  %v3713_v14 = vld [vmem:[#allocation2 + $0x20] sm:$0xff]  ;;  %v443_v19 = vld [vmem:[#allocation2 + $0x48] sm:$0xff] }
  0x46   : > { %2834 = vrot.lane.b32.xlu0 %v3653_v5, %s3433_s22  ;;  %v3711_v13 = vld [vmem:[#allocation2 + $0x18] sm:$0xff]  ;;  %v444_v20 = vld [vmem:[#allocation2 + $0x50] sm:$0xff]  ;;  %v3726_v25 = vld [vmem:[#allocation2 + $0x60] sm:$0xff] }
  0x47   : > { %v442_v18 = vld [vmem:[#allocation2 + $0x38] sm:$0xff]  ;;  %v3724_v24 = vpack.i.bf16 %v444_v20, %v443_v19  ;;  %v3728_v26 = vld [vmem:[#allocation2 + $0x68] sm:$0xff]  ;;  %v3732_v28 = vld [vmem:[#allocation2 + $0x80] sm:$0xff] }
  0x48   : > { %v3730_v27 = vld [vmem:[#allocation2 + $0x78] sm:$0xff]  ;;  %v3738_v30 = vpack.i.bf16 %v3728_v26, %v3726_v25  ;;  %v3746_v35 = vld [vmem:[#allocation2 + $0x90] sm:$0xff]  ;;  %v3750_v38 = vld [vmem:[#allocation2 + $0xa8] sm:$0xff] }
  0x49   : > { %2839 = vrot.lane.b32.xlu1 %v3657_v10, %s3433_s22  ;;  %v3744_v34 = vpack.i.bf16 %v3732_v28, %v3730_v27  ;;  %v3748_v36 = vld [vmem:[#allocation2 + $0x98] sm:$0xff]  ;;  %v3766_v44 = vld [vmem:[#allocation2 + $0xc0] sm:$0xff]  ;;  %v3768_v46 = vld [vmem:[#allocation2 + $0xc8] sm:$0xff] }
  0x4a   : > { %2844 = vrot.lane.b32.xlu0 %v2843_v11, %s3433_s22  ;;  %v437_v11 = vld [vmem:[#allocation2 + $0x16a] sm:$0xff]  ;;  %v3758_v42 = vpack.i.bf16 %v3748_v36, %v3746_v35  ;;  %5036 = vst [vmem:[#allocation3_spill] sm:$0xff] %v3766_v44  ;;  %5037 = vst [vmem:[#allocation4_spill] sm:$0xff] %v3768_v46  ;;  %v2968_v50 = vpack.i.bf16 %v3768_v46, %v3766_v44  ;;  %v458_v53 = vld [vmem:[#allocation2 + $0xf8] sm:$0xff] }
  0x4b   : > { %v2928_v15 = vpack.i.bf16 %v438_v12, %v437_v11  ;;  %v457_v52 = vld [vmem:[#allocation2 + $0xf0] sm:$0xff]  ;;  %v459_v58 = vld [vmem:[#allocation2 + $0x108] sm:$0xff]  ;;  %v3786_v2 = vld [vmem:[#allocation2 + $0x120] sm:$0xff] }
  0x4c   : > { %v460_v59 = vld [vmem:[#allocation2 + $0x110] sm:$0xff]  ;;  %v2978_v60 = vpack.i.bf16 %v458_v53, %v457_v52  ;;  %v3788_v3 = vld [vmem:[#allocation2 + $0x128] sm:$0xff]  ;;  %v3790_v6 = vld [vmem:[#allocation2 + $0x138] sm:$0xff] }
  0x4d   : > { %2849 = vrot.lane.b32.xlu1 %v2848_v16, %s3433_s22  ;;  %v2933_v16 = vpack.i.bf16 %v3713_v14, %v3711_v13  ;;  %v3784_v61 = vpack.i.bf16 %v460_v59, %v459_v58  ;;  %v3792_v7 = vld [vmem:[#allocation2 + $0x140] sm:$0xff]  ;;  %v3805_v12 = vld [vmem:[#allocation2 + $0x150] sm:$0xff]  ;;  %v3414_v52 = vld [vmem:[%s5011_s1 + $0x8] sm:$0xff]   ;;  %s220_s22 = scalar_lea.vmem %s5014_s4, %s2665_s18 }
  0x4e   : > { %2854 = vrot.lane.b32.xlu0 %v2853_v17, %s3434_s23  ;;  %v441_v17 = vld [vmem:[#allocation2 + $0x30] sm:$0xff]  ;;  %v3803_v11 = vpack.i.bf16 %v3792_v7, %v3790_v6  ;;  %v469_v20 = vld [vmem:[#allocation2 + $0x180] sm:$0xff] }
  0x4f   : > { %v3721_v21 = vpack.i.bf16 %v442_v18, %v441_v17  ;;  %v3811_v17 = vld [vmem:[#allocation2 + $0x170] sm:$0xff]  ;;  %v3415_v58 = vld [vmem:[%s5011_s1] sm:$0xff]  }
  0x51   : > { %2859 = vrot.lane.b32.xlu1 %v3665_v22, %s3434_s23 }
  0x52   : > { %2864 = vrot.lane.b32.xlu0 %v3668_v23, %s3434_s23 }
  0x55   : > { %2869 = vrot.lane.b32.xlu1 %v3676_v31, %s3434_s23 }
  0x56   : > { %2874 = vrot.lane.b32.xlu0 %v3680_v32, %s3434_s23 }
  0x59   : > { %2879 = vrot.lane.b32.xlu1 %v3684_v40, %s3434_s23 }
  0x5a   : > { %2884 = vrot.lane.b32.xlu0 %v2883_v41, %s3434_s23  ;;  %v3752_v41 = vld [vmem:[#allocation2 + $0xb0] sm:$0xff] }
  0x5b   : > { %v3764_v43 = vpack.i.bf16 %v3752_v41, %v3750_v38 }
  0x5d   : > { %2889 = vrot.lane.b32.xlu1 %v2888_v47, %s3434_s23  ;;  %v3770_v47 = vld [vmem:[#allocation2 + $0xd8] sm:$0xff] }
  0x5e   : > { %2894 = vrot.lane.b32.xlu0 %v2893_v48, %s3434_s23  ;;  %5038 = vst [vmem:[#allocation5_spill] sm:$0xff] %v3770_v47  ;;  %v3772_v48 = vld [vmem:[#allocation2 + $0xe0] sm:$0xff] }
  0x5f   : > { %5039 = vst [vmem:[#allocation6_spill] sm:$0xff] %v3772_v48  ;;  %v2973_v51 = vpack.i.bf16 %v3772_v48, %v3770_v47  ;;  %v513_v47 = vld [vmem:[#allocation2 + $0x92] sm:$0xff]  ;;  %v514_v48 = vld [vmem:[#allocation2 + $0x9a] sm:$0xff] }
  0x61   : > { %2899 = vrot.lane.b32.xlu1 %v3692_v54, %s3434_s23 }
  0x62   : > { %2904 = vrot.lane.b32.xlu0 %v3695_v55, %s3434_s23 }
  0x65   : > { %2909 = vrot.lane.b32.xlu1 %v3699_v0, %s3434_s23 }
  0x66   : > { %2914 = vrot.lane.b32.xlu0 %v3703_v1, %s3434_s23 }
  0x69   : > { %2919 = vrot.lane.b32.xlu1 %v3707_v8, %s3434_s23 }
  0x6a   : > { %2924 = vrot.lane.b32.xlu0 %v2923_v9, %s3434_s23  ;;  %v3797_v9 = vpack.i.bf16 %v3788_v3, %v3786_v2 }
  0x6d   : > { %2929 = vrot.lane.b32.xlu1 %v2928_v15, %s3434_s23  ;;  %v3807_v15 = vld [vmem:[#allocation2 + $0x158] sm:$0xff] }
  0x6e   : > { %2934 = vrot.lane.b32.xlu0 %v2933_v16, %s3435_s24  ;;  %v3809_v16 = vld [vmem:[#allocation2 + $0x168] sm:$0xff]  ;;  %v3817_v18 = vpack.i.bf16 %v3807_v15, %v3805_v12 }
  0x6f   : > { %v3823_v19 = vpack.i.bf16 %v3811_v17, %v3809_v16 }
  0x71   : > { %2939 = vrot.lane.b32.xlu1 %v3721_v21, %s3435_s24 }
  0x72   : > { %2944 = vrot.lane.b32.xlu0 %v3724_v24, %s3435_s24 }
  0x75   : > { %2949 = vrot.lane.b32.xlu1 %v3738_v30, %s3435_s24 }
  0x76   : > { %2954 = vrot.lane.b32.xlu0 %v3744_v34, %s3435_s24 }
  0x79   : > { %2959 = vrot.lane.b32.xlu1 %v3758_v42, %s3435_s24 }
  0x7a   : > { %2964 = vrot.lane.b32.xlu0 %v3764_v43, %s3435_s24 }
  0x7d   : > { %2969 = vrot.lane.b32.xlu1 %v2968_v50, %s3435_s24  ;;  %v470_v50 = vld [vmem:[#allocation2 + $0x188] sm:$0xff] }
  0x7e   : > { %2974 = vrot.lane.b32.xlu0 %v2973_v51, %s3435_s24  ;;  %v3008_v51 = vpack.i.bf16 %v470_v50, %v469_v20 }
  0x81   : > { %2979 = vrot.lane.b32.xlu1 %v2978_v60, %s3435_s24 }
  0x82   : > { %2984 = vrot.lane.b32.xlu0 %v3784_v61, %s3435_s24 }
  0x85   : > { %2989 = vrot.lane.b32.xlu1 %v3797_v9, %s3435_s24 }
  0x86   : > { %2994 = vrot.lane.b32.xlu0 %v3803_v11, %s3435_s24 }
  0x89   : > { %2999 = vrot.lane.b32.xlu1 %v3817_v18, %s3435_s24 }
  0x8a   : > { %3004 = vrot.lane.b32.xlu0 %v3823_v19, %s3435_s24 }
  0x8d   : > { %3009 = vrot.lane.b32.xlu1 %v3008_v51, %s3435_s24 }
  0x8e   : > { %3014 = vrot.lane.b32.xlu0 %v3597_v33, %s3436_s25  ;;  %v3848_v33 = vpop.permute.xlu0 %2774 }
  0x91   : > { %3019 = vrot.lane.b32.xlu1 %v3595_v29, %s3436_s25 }
  0x92   : > { %3024 = vrot.lane.b32.xlu0 %v3603_v37, %s3436_s25 }
  0x95   : > { %3029 = vrot.lane.b32.xlu1 %v3609_v39, %s3436_s25 }
  0x96   : > { %3034 = vrot.lane.b32.xlu0 %v3613_v45, %s3436_s25 }
  0x99   : > { %3039 = vrot.lane.b32.xlu1 %v3617_v49, %s3436_s25 }
  0x9a   : > { %3044 = vrot.lane.b32.xlu0 %v3633_v56, %s3436_s25 }
  0x9d   : > { %3049 = vrot.lane.b32.xlu1 %v3637_v57, %s3436_s25  ;;  %v3413_v57 = vld [vmem:[%s5011_s1 + $0x10] ss:$0 sps:$4 sm:$0x33]  }
  0x9e   : > { %3054 = vrot.lane.b32.xlu0 %v3641_v62, %s3436_s25  ;;  %2753 = vmatprep.subr.msk.bf16.mxu0 %vm2004_vm2, %v3413_v57  ;;  %v2006_v62 = vsel %vm2004_vm2, %v3413_v57, 0 }
  0x9f   : > { %2710 = vmatpush3.bf16.msra.mxu0 %v2006_v62  ;;  %2754 = vmatprep.subr.msk.bf16.mxu1 %vm2004_vm2, %v3413_v57 }
  0xa0   : > { %2750 = vmatpush3.bf16.msra.mxu1 %v2006_v62  ;;  %2711 = vmatprep.subr.bf16.mxu0 %v3414_v52  ;;  %v572_v62 = vld [vmem:[#allocation2 + $0x61] sm:$0xff] }
  0xa1   : > { %3059 = vrot.lane.b32.xlu1 %v3645_v63, %s3436_s25  ;;  %2748 = vmatprep.subr.bf16.mxu1 %v3414_v52 }
  0xa2   : > { %3064 = vrot.lane.b32.xlu0 %v3665_v22, %s3437_s26 }
  0xa3   : > { %v3854_v39 = vpop.permute.xlu1 %2784  ;;  %2712 = vmatpush3.bf16.msra.mxu0 %v3414_v52 }
  0xa4   : > { %5040 = vst [vmem:[#allocation7_spill] sm:$0xff] %v3854_v39  ;;  %v3856_v45 = vpop.permute.xlu0 %2779  ;;  %2751 = vmatpush3.bf16.msra.mxu1 %v3414_v52  ;;  %2713 = vmatprep.subr.bf16.mxu0 %v3415_v58  ;;  %v573_v52 = vld [vmem:[#allocation2 + $0x69] sm:$0xff] }
  0xa5   : > { %3069 = vrot.lane.b32.xlu1 %v3692_v54, %s3437_s26  ;;  %2749 = vmatprep.subr.bf16.mxu1 %v3415_v58 }
  0xa6   : > { %3074 = vrot.lane.b32.xlu0 %v3668_v23, %s3437_s26 }
  0xa7   : > { %v3862_v49 = vpop.permute.xlu1 %2789  ;;  %2714 = vmatpush3.bf16.msra.mxu0 %v3415_v58 }
  0xa8   : > { %5041 = vst [vmem:[#allocation8_spill] sm:$0xff] %v3862_v49  ;;  %v3864_v56 = vpop.permute.xlu0 %2794  ;;  %2752 = vmatpush3.bf16.msra.mxu1 %v3415_v58 }
  0xa9   : > { %3079 = vrot.lane.b32.xlu1 %v3695_v55, %s3437_s26 }
  0xaa   : > { %3084 = vrot.lane.b32.xlu0 %v3721_v21, %s3438_s29 }
  0xab   : > { %v3873_v22 = vpop.permute.xlu1 %2799 }
  0xac   : > { %v3875_v54 = vpop.permute.xlu0 %2804 }
  0xad   : > { %3089 = vrot.lane.b32.xlu1 %v2978_v60, %s3438_s29  ;;  %v2806_v44 = vunpack.i.l.bf16 %v3875_v54 }
  0xae   : > { %3094 = vrot.lane.b32.xlu0 %v3724_v24, %s3438_s29 }
  0xaf   : > { %v3883_v21 = vpop.permute.xlu1 %2809 }
  0xb0   : > { %v3885_v53 = vpop.permute.xlu0 %2814 }
  0xb1   : > { %3099 = vrot.lane.b32.xlu1 %v3784_v61, %s3438_s29 }
  0xb2   : > { %3104 = vrot.lane.b32.xlu0 %v3595_v29, %s3439_s8 }
  0xb3   : > { %v3894_v24 = vpop.permute.xlu1 %2819 }
  0xb4   : > { %v3896_v59 = vpop.permute.xlu0 %2824 }
  0xb5   : > { %5042 = vst [vmem:[#allocation9_spill] sm:$0xff] %v3896_v59  ;;  %3109 = vrot.lane.b32.xlu1 %v3645_v63, %s3439_s8 }
  0xb6   : > { %3114 = vrot.lane.b32.xlu0 %v3603_v37, %s3439_s8 }
  0xb7   : > { %v3902_v60 = vpop.permute.xlu1 %2829 }
  0xb8   : > { %5043 = vst [vmem:[#allocation10_spill] sm:$0xff] %v3902_v60  ;;  %v3904_v61 = vpop.permute.xlu0 %2834  ;;  %v575_v60 = vld [vmem:[#allocation2 + $0x81] sm:$0xff] }
  0xb9   : > { %3119 = vrot.lane.b32.xlu1 %v3649_v4, %s3439_s8 }
  0xba   : > { %3124 = vrot.lane.b32.xlu0 %v3668_v23, %s3440_s9 }
  0xbb   : > { %v3910_v29 = vpop.permute.xlu1 %2839 }
  0xbc   : > { %v3912_v20 = vpop.permute.xlu0 %2844 }
  0xbd   : > { %3129 = vrot.lane.b32.xlu1 %v3695_v55, %s3440_s9 }
  0xbe   : > { %3134 = vrot.lane.b32.xlu0 %v3676_v31, %s3440_s9 }
  0xbf   : > { %v3918_v37 = vpop.permute.xlu1 %2849 }
  0xc0   : > { %v3920_v63 = vpop.permute.xlu0 %2854 }
  0xc1   : > { %3139 = vrot.lane.b32.xlu1 %v3699_v0, %s3440_s9 }
  0xc2   : > { %3144 = vrot.lane.b32.xlu0 %v3649_v4, %s3436_s25 }
  0xc3   : > { %v3926_v23 = vpop.permute.xlu1 %2859 }
  0xc4   : > { %5044 = vst [vmem:[#allocation11_spill] sm:$0xff] %v3926_v23  ;;  %v3928_v50 = vpop.permute.xlu0 %2864  ;;  %v4011_v23 = vpack.i.bf16 %v514_v48, %v513_v47  ;;  %v1668_v47 = vsel %vm222_vm0, %v3746_v35, %v2806_v44 }
  0xc5   : > { %5045 = vst [vmem:[#allocation12_spill] sm:$0xff] %v3928_v50  ;;  %3149 = vrot.lane.b32.xlu1 %v3653_v5, %s3436_s25  ;;  %v574_v50 = vld [vmem:[#allocation2 + $0x79] sm:$0xff] }
  0xc6   : > { %3154 = vrot.lane.b32.xlu0 %v3676_v31, %s3437_s26 }
  0xc7   : > { %v3934_v55 = vpop.permute.xlu1 %2869 }
  0xc8   : > { %5046 = vst [vmem:[#allocation13_spill] sm:$0xff] %v3934_v55  ;;  %v3936_v51 = vpop.permute.xlu0 %2874 }
  0xc9   : > { %3159 = vrot.lane.b32.xlu1 %v3699_v0, %s3437_s26  ;;  %v3193_v0 = vpack.i.bf16 %v573_v52, %v572_v62  ;;  %v497_v52 = vld [vmem:[#allocation2 + $0x151] sm:$0xff]  ;;  %v2876_v46 = vunpack.i.l.bf16 %v3936_v51 }
  0xca   : > { %3164 = vrot.lane.b32.xlu0 %v3680_v32, %s3437_s26 }
  0xcb   : > { %v3942_v4 = vpop.permute.xlu1 %2879 }
  0xcc   : > { %v3944_v57 = vpop.permute.xlu0 %2884 }
  0xcd   : > { %3169 = vrot.lane.b32.xlu1 %v3703_v1, %s3437_s26 }
  0xce   : > { %3174 = vrot.lane.b32.xlu0 %v3738_v30, %s3438_s29  ;;  %v3203_v30 = vpack.i.bf16 %v575_v60, %v574_v50  ;;  %v495_v60 = vld [vmem:[#allocation2 + $0x139] sm:$0xff]  ;;  %v496_v50 = vld [vmem:[#allocation2 + $0x141] sm:$0xff] }
  0xcf   : > { %v3950_v31 = vpop.permute.xlu1 %2889 }
  0xd0   : > { %v3952_v58 = vpop.permute.xlu0 %2894 }
  0xd1   : > { %5047 = vst [vmem:[#allocation14_spill] sm:$0xff] %v3952_v58  ;;  %3179 = vrot.lane.b32.xlu1 %v3797_v9, %s3438_s29 }
  0xd2   : > { %3184 = vrot.lane.b32.xlu0 %v3744_v34, %s3438_s29 }
  0xd3   : > { %v3958_v55 = vpop.permute.xlu1 %2899 }
  0xd4   : > { %5048 = vst [vmem:[#allocation15_spill] sm:$0xff] %v3958_v55  ;;  %v3960_v59 = vpop.permute.xlu0 %2904  ;;  %v2801_v55 = vunpack.i.l.bf16 %v3873_v22 }
  0xd5   : > { %5049 = vst [vmem:[#allocation16_spill] sm:$0xff] %v3960_v59  ;;  %3189 = vrot.lane.b32.xlu1 %v3803_v11, %s3438_s29  ;;  %v512_v59 = vld [vmem:[#allocation2 + $0x82] sm:$0xff] }
  0xd6   : > { %3194 = vrot.lane.b32.xlu0 %v3193_v0, %s3439_s8  ;;  %v498_v0 = vld [vmem:[#allocation2 + $0x159] sm:$0xff] }
  0xd7   : > { %v3965_v49 = vpop.permute.xlu1 %2909 }
  0xd8   : > { %5050 = vst [vmem:[#allocation17_spill] sm:$0xff] %v3965_v49  ;;  %v3967_v39 = vpop.permute.xlu0 %2914  ;;  %v511_v49 = vld [vmem:[#allocation2 + $0x7a] sm:$0xff] }
  0xd9   : > { %3199 = vrot.lane.b32.xlu1 %v3653_v5, %s3439_s8  ;;  %v3233_v5 = vpack.i.bf16 %v496_v50, %v495_v60  ;;  %v530_v60 = vld [vmem:[#allocation2 + $0x15a] sm:$0xff]  ;;  %v2807_v50 = vunpack.i.h.bf16 %v3875_v54 }
  0xda   : > { %3204 = vrot.lane.b32.xlu0 %v3203_v30, %s3439_s8  ;;  %v2796_v30 = vunpack.i.l.bf16 %v3864_v56 }
  0xdb   : > { %v3972_v34 = vpop.permute.xlu1 %2919 }
  0xdc   : > { %v3974_v9 = vpop.permute.xlu0 %2924  ;;  %v1664_v54 = vsel %vm222_vm0, %v3726_v25, %v2796_v30  ;;  %v1669_v25 = vsel %vm222_vm0, %v3748_v36, %v2807_v50  ;;  %v2812_v36 = vunpack.i.h.bf16 %v3883_v21 }
  0xdd   : > { %3209 = vrot.lane.b32.xlu1 %v3657_v10, %s3439_s8  ;;  %v2797_v10 = vunpack.i.h.bf16 %v3864_v56  ;;  %v4000_v56 = vpack.i.bf16 %v498_v0, %v497_v52 }
  0xde   : > { %3214 = vrot.lane.b32.xlu0 %v3680_v32, %s3440_s9 }
  0xdf   : > { %v3980_v11 = vpop.permute.xlu1 %2929 }
  0xe0   : > { %v3982_v62 = vpop.permute.xlu0 %2934 }
  0xe1   : > { %5051 = vst [vmem:[#allocation18_spill] sm:$0xff] %v3982_v62  ;;  %3219 = vrot.lane.b32.xlu1 %v3703_v1, %s3440_s9  ;;  %v2802_v62 = vunpack.i.h.bf16 %v3873_v22  ;;  %v3243_v22 = vpack.i.bf16 %v512_v59, %v511_v49  ;;  %v2882_v49 = vunpack.i.h.bf16 %v3942_v4  ;;  %v2881_v59 = vunpack.i.l.bf16 %v3942_v4 }
  0xe2   : > { %3224 = vrot.lane.b32.xlu0 %v3684_v40, %s3440_s9  ;;  %v529_v40 = vld [vmem:[#allocation2 + $0x152] sm:$0xff]  ;;  %v2886_v4 = vunpack.i.l.bf16 %v3944_v57 }
  0xe3   : > { %v3990_v32 = vpop.permute.xlu1 %2939  ;;  %v4013_v52 = vpack.i.bf16 %v530_v60, %v529_v40  ;;  %v1667_v0 = vsel %vm222_vm0, %v3732_v28, %v2802_v62  ;;  %v1697_v28 = vsel %vm1688_vm3, %v1664_v54, %v2876_v46  ;;  %v2811_v62 = vunpack.i.l.bf16 %v3883_v21 }
  0xe4   : > { %5052 = vst [vmem:[#allocation19_spill] sm:$0xff] %v3990_v32  ;;  %v3994_v1 = vpop.permute.xlu0 %2944  ;;  %v2877_v32 = vunpack.i.h.bf16 %v3936_v51  ;;  %v1666_v51 = vsel %vm222_vm0, %v3730_v27, %v2801_v55  ;;  %v2887_v55 = vunpack.i.h.bf16 %v3944_v57  ;;  %v1700_v46 = vsel %vm1688_vm3, %v1667_v0, %v2882_v49 }
  0xe5   : > { %5053 = vst [vmem:[#allocation20_spill] sm:$0xff] %v3994_v1  ;;  %3229 = vrot.lane.b32.xlu1 %v3707_v8, %s3440_s9  ;;  %v1665_v1 = vsel %vm222_vm0, %v3728_v26, %v2797_v10  ;;  %v1699_v30 = vsel %vm1688_vm3, %v1666_v51, %v2881_v59  ;;  %v2892_v40 = vunpack.i.h.bf16 %v3950_v31  ;;  %v2891_v60 = vunpack.i.l.bf16 %v3950_v31 }
  0xe6   : > { %3234 = vrot.lane.b32.xlu0 %v3233_v5, %s3436_s25  ;;  %v1698_v27 = vsel %vm1688_vm3, %v1665_v1, %v2877_v32  ;;  %v1702_v54 = vsel %vm1688_vm3, %v1669_v25, %v2887_v55  ;;  %v1671_v59 = vsel %vm222_vm0, %v3752_v41, %v2812_v36  ;;  %v2836_v41 = vunpack.i.l.bf16 %v3904_v61  ;;  %v576_v36 = vld [vmem:[#allocation2 + $0x91] sm:$0xff] }
  0xe7   : > { %v4009_v58 = vpop.permute.xlu1 %2949 }
  0xe8   : > { %v2955_v26 = vpop.permute.xlu0 %2954 }
  0xe9   : > { %v2957_v48 = vunpack.i.h.bf16 %v2955_v26  ;;  %v2956_v5 = vunpack.i.l.bf16 %v2955_v26  ;;  %3239 = vrot.lane.b32.xlu1 %v4000_v56, %s3436_s25  ;;  %v1670_v26 = vsel %vm222_vm0, %v3750_v38, %v2811_v62  ;;  %v2837_v38 = vunpack.i.h.bf16 %v3904_v61  ;;  %v577_v62 = vld [vmem:[#allocation2 + $0x99] sm:$0xff] }
  0xea   : > { %3244 = vrot.lane.b32.xlu0 %v3243_v22, %s3437_s26  ;;  %v1701_v22 = vsel %vm1688_vm3, %v1668_v47, %v2886_v4  ;;  %v2917_v61 = vunpack.i.h.bf16 %v3967_v39 }
  0xeb   : > { %v4035_v35 = vsel %vm1721_vm4, %v1697_v28, %v2956_v5  ;;  %v4038_v44 = vsel %vm1721_vm4, %v1698_v27, %v2957_v48  ;;  %v2960_v10 = vpop.permute.xlu1 %2959  ;;  %v1704_v5 = vsel %vm1688_vm3, %v1671_v59, %v2892_v40  ;;  %v1703_v28 = vsel %vm1688_vm3, %v1670_v26, %v2891_v60  ;;  %v595_v40 = vld [vmem:[#allocation2 + $0x171] sm:$0xff] }
  0xec   : > { %v2962_v32 = vunpack.i.h.bf16 %v2960_v10  ;;  %v2961_v1 = vunpack.i.l.bf16 %v2960_v10  ;;  %v2965_v57 = vpop.permute.xlu0 %2964  ;;  %v578_v10 = vld [vmem:[#allocation2 + $0xa9] sm:$0xff]  ;;  %v2846_v60 = vunpack.i.l.bf16 %v3912_v20  ;;  %v2921_v59 = vunpack.i.l.bf16 %v3972_v34 }
  0xed   : > { %v2967_v50 = vunpack.i.h.bf16 %v2965_v57  ;;  %v2966_v21 = vunpack.i.l.bf16 %v2965_v57  ;;  %3249 = vrot.lane.b32.xlu1 %v3707_v8, %s3437_s26  ;;  %v594_v57 = vld [vmem:[#allocation2 + $0x169] sm:$0xff] }
  0xee   : > { %v4049_v0 = vsel %vm1721_vm4, %v1699_v30, %v2961_v1  ;;  %v4052_v51 = vsel %vm1721_vm4, %v1700_v46, %v2962_v32  ;;  %3254 = vrot.lane.b32.xlu0 %v4011_v23, %s3437_s26  ;;  %v2842_v46 = vunpack.i.h.bf16 %v3910_v29  ;;  %v2841_v30 = vunpack.i.l.bf16 %v3910_v29  ;;  %v579_v1 = vld [vmem:[#allocation2 + $0xb1] sm:$0xff] }
  0xef   : > { %v4057_v31 = vsel %vm1721_vm4, %v1701_v22, %v2966_v21  ;;  %v4060_v49 = vsel %vm1721_vm4, %v1702_v54, %v2967_v50  ;;  %v2970_v8 = vpop.permute.xlu1 %2969  ;;  %v2916_v50 = vunpack.i.l.bf16 %v3967_v39  ;;  %v3283_v29 = vpack.i.bf16 %v577_v62, %v576_v36 }
  0xf0   : > { %5054 = vst [vmem:[#allocation21_spill] sm:$0xff] %v4057_v31  ;;  %5055 = vst [vmem:[#allocation22_spill] sm:$0xff] %v4060_v49  ;;  %v2972_v25 = vunpack.i.h.bf16 %v2970_v8  ;;  %v2971_v47 = vunpack.i.l.bf16 %v2970_v8  ;;  %v4066_v48 = vpop.permute.xlu0 %2974  ;;  %v1681_v21 = vsel %vm222_vm0, %v3788_v3, %v2837_v38  ;;  %v1680_v22 = vsel %vm222_vm0, %v3786_v2, %v2836_v41  ;;  %v5070_v49 = vld [vmem:[#allocation6_spill] sm:$0xff] }
  0xf1   : > { %3259 = vrot.lane.b32.xlu1 %v4013_v52, %s3437_s26  ;;  %v4102_v8 = vpack.i.bf16 %v595_v40, %v594_v57  ;;  %v1682_v39 = vsel %vm222_vm0, %v3790_v6, %v2841_v30  ;;  %v1684_v2 = vsel %vm222_vm0, %v3805_v12, %v2846_v60  ;;  %v1714_v6 = vsel %vm1688_vm3, %v1681_v21, %v2917_v61 }
  0xf2   : > { %v4073_v27 = vsel %vm1721_vm4, %v1703_v28, %v2971_v47  ;;  %v4076_v55 = vsel %vm1721_vm4, %v1704_v5, %v2972_v25  ;;  %3264 = vrot.lane.b32.xlu0 %v3758_v42, %s3438_s29  ;;  %v2847_v42 = vunpack.i.h.bf16 %v3912_v20  ;;  %v3293_v20 = vpack.i.bf16 %v579_v1, %v578_v10 }
  0xf3   : > { %5056 = vst [vmem:[#allocation23_spill] sm:$0xff] %v4073_v27  ;;  %5057 = vst [vmem:[#allocation24_spill] sm:$0xff] %v4076_v55  ;;  %v4082_v4 = vpop.permute.xlu1 %2979  ;;  %v2927_v5 = vunpack.i.h.bf16 %v3974_v9  ;;  %v2851_v28 = vunpack.i.l.bf16 %v3918_v37  ;;  %v1715_v36 = vsel %vm1688_vm3, %v1682_v39, %v2921_v59  ;;  %v2931_v30 = vunpack.i.l.bf16 %v3980_v11 }
  0xf4   : > { %v4086_v32 = vpop.permute.xlu0 %2984  ;;  %v1685_v3 = vsel %vm222_vm0, %v3807_v15, %v2847_v42  ;;  %v2852_v15 = vunpack.i.h.bf16 %v3918_v37 }
  0xf5   : > { %3269 = vrot.lane.b32.xlu1 %v3817_v18, %s3438_s29  ;;  %v1683_v18 = vsel %vm222_vm0, %v3792_v7, %v2842_v46  ;;  %v1713_v7 = vsel %vm1688_vm3, %v1680_v22, %v2916_v50  ;;  %v2932_v46 = vunpack.i.h.bf16 %v3980_v11  ;;  %v1718_v40 = vsel %vm1688_vm3, %v1685_v3, %v2927_v5  ;;  %v502_v5 = vld [vmem:[#allocation2 + $0x189] sm:$0xff] }
  0xf6   : > { %3274 = vrot.lane.b32.xlu0 %v3764_v43, %s3438_s29  ;;  %v2922_v43 = vunpack.i.h.bf16 %v3972_v34  ;;  %v2926_v34 = vunpack.i.l.bf16 %v3974_v9  ;;  %v1687_v21 = vsel %vm222_vm0, %v3811_v17, %v2852_v15  ;;  %v1686_v22 = vsel %vm222_vm0, %v3809_v16, %v2851_v28  ;;  %v626_v17 = vld [vmem:[#allocation2 + $0x16a] sm:$0xff] }
  0xf7   : > { %v4100_v54 = vpop.permute.xlu1 %2989  ;;  %v1719_v59 = vsel %vm1688_vm3, %v1686_v22, %v2931_v30  ;;  %v549_v30 = vld [vmem:[#allocation2 + $0xc8] sm:$0xff]  ;;  %v551_v22 = vld [vmem:[#allocation2 + $0xe0] sm:$0xff] }
  0xf8   : > { %v2995_v26 = vpop.permute.xlu0 %2994  ;;  %v1716_v41 = vsel %vm1688_vm3, %v1683_v18, %v2922_v43  ;;  %v1717_v57 = vsel %vm1688_vm3, %v1684_v2, %v2926_v34  ;;  %v627_v2 = vld [vmem:[#allocation2 + $0x172] sm:$0xff] }
  0xf9   : > { %v2997_v25 = vunpack.i.h.bf16 %v2995_v26  ;;  %v2996_v47 = vunpack.i.l.bf16 %v2995_v26  ;;  %3279 = vrot.lane.b32.xlu1 %v3823_v19, %s3438_s29 }
  0xfa   : > { %3284 = vrot.lane.b32.xlu0 %v3283_v29, %s3439_s8  ;;  %v611_v29 = vld [vmem:[#allocation2 + $0xb2] sm:$0xff] }
  0xfb   : > { %v4124_v12 = vsel %vm1721_vm4, %v1713_v7, %v2996_v47  ;;  %v4127_v38 = vsel %vm1721_vm4, %v1714_v6, %v2997_v25  ;;  %v3000_v19 = vpop.permute.xlu1 %2999  ;;  %v3318_v7 = vpack.i.bf16 %v627_v2, %v626_v17  ;;  %v501_v6 = vld [vmem:[#allocation2 + $0x181] sm:$0xff]  ;;  %v4212_v17 = vld [vmem:[#allocation2 + $0xd9] sm:$0xff] }
  0xfc   : > { %v3002_v62 = vunpack.i.h.bf16 %v3000_v19  ;;  %v3001_v10 = vunpack.i.l.bf16 %v3000_v19  ;;  %v3005_v9 = vpop.permute.xlu0 %3004  ;;  %v517_v19 = vld [vmem:[#allocation2 + $0xc2] sm:$0xff] }
  0xfd   : > { %v3007_v1 = vunpack.i.h.bf16 %v3005_v9  ;;  %v3006_v37 = vunpack.i.l.bf16 %v3005_v9  ;;  %3289 = vrot.lane.b32.xlu1 %v4000_v56, %s3439_s8  ;;  %v610_v56 = vld [vmem:[#allocation2 + $0xaa] sm:$0xff] }
  0xfe   : > { %v4138_v42 = vsel %vm1721_vm4, %v1715_v36, %v3001_v10  ;;  %v4141_v60 = vsel %vm1721_vm4, %v1716_v41, %v3002_v62  ;;  %3294 = vrot.lane.b32.xlu0 %v3293_v20, %s3439_s8  ;;  %v1720_v20 = vsel %vm1688_vm3, %v1687_v21, %v2932_v46  ;;  %v3313_v16 = vpack.i.bf16 %v611_v29, %v610_v56  ;;  %v533_v62 = vld [vmem:[#allocation2 + $0x182] sm:$0xff]  ;;  %v534_v10 = vld [vmem:[#allocation2 + $0x18a] sm:$0xff] }
  0xff   : > { %5058 = vst [vmem:[#allocation25_spill] sm:$0xff] %v4138_v42  ;;  %5059 = vst [vmem:[#allocation26_spill] sm:$0xff] %v4141_v60  ;;  %v4145_v61 = vsel %vm1721_vm4, %v1717_v57, %v3006_v37  ;;  %v4148_v11 = vsel %vm1721_vm4, %v1718_v40, %v3007_v1  ;;  %v3010_v50 = vpop.permute.xlu1 %3009  ;;  %v548_v46 = vld [vmem:[#allocation2 + $0xc0] sm:$0xff]  ;;  %v565_v40 = vld [vmem:[#allocation2 + $0x188] sm:$0xff]  ;;  %v2777_v56 = vunpack.i.h.bf16 %v3848_v33  ;;  %v2776_v29 = vunpack.i.l.bf16 %v3848_v33 }
 0x100   : > { %5060 = vst [vmem:[#allocation27_spill] sm:$0xff] %v4145_v61  ;;  %5061 = vst [vmem:[#allocation28_spill] sm:$0xff] %v4148_v11  ;;  %v3012_v18 = vunpack.i.h.bf16 %v3010_v50  ;;  %v3011_v39 = vunpack.i.l.bf16 %v3010_v50  ;;  %v4154_v43 = vpop.permute.xlu0 %3014  ;;  %v343_v1 = vld [vmem:[#allocation2] sm:$0xff]  ;;  %v550_v50 = vld [vmem:[#allocation2 + $0xd8] sm:$0xff]  ;;  %v4200_v21 = vpack.i.bf16 %v534_v10, %v533_v62  ;;  %v2781_v33 = vunpack.i.l.bf16 %v3856_v45 }
 0x101   : > { %3299 = vrot.lane.b32.xlu1 %v4102_v8, %s3439_s8  ;;  %v564_v57 = vld [vmem:[#allocation2 + $0x180] sm:$0xff]  ;;  %v3363_v10 = vpack.i.bf16 %v551_v22, %v550_v50  ;;  %v5067_v61 = vld [vmem:[#allocation14_spill] sm:$0xff] }
 0x102   : > { %v4161_v26 = vsel %vm1721_vm4, %v1719_v59, %v3011_v39  ;;  %v4164_v3 = vsel %vm1721_vm4, %v1720_v20, %v3012_v18  ;;  %3304 = vrot.lane.b32.xlu0 %v4011_v23, %s3440_s9  ;;  %v4180_v23 = vpack.i.bf16 %v502_v5, %v501_v6  ;;  %v4202_v18 = vld [vmem:[#allocation2 + $0x198] sm:$0xff]  ;;  %v4204_v39 = vld [vmem:[#allocation2 + $0x1a0] sm:$0xff]  ;;  %v3353_v20 = vpack.i.bf16 %v549_v30, %v548_v46 }
 0x103   : > { %5062 = vst [vmem:[#allocation29_spill] sm:$0xff] %v4161_v26  ;;  %5063 = vst [vmem:[#allocation30_spill] sm:$0xff] %v4164_v3  ;;  %v4168_v25 = vpop.permute.xlu1 %3019  ;;  %v4208_v59 = vld [vmem:[#allocation2 + $0xc1] sm:$0xff]  ;;  %v4219_v6 = vld [vmem:[#allocation2 + $0x199] sm:$0xff]  ;;  %v3358_v62 = vpack.i.bf16 %v565_v40, %v564_v57  ;;  %v3368_v46 = vpack.i.bf16 %v4204_v39, %v4202_v18  ;;  %v1656_v3 = vsel %vm222_vm0, %v343_v1, %v2776_v29  ;;  %v2817_v26 = vunpack.i.h.bf16 %v3885_v53 }
 0x104   : > { %v4170_v47 = vpop.permute.xlu0 %3024  ;;  %v4221_v5 = vld [vmem:[#allocation2 + $0x1a1] sm:$0xff]  ;;  %v2816_v57 = vunpack.i.l.bf16 %v3885_v53  ;;  %v2822_v40 = vunpack.i.h.bf16 %v3894_v24  ;;  %v1658_v22 = vsel %vm222_vm0, %v3711_v13, %v2781_v33  ;;  %v2821_v53 = vunpack.i.l.bf16 %v3894_v24  ;;  %v5068_v13 = vld [vmem:[#allocation4_spill] sm:$0xff] }
 0x105   : > { %3309 = vrot.lane.b32.xlu1 %v4013_v52, %s3440_s9  ;;  %v518_v52 = vld [vmem:[#allocation2 + $0xca] sm:$0xff]  ;;  %v4244_v50 = vld [vmem:[#allocation2 + $0xe2] sm:$0xff]  ;;  %v2857_v18 = vunpack.i.h.bf16 %v3920_v63  ;;  %v2856_v39 = vunpack.i.l.bf16 %v3920_v63  ;;  %v2896_v55 = vunpack.i.l.bf16 %v5067_v61  ;;  %v1673_v24 = vsel %vm222_vm0, %v5068_v13, %v2817_v26 }
 0x106   : > { %3314 = vrot.lane.b32.xlu0 %v3313_v16, %s3440_s9  ;;  %v4191_v36 = vpack.i.bf16 %v518_v52, %v517_v19  ;;  %v2782_v19 = vunpack.i.h.bf16 %v3856_v45  ;;  %v4235_v45 = vld [vmem:[#allocation2 + $0xda] sm:$0xff]  ;;  %v4248_v29 = vld [vmem:[#allocation2 + $0x1a2] sm:$0xff]  ;;  %v2897_v33 = vunpack.i.h.bf16 %v5067_v61  ;;  %v1675_v31 = vsel %vm222_vm0, %v5070_v49, %v2822_v40 }
 0x107   : > { %v4175_v34 = vpop.permute.xlu1 %3029  ;;  %v5072_v61 = vld [vmem:[#allocation5_spill] sm:$0xff]  ;;  %v1689_v63 = vsel %vm1688_vm3, %v1656_v3, %v2856_v39  ;;  %v2976_v39 = vunpack.i.l.bf16 %v4066_v48 }
 0x108   : > { %v4177_v15 = vpop.permute.xlu0 %3034 }
 0x109   : > { %3319 = vrot.lane.b32.xlu1 %v3318_v7, %s3440_s9 }
 0x10a   : > { %3324 = vrot.lane.b32.xlu0 %v4102_v8, %s3436_s25  ;;  %v344_v8 = vld [vmem:[#allocation2 + $0x8] sm:$0xff] }
 0x10b   : > { %v4184_v28 = vpop.permute.xlu1 %3039  ;;  %v1657_v30 = vsel %vm222_vm0, %v344_v8, %v2777_v56  ;;  %v4246_v56 = vld [vmem:[#allocation2 + $0x19a] sm:$0xff] }
 0x10c   : > { %v4186_v41 = vpop.permute.xlu0 %3044  ;;  %v1690_v13 = vsel %vm1688_vm3, %v1657_v30, %v2857_v18  ;;  %v5074_v30 = vld [vmem:[#allocation19_spill] sm:$0xff] }
 0x10d   : > { %5064 = vst [vmem:[#allocation31_spill] sm:$0xff] %v4186_v41  ;;  %3329 = vrot.lane.b32.xlu1 %v4180_v23, %s3436_s25  ;;  %v2942_v18 = vunpack.i.h.bf16 %v5074_v30  ;;  %v2941_v3 = vunpack.i.l.bf16 %v5074_v30 }
 0x10e   : > { %3334 = vrot.lane.b32.xlu0 %v3313_v16, %s3437_s26  ;;  %v4210_v16 = vld [vmem:[#allocation2 + $0xc9] sm:$0xff] }
 0x10f   : > { %v4193_v9 = vpop.permute.xlu1 %3049  ;;  %v3373_v11 = vpack.i.bf16 %v4210_v16, %v4208_v59  ;;  %v1659_v59 = vsel %vm222_vm0, %v3713_v14, %v2782_v19  ;;  %v5066_v16 = vld [vmem:[#allocation11_spill] sm:$0xff]  ;;  %v5073_v14 = vld [vmem:[#allocation18_spill] sm:$0xff] }
 0x110   : > { %5065 = vst [vmem:[#allocation32_spill] sm:$0xff] %v4193_v9  ;;  %v4195_v37 = vpop.permute.xlu0 %3054  ;;  %v2862_v1 = vunpack.i.h.bf16 %v5066_v16  ;;  %v2861_v8 = vunpack.i.l.bf16 %v5066_v16  ;;  %v5069_v19 = vld [vmem:[#allocation3_spill] sm:$0xff]  ;;  %v2936_v60 = vunpack.i.l.bf16 %v5073_v14 }
 0x111   : > { %3339 = vrot.lane.b32.xlu1 %v3318_v7, %s3437_s26  ;;  %v4217_v7 = vld [vmem:[#allocation2 + $0xe1] sm:$0xff]  ;;  %v1672_v16 = vsel %vm222_vm0, %v5069_v19, %v2816_v57  ;;  %v5071_v9 = vld [vmem:[#allocation15_spill] sm:$0xff] }
 0x112   : > { %3344 = vrot.lane.b32.xlu0 %v4191_v36, %s3437_s26  ;;  %v2902_v41 = vunpack.i.h.bf16 %v5071_v9  ;;  %v2901_v26 = vunpack.i.l.bf16 %v5071_v9  ;;  %v1691_v57 = vsel %vm1688_vm3, %v1658_v22, %v2861_v8  ;;  %v1692_v49 = vsel %vm1688_vm3, %v1659_v59, %v2862_v1 }
 0x113   : > { %v4215_v2 = vpop.permute.xlu1 %3059  ;;  %v1705_v40 = vsel %vm1688_vm3, %v1672_v16, %v2896_v55  ;;  %v2937_v9 = vunpack.i.h.bf16 %v5073_v14  ;;  %v2977_v55 = vunpack.i.h.bf16 %v4066_v48  ;;  %v2981_v22 = vunpack.i.l.bf16 %v4082_v4 }
 0x114   : > { %v4224_v52 = vpop.permute.xlu0 %3064  ;;  %v1708_v8 = vsel %vm1688_vm3, %v1675_v31, %v2902_v41  ;;  %v1722_v59 = vsel %vm1721_vm4, %v1689_v63, %v2936_v60  ;;  %v3016_v14 = vunpack.i.l.bf16 %v4154_v43  ;;  %v3022_v41 = vunpack.i.h.bf16 %v4168_v25 }
 0x115   : > { %3349 = vrot.lane.b32.xlu1 %v4200_v21, %s3437_s26  ;;  %v1723_v31 = vsel %vm1721_vm4, %v1690_v13, %v2937_v9  ;;  %v3021_v48 = vunpack.i.l.bf16 %v4168_v25  ;;  %v1724_v60 = vsel %vm1721_vm4, %v1691_v57, %v2941_v3  ;;  %v1738_v63 = vsel %vm1721_vm4, %v1705_v40, %v2976_v39 }
 0x116   : > { %3354 = vrot.lane.b32.xlu0 %v3353_v20, %s3438_s29  ;;  %v5076_v39 = vpack.i.bf16 %v4221_v5, %v4219_v6 }
 0x117   : > { %v4255_v20 = vpop.permute.xlu1 %3069  ;;  %v1757_v40 = vsel %vm1754_vm5, %v1724_v60, %v3021_v48 }
 0x118   : > { %v4262_v27 = vpop.permute.xlu0 %3074  ;;  %v3072_v30 = vunpack.i.h.bf16 %v4255_v20 }
 0x119   : > { %3359 = vrot.lane.b32.xlu1 %v3358_v62, %s3438_s29  ;;  %v1674_v62 = vsel %vm222_vm0, %v5072_v61, %v2821_v53  ;;  %v1706_v53 = vsel %vm1688_vm3, %v1673_v24, %v2897_v33  ;;  %v2982_v24 = vunpack.i.h.bf16 %v4082_v4  ;;  %v3017_v33 = vunpack.i.h.bf16 %v4154_v43 }
 0x11a   : > { %3364 = vrot.lane.b32.xlu0 %v3363_v10, %s3438_s29  ;;  %v1707_v1 = vsel %vm1688_vm3, %v1674_v62, %v2901_v26  ;;  %v1725_v4 = vsel %vm1721_vm4, %v1692_v49, %v2942_v18  ;;  %v3057_v43 = vunpack.i.h.bf16 %v4195_v37  ;;  %v1739_v16 = vsel %vm1721_vm4, %v1706_v53, %v2977_v55 }
 0x11b   : > { %v4284_v42 = vpop.permute.xlu1 %3079  ;;  %v1740_v25 = vsel %vm1721_vm4, %v1707_v1, %v2981_v22  ;;  %v3062_v26 = vunpack.i.h.bf16 %v4215_v2  ;;  %v3061_v61 = vunpack.i.l.bf16 %v4215_v2  ;;  %v5075_v62 = vpack.i.bf16 %v4217_v7, %v4212_v17 }
 0x11c   : > { %v4290_v10 = vpop.permute.xlu0 %3084  ;;  %v1741_v13 = vsel %vm1721_vm4, %v1708_v8, %v2982_v24  ;;  %v1756_v57 = vsel %vm1754_vm5, %v1723_v31, %v3017_v33  ;;  %v1758_v2 = vsel %vm1754_vm5, %v1725_v4, %v3022_v41  ;;  %v3067_v17 = vunpack.i.h.bf16 %v4224_v52 }
 0x11d   : > { %3369 = vrot.lane.b32.xlu1 %v3368_v46, %s3438_s29  ;;  %v3056_v46 = vunpack.i.l.bf16 %v4195_v37  ;;  %v1755_v37 = vsel %vm1754_vm5, %v1722_v59, %v3016_v14  ;;  %v1772_v53 = vsel %vm1754_vm5, %v1739_v16, %v3057_v43  ;;  %v3071_v18 = vunpack.i.l.bf16 %v4255_v20 }
 0x11e   : > { %3374 = vrot.lane.b32.xlu0 %v3373_v11, %s3439_s8  ;;  %v3076_v3 = vunpack.i.l.bf16 %v4262_v27  ;;  %v1773_v8 = vsel %vm1754_vm5, %v1740_v25, %v3061_v61  ;;  %v1774_v1 = vsel %vm1754_vm5, %v1741_v13, %v3062_v26  ;;  %v3081_v55 = vunpack.i.l.bf16 %v4284_v42 }
 0x11f   : > { %v4306_v19 = vpop.permute.xlu1 %3089  ;;  %v1771_v9 = vsel %vm1754_vm5, %v1738_v63, %v3056_v46  ;;  %v3082_v22 = vunpack.i.h.bf16 %v4284_v42  ;;  %v3087_v59 = vunpack.i.h.bf16 %v4290_v10  ;;  %v3086_v6 = vunpack.i.l.bf16 %v4290_v10 }
 0x120   : > { %v4312_v11 = vpop.permute.xlu0 %3094  ;;  %v1789_v24 = vsel %vm1787_vm6, %v1756_v57, %v3067_v17  ;;  %v3092_v33 = vunpack.i.h.bf16 %v4306_v19  ;;  %v1805_v41 = vsel %vm1787_vm6, %v1772_v53, %v3072_v30  ;;  %v1790_v42 = vsel %vm1787_vm6, %v1757_v40, %v3076_v3 }
 0x121   : > { %3379 = vrot.lane.b32.xlu1 %v4180_v23, %s3439_s8  ;;  %v3066_v23 = vunpack.i.l.bf16 %v4224_v52  ;;  %v3077_v52 = vunpack.i.h.bf16 %v4262_v27  ;;  %v3091_v27 = vunpack.i.l.bf16 %v4306_v19  ;;  %v3096_v14 = vunpack.i.l.bf16 %v4312_v11 }
 0x122   : > { %3384 = vrot.lane.b32.xlu0 %v5075_v62, %s3439_s8  ;;  %v3097_v48 = vunpack.i.h.bf16 %v4312_v11  ;;  %v1806_v46 = vsel %vm1787_vm6, %v1773_v8, %v3081_v55  ;;  %v5077_v4 = vpack.i.bf16 %v4244_v50, %v4235_v45  ;;  %v1807_v63 = vsel %vm1787_vm6, %v1774_v1, %v3082_v22 }
 0x123   : > { %v4332_v49 = vpop.permute.xlu1 %3099  ;;  %v1788_v20 = vsel %vm1787_vm6, %v1755_v37, %v3066_v23  ;;  %v1791_v10 = vsel %vm1787_vm6, %v1758_v2, %v3077_v52  ;;  %v1822_v11 = vsel %vm1820_vm7, %v1789_v24, %v3087_v59  ;;  %v1838_v26 = vsel %vm1820_vm7, %v1805_v41, %v3092_v33 }
 0x124   : > { %v3105_v7 = vpop.permute.xlu0 %3104  ;;  %v1821_v43 = vsel %vm1820_vm7, %v1788_v20, %v3086_v6  ;;  %v1823_v61 = vsel %vm1820_vm7, %v1790_v42, %v3096_v14  ;;  %v1824_v37 = vsel %vm1820_vm7, %v1791_v10, %v3097_v48  ;;  %v3102_v45 = vunpack.i.h.bf16 %v4332_v49 }
 0x125   : > { %3389 = vrot.lane.b32.xlu1 %v5076_v39, %s3439_s8  ;;  %v3107_v60 = vunpack.i.h.bf16 %v3105_v7  ;;  %v3106_v19 = vunpack.i.l.bf16 %v3105_v7  ;;  %v5078_v23 = vpack.i.bf16 %v4248_v29, %v4246_v56  ;;  %v3101_v7 = vunpack.i.l.bf16 %v4332_v49 }
 0x126   : > { %3394 = vrot.lane.b32.xlu0 %v4191_v36, %s3440_s9  ;;  %v1804_v36 = vsel %vm1787_vm6, %v1771_v9, %v3071_v18 }
 0x127   : > { %v3110_v5 = vpop.permute.xlu1 %3109  ;;  %v1854_v9 = vsel %vm1853_vm8, %v1821_v43, %v3106_v19  ;;  %v1855_v17 = vsel %vm1853_vm8, %v1822_v11, %v3107_v60  ;;  %v1839_v24 = vsel %vm1820_vm7, %v1806_v46, %v3101_v7  ;;  %v5079_v43 = vld [vmem:[#allocation7_spill] sm:$0xff] }
 0x128   : > { %v3115_v31 = vpop.permute.xlu0 %3114  ;;  %v3111_v16 = vunpack.i.l.bf16 %v3110_v5  ;;  %v3112_v62 = vunpack.i.h.bf16 %v3110_v5  ;;  %v2786_v11 = vunpack.i.l.bf16 %v5079_v43 }
 0x129   : > { %3399 = vrot.lane.b32.xlu1 %v4200_v21, %s3440_s9  ;;  %v1837_v21 = vsel %vm1820_vm7, %v1804_v36, %v3091_v27  ;;  %v3117_v40 = vunpack.i.h.bf16 %v3115_v31  ;;  %v3116_v2 = vunpack.i.l.bf16 %v3115_v31  ;;  %v1840_v36 = vsel %vm1820_vm7, %v1807_v63, %v3102_v45 }
 0x12a   : > { %3404 = vrot.lane.b32.xlu0 %v5077_v4, %s3440_s9  ;;  %v1870_v3 = vsel %vm1853_vm8, %v1837_v21, %v3111_v16  ;;  %v1871_v29 = vsel %vm1853_vm8, %v1838_v26, %v3112_v62  ;;  %v5080_v26 = vld [vmem:[#allocation8_spill] sm:$0xff] }
 0x12b   : > { %v3120_v25 = vpop.permute.xlu1 %3119  ;;  %v1856_v59 = vsel %vm1853_vm8, %v1823_v61, %v3116_v2  ;;  %v1857_v49 = vsel %vm1853_vm8, %v1824_v37, %v3117_v40  ;;  %v2792_v61 = vunpack.i.h.bf16 %v5080_v26  ;;  %v2791_v62 = vunpack.i.l.bf16 %v5080_v26 }
 0x12c   : > { %v3125_v13 = vpop.permute.xlu0 %3124  ;;  %v3122_v52 = vunpack.i.h.bf16 %v3120_v25  ;;  %v3121_v55 = vunpack.i.l.bf16 %v3120_v25  ;;  %v2787_v25 = vunpack.i.h.bf16 %v5079_v43 }
 0x12d   : > { %v3127_v50 = vunpack.i.h.bf16 %v3125_v13  ;;  %v3126_v57 = vunpack.i.l.bf16 %v3125_v13  ;;  %3409 = vrot.lane.b32.xlu1 %v5078_v23, %s3440_s9  ;;  %v5081_v13 = vld [vmem:[#allocation9_spill] sm:$0xff]  ;;  %v3416_v23 = vld [vmem:[#allocation2 + $0x30] sm:$0xff] }
 0x12e   : > { %v1872_v60 = vsel %vm1853_vm8, %v1839_v24, %v3121_v55  ;;  %v1873_v19 = vsel %vm1853_vm8, %v1840_v36, %v3122_v52  ;;  %v2827_v37 = vunpack.i.h.bf16 %v5081_v13  ;;  %v2826_v45 = vunpack.i.l.bf16 %v5081_v13  ;;  %v3418_v52 = vld [vmem:[#allocation2 + $0x50] sm:$0xff] }
 0x12f   : > { %v3130_v53 = vpop.permute.xlu1 %3129  ;;  %v1887_v30 = vsel %vm1886_vm9, %v1854_v9, %v3126_v57  ;;  %v1888_v18 = vsel %vm1886_vm9, %v1855_v17, %v3127_v50  ;;  %v5082_v50 = vld [vmem:[#allocation10_spill] sm:$0xff]  ;;  %v1660_v40 = vsel %vm222_vm0, %v3416_v23, %v2786_v11  ;;  %v5083_v9 = vld [vmem:[#allocation12_spill] sm:$0xff]  ;;  %v1663_v55 = vsel %vm222_vm0, %v3418_v52, %v2792_v61 }
 0x130   : > { %v3132_v39 = vunpack.i.h.bf16 %v3130_v53  ;;  %v3131_v8 = vunpack.i.l.bf16 %v3130_v53  ;;  %v3135_v1 = vpop.permute.xlu0 %3134  ;;  %v1919_v56 = vpack.c.bf16 %v1888_v18, %v1887_v30  ;;  %v2832_v57 = vunpack.i.h.bf16 %v5082_v50  ;;  %v3417_v30 = vld [vmem:[#allocation2 + $0x38] sm:$0xff] }
 0x131   : > { %v3137_v20 = vunpack.i.h.bf16 %v3135_v1  ;;  %v3136_v22 = vunpack.i.l.bf16 %v3135_v1  ;;  %v2831_v2 = vunpack.i.l.bf16 %v5082_v50  ;;  %v2867_v17 = vunpack.i.h.bf16 %v5083_v9  ;;  %v5085_v1 = vld [vmem:[#allocation16_spill] sm:$0xff] }
 0x132   : > { %2715 = vmatprep.mubr.msk.bf16.mxu0 %vm1955_vm10, %v1919_v56  ;;  %v1903_v6 = vsel %vm1886_vm9, %v1870_v3, %v3131_v8  ;;  %v1904_v5 = vsel %vm1886_vm9, %v1871_v29, %v3132_v39  ;;  %v2866_v7 = vunpack.i.l.bf16 %v5083_v9  ;;  %v1661_v18 = vsel %vm222_vm0, %v3417_v30, %v2787_v25  ;;  %v5084_v3 = vld [vmem:[#allocation13_spill] sm:$0xff] }
 0x133   : > { %v1889_v33 = vsel %vm1886_vm9, %v1856_v59, %v3136_v22  ;;  %v1890_v27 = vsel %vm1886_vm9, %v1857_v49, %v3137_v20  ;;  %v3140_v14 = vpop.permute.xlu1 %3139  ;;  %v1927_v31 = vpack.c.bf16 %v1904_v5, %v1903_v6  ;;  %v2872_v39 = vunpack.i.h.bf16 %v5084_v3  ;;  %v3419_v20 = vld [vmem:[#allocation2 + $0x48] sm:$0xff]  ;;  %v3420_v59 = vld [vmem:[#allocation2 + $0xf8] sm:$0xff]  ;;  %v3421_v5 = vld [vmem:[#allocation2 + $0xf0] sm:$0xff] }
 0x134   : > { %v1920_v41 = vpack.c.bf16 %v1890_v27, %v1889_v33  ;;  %v3142_v42 = vunpack.i.h.bf16 %v3140_v14  ;;  %v3141_v48 = vunpack.i.l.bf16 %v3140_v14  ;;  %v4400_v10 = vpop.permute.xlu0 %3144  ;;  %v2871_v8 = vunpack.i.l.bf16 %v5084_v3  ;;  %v3422_v33 = vld [vmem:[#allocation2 + $0x110] sm:$0xff]  ;;  %v5086_v14 = vld [vmem:[#allocation17_spill] sm:$0xff] }
 0x135   : > { %2731 = vmatprep.mubr.msk.bf16.mxu1 %vm1955_vm10, %v1927_v31  ;;  %v2906_v56 = vunpack.i.l.bf16 %v5085_v1  ;;  %v1662_v22 = vsel %vm222_vm0, %v3419_v20, %v2791_v62  ;;  %v1677_v49 = vsel %vm222_vm0, %v3420_v59, %v2827_v37  ;;  %v2907_v6 = vunpack.i.h.bf16 %v5085_v1 }
 0x136   : > { %v1905_v46 = vsel %vm1886_vm9, %v1872_v60, %v3141_v48  ;;  %v1906_v4 = vsel %vm1886_vm9, %v1873_v19, %v3142_v42  ;;  %2716 = vmatmul.mubr.msk.bf16.vlgmr.msra.gmra.mxu0 %vm1955_vm10, %v1920_v41  ;;  %v1676_v24 = vsel %vm222_vm0, %v3421_v5, %v2826_v45  ;;  %v1679_v27 = vsel %vm222_vm0, %v3422_v33, %v2832_v57  ;;  %v3423_v41 = vld [vmem:[#allocation2 + $0x108] sm:$0xff]  ;;  %v5087_v19 = vld [vmem:[#allocation20_spill] sm:$0xff] }
 0x137   : > { %v1928_v63 = vpack.c.bf16 %v1906_v4, %v1905_v46  ;;  %v4409_v16 = vpop.permute.xlu1 %3149  ;;  %v2912_v31 = vunpack.i.h.bf16 %v5086_v14  ;;  %v2911_v36 = vunpack.i.l.bf16 %v5086_v14  ;;  %v1678_v42 = vsel %vm222_vm0, %v3423_v41, %v2831_v2 }
 0x138   : > { %v4412_v21 = vpop.permute.xlu0 %3154  ;;  %v1694_v48 = vsel %vm1688_vm3, %v1661_v18, %v2867_v17  ;;  %v1693_v60 = vsel %vm1688_vm3, %v1660_v40, %v2866_v7  ;;  %v2946_v46 = vunpack.i.l.bf16 %v5087_v19  ;;  %v1696_v43 = vsel %vm1688_vm3, %v1663_v55, %v2872_v39 }
 0x139   : > { %2732 = vmatmul.mubr.msk.bf16.vlgmr.msra.gmra.mxu1 %vm1955_vm10, %v1928_v63  ;;  %v1695_v11 = vsel %vm1688_vm3, %v1662_v22, %v2871_v8  ;;  %v1709_v63 = vsel %vm1688_vm3, %v1676_v24, %v2906_v56  ;;  %v2947_v25 = vunpack.i.h.bf16 %v5087_v19  ;;  %v1710_v61 = vsel %vm1688_vm3, %v1677_v49, %v2907_v6 }
 0x13a   : > { %v2952_v62 = vunpack.i.h.bf16 %v4009_v58  ;;  %v2951_v13 = vunpack.i.l.bf16 %v4009_v58  ;;  %v2986_v37 = vunpack.i.l.bf16 %v4086_v32  ;;  %v1712_v45 = vsel %vm1688_vm3, %v1679_v27, %v2912_v31 }
 0x13b   : > { %v4424_v53 = vpop.permute.xlu1 %3159  ;;  %v1711_v50 = vsel %vm1688_vm3, %v1678_v42, %v2911_v36  ;;  %v2987_v57 = vunpack.i.h.bf16 %v4086_v32  ;;  %v2991_v23 = vunpack.i.l.bf16 %v4100_v54  ;;  %v1726_v40 = vsel %vm1721_vm4, %v1693_v60, %v2946_v46 }
 0x13c   : > { %v4430_v29 = vpop.permute.xlu0 %3164  ;;  %v2992_v2 = vunpack.i.h.bf16 %v4100_v54  ;;  %v3027_v9 = vunpack.i.h.bf16 %v4170_v47  ;;  %v3026_v17 = vunpack.i.l.bf16 %v4170_v47  ;;  %v1727_v58 = vsel %vm1721_vm4, %v1694_v48, %v2947_v25 }
 0x13d   : > { %v3032_v30 = vunpack.i.h.bf16 %v4175_v34  ;;  %v3031_v18 = vunpack.i.l.bf16 %v4175_v34  ;;  %v3146_v3 = vunpack.i.l.bf16 %v4400_v10  ;;  %v1728_v39 = vsel %vm1721_vm4, %v1695_v11, %v2951_v13 }
 0x13e   : > { %v1729_v8 = vsel %vm1721_vm4, %v1696_v43, %v2952_v62  ;;  %v1742_v54 = vsel %vm1721_vm4, %v1709_v63, %v2986_v37  ;;  %v3147_v1 = vunpack.i.h.bf16 %v4400_v10  ;;  %v1743_v47 = vsel %vm1721_vm4, %v1710_v61, %v2987_v57 }
 0x13f   : > { %v4444_v4 = vpop.permute.xlu1 %3169  ;;  %v1744_v56 = vsel %vm1721_vm4, %v1711_v50, %v2991_v23  ;;  %v3152_v52 = vunpack.i.h.bf16 %v4409_v16  ;;  %v3151_v55 = vunpack.i.l.bf16 %v4409_v16  ;;  %v1745_v34 = vsel %vm1721_vm4, %v1712_v45, %v2992_v2 }
 0x140   : > { %v4450_v26 = vpop.permute.xlu0 %3174  ;;  %v1759_v20 = vsel %vm1754_vm5, %v1726_v40, %v3026_v17  ;;  %v1760_v22 = vsel %vm1754_vm5, %v1727_v58, %v3027_v9  ;;  %v3156_v59 = vunpack.i.l.bf16 %v4412_v21  ;;  %v1761_v10 = vsel %vm1754_vm5, %v1728_v39, %v3031_v18 }
 0x141   : > { %v1762_v6 = vsel %vm1754_vm5, %v1729_v8, %v3032_v30  ;;  %v1775_v5 = vsel %vm1754_vm5, %v1742_v54, %v3146_v3  ;;  %v3157_v24 = vunpack.i.h.bf16 %v4412_v21  ;;  %v1776_v16 = vsel %vm1754_vm5, %v1743_v47, %v3147_v1 }
 0x142   : > { %v3162_v27 = vunpack.i.h.bf16 %v4424_v53  ;;  %v3161_v14 = vunpack.i.l.bf16 %v4424_v53  ;;  %v3167_v31 = vunpack.i.h.bf16 %v4430_v29  ;;  %v1777_v36 = vsel %vm1754_vm5, %v1744_v56, %v3151_v55 }
 0x143   : > { %v3180_v7 = vpop.permute.xlu1 %3179  ;;  %v1778_v41 = vsel %vm1754_vm5, %v1745_v34, %v3152_v52  ;;  %v3166_v42 = vunpack.i.l.bf16 %v4430_v29  ;;  %v3171_v48 = vunpack.i.l.bf16 %v4444_v4  ;;  %v1792_v60 = vsel %vm1787_vm6, %v1759_v20, %v3156_v59 }
 0x144   : > { %v3185_v32 = vpop.permute.xlu0 %3184  ;;  %v3172_v21 = vunpack.i.h.bf16 %v4444_v4  ;;  %v3177_v19 = vunpack.i.h.bf16 %v4450_v26  ;;  %v3176_v46 = vunpack.i.l.bf16 %v4450_v26  ;;  %v1793_v53 = vsel %vm1787_vm6, %v1760_v22, %v3157_v24 }
 0x145   : > { %v3182_v11 = vunpack.i.h.bf16 %v3180_v7  ;;  %v3181_v63 = vunpack.i.l.bf16 %v3180_v7  ;;  %v3186_v25 = vunpack.i.l.bf16 %v3185_v32  ;;  %v1808_v62 = vsel %vm1787_vm6, %v1775_v5, %v3161_v14 }
 0x146   : > { %v1809_v29 = vsel %vm1787_vm6, %v1776_v16, %v3162_v27  ;;  %v1795_v13 = vsel %vm1787_vm6, %v1762_v6, %v3167_v31  ;;  %v3187_v37 = vunpack.i.h.bf16 %v3185_v32  ;;  %v1794_v4 = vsel %vm1787_vm6, %v1761_v10, %v3166_v42 }
 0x147   : > { %v4480_v49 = vpop.permute.xlu1 %3189  ;;  %v1810_v45 = vsel %vm1787_vm6, %v1777_v36, %v3171_v48  ;;  %v1811_v57 = vsel %vm1787_vm6, %v1778_v41, %v3172_v21  ;;  %v1825_v23 = vsel %vm1820_vm7, %v1792_v60, %v3176_v46  ;;  %v1826_v40 = vsel %vm1820_vm7, %v1793_v53, %v3177_v19 }
 0x148   : > { %v3195_v33 = vpop.permute.xlu0 %3194  ;;  %v1841_v17 = vsel %vm1820_vm7, %v1808_v62, %v3181_v63  ;;  %v1842_v7 = vsel %vm1820_vm7, %v1809_v29, %v3182_v11  ;;  %v1827_v58 = vsel %vm1820_vm7, %v1794_v4, %v3186_v25  ;;  %v1828_v3 = vsel %vm1820_vm7, %v1795_v13, %v3187_v37 }
 0x149   : > { %v3197_v50 = vunpack.i.h.bf16 %v3195_v33  ;;  %v3196_v26 = vunpack.i.l.bf16 %v3195_v33  ;;  %v3192_v32 = vunpack.i.h.bf16 %v4480_v49  ;;  %v3191_v52 = vunpack.i.l.bf16 %v4480_v49 }
 0x14b   : > { %v3200_v43 = vpop.permute.xlu1 %3199  ;;  %v1858_v54 = vsel %vm1853_vm8, %v1825_v23, %v3196_v26  ;;  %v1859_v1 = vsel %vm1853_vm8, %v1826_v40, %v3197_v50  ;;  %v1843_v42 = vsel %vm1820_vm7, %v1810_v45, %v3191_v52  ;;  %v1844_v46 = vsel %vm1820_vm7, %v1811_v57, %v3192_v32 }
 0x14c   : > { %v3205_v61 = vpop.permute.xlu0 %3204  ;;  %v3201_v2 = vunpack.i.l.bf16 %v3200_v43  ;;  %v3202_v30 = vunpack.i.h.bf16 %v3200_v43  ;;  %v3037_v23 = vunpack.i.h.bf16 %v4177_v15  ;;  %v3036_v40 = vunpack.i.l.bf16 %v4177_v15 }
 0x14d   : > { %v3207_v47 = vunpack.i.h.bf16 %v3205_v61  ;;  %v3206_v56 = vunpack.i.l.bf16 %v3205_v61 }
 0x14e   : > { %v1874_v55 = vsel %vm1853_vm8, %v1841_v17, %v3201_v2  ;;  %v1875_v59 = vsel %vm1853_vm8, %v1842_v7, %v3202_v30  ;;  %v3041_v17 = vunpack.i.l.bf16 %v4184_v28  ;;  %v1763_v32 = vsel %vm1754_vm5, %v4035_v35, %v3036_v40 }
 0x14f   : > { %v3210_v9 = vpop.permute.xlu1 %3209  ;;  %v1860_v31 = vsel %vm1853_vm8, %v1827_v58, %v3206_v56  ;;  %v1861_v49 = vsel %vm1853_vm8, %v1828_v3, %v3207_v47 }
 0x150   : > { %v3215_v18 = vpop.permute.xlu0 %3214  ;;  %v3212_v33 = vunpack.i.h.bf16 %v3210_v9  ;;  %v3211_v16 = vunpack.i.l.bf16 %v3210_v9  ;;  %v3042_v9 = vunpack.i.h.bf16 %v4184_v28  ;;  %v1765_v15 = vsel %vm1754_vm5, %v4049_v0, %v3041_v17 }
 0x151   : > { %v3217_v39 = vunpack.i.h.bf16 %v3215_v18  ;;  %v3216_v8 = vunpack.i.l.bf16 %v3215_v18 }
 0x152   : > { %v1876_v25 = vsel %vm1853_vm8, %v1843_v42, %v3211_v16  ;;  %v1877_v61 = vsel %vm1853_vm8, %v1844_v46, %v3212_v33  ;;  %v1766_v28 = vsel %vm1754_vm5, %v4052_v51, %v3042_v9 }
 0x153   : > { %v1891_v34 = vsel %vm1886_vm9, %v1858_v54, %v3216_v8  ;;  %v1892_v20 = vsel %vm1886_vm9, %v1859_v1, %v3217_v39  ;;  %v3220_v22 = vpop.permute.xlu1 %3219  ;;  %v1764_v39 = vsel %vm1754_vm5, %v4038_v44, %v3037_v23 }
 0x154   : > { %v1921_v10 = vpack.c.bf16 %v1892_v20, %v1891_v34  ;;  %v3222_v6 = vunpack.i.h.bf16 %v3220_v22  ;;  %v3221_v5 = vunpack.i.l.bf16 %v3220_v22  ;;  %v3225_v24 = vpop.permute.xlu0 %3224  ;;  %v5088_v34 = vld [vmem:[#allocation25_spill] sm:$0xff]  ;;  %v5089_v22 = vld [vmem:[#allocation26_spill] sm:$0xff] }
 0x155   : > { %v3227_v27 = vunpack.i.h.bf16 %v3225_v24  ;;  %v3226_v14 = vunpack.i.l.bf16 %v3225_v24 }
 0x156   : > { %v1907_v36 = vsel %vm1886_vm9, %v1874_v55, %v3221_v5  ;;  %v1908_v41 = vsel %vm1886_vm9, %v1875_v59, %v3222_v6  ;;  %2719 = vmatprep.mubr.msk.bf16.mxu0 %vm1955_vm10, %v1921_v10 }
 0x157   : > { %v1929_v48 = vpack.c.bf16 %v1908_v41, %v1907_v36  ;;  %v1893_v60 = vsel %vm1886_vm9, %v1860_v31, %v3226_v14  ;;  %v1894_v21 = vsel %vm1886_vm9, %v1861_v49, %v3227_v27  ;;  %v3230_v19 = vpop.permute.xlu1 %3229 }
 0x158   : > { %v1922_v43 = vpack.c.bf16 %v1894_v21, %v1893_v60  ;;  %v3232_v53 = vunpack.i.h.bf16 %v3230_v19  ;;  %v3231_v11 = vunpack.i.l.bf16 %v3230_v19  ;;  %v3235_v63 = vpop.permute.xlu0 %3234 }
 0x159   : > { %2735 = vmatprep.mubr.msk.bf16.mxu1 %vm1955_vm10, %v1929_v48  ;;  %v3236_v7 = vunpack.i.l.bf16 %v3235_v63  ;;  %v3237_v30 = vunpack.i.h.bf16 %v3235_v63 }
 0x15a   : > { %v1909_v62 = vsel %vm1886_vm9, %v1876_v25, %v3231_v11  ;;  %v1910_v29 = vsel %vm1886_vm9, %v1877_v61, %v3232_v53  ;;  %2720 = vmatmul.mubr.msk.bf16.gmra.mxu0 %vm1955_vm10, %v1922_v43 }
 0x15b   : > { %v1930_v13 = vpack.c.bf16 %v1910_v29, %v1909_v62  ;;  %v3240_v37 = vpop.permute.xlu1 %3239  ;;  %v1779_v1 = vsel %vm1754_vm5, %v4124_v12, %v3236_v7  ;;  %v1780_v35 = vsel %vm1754_vm5, %v4127_v38, %v3237_v30 }
 0x15c   : > { %v3245_v4 = vpop.permute.xlu0 %3244  ;;  %v3242_v18 = vunpack.i.h.bf16 %v3240_v37  ;;  %v3241_v3 = vunpack.i.l.bf16 %v3240_v37 }
 0x15d   : > { %2736 = vmatmul.mubr.msk.bf16.gmra.mxu1 %vm1955_vm10, %v1930_v13  ;;  %v3246_v8 = vunpack.i.l.bf16 %v3245_v4  ;;  %v3247_v47 = vunpack.i.h.bf16 %v3245_v4 }
 0x15e   : > { %v1781_v20 = vsel %vm1754_vm5, %v5088_v34, %v3241_v3  ;;  %v1782_v0 = vsel %vm1754_vm5, %v5089_v22, %v3242_v18 }
 0x15f   : > { %v3250_v45 = vpop.permute.xlu1 %3249  ;;  %v1796_v51 = vsel %vm1787_vm6, %v1763_v32, %v3246_v8  ;;  %v1797_v33 = vsel %vm1787_vm6, %v1764_v39, %v3247_v47 }
 0x160   : > { %v3255_v50 = vpop.permute.xlu0 %3254  ;;  %v3252_v52 = vunpack.i.h.bf16 %v3250_v45  ;;  %v3251_v55 = vunpack.i.l.bf16 %v3250_v45 }
 0x161   : > { %v3257_v44 = vunpack.i.h.bf16 %v3255_v50  ;;  %v3256_v59 = vunpack.i.l.bf16 %v3255_v50 }
 0x162   : > { %v1812_v31 = vsel %vm1787_vm6, %v1779_v1, %v3251_v55  ;;  %v1813_v49 = vsel %vm1787_vm6, %v1780_v35, %v3252_v52 }
 0x163   : > { %v3260_v26 = vpop.permute.xlu1 %3259  ;;  %v1799_v36 = vsel %vm1787_vm6, %v1766_v28, %v3257_v44  ;;  %v1798_v42 = vsel %vm1787_vm6, %v1765_v15, %v3256_v59 }
 0x164   : > { %v3265_v57 = vpop.permute.xlu0 %3264  ;;  %v3261_v10 = vunpack.i.l.bf16 %v3260_v26  ;;  %v3262_v6 = vunpack.i.h.bf16 %v3260_v26 }
 0x165   : > { %v3267_v12 = vunpack.i.h.bf16 %v3265_v57  ;;  %v3266_v5 = vunpack.i.l.bf16 %v3265_v57 }
 0x166   : > { %v1814_v48 = vsel %vm1787_vm6, %v1781_v20, %v3261_v10  ;;  %v1815_v19 = vsel %vm1787_vm6, %v1782_v0, %v3262_v6 }
 0x167   : > { %v3270_v2 = vpop.permute.xlu1 %3269  ;;  %v1829_v46 = vsel %vm1820_vm7, %v1796_v51, %v3266_v5  ;;  %v1830_v43 = vsel %vm1820_vm7, %v1797_v33, %v3267_v12 }
 0x168   : > { %v3275_v58 = vpop.permute.xlu0 %3274  ;;  %v3272_v38 = vunpack.i.h.bf16 %v3270_v2  ;;  %v3271_v16 = vunpack.i.l.bf16 %v3270_v2 }
 0x169   : > { %v3276_v27 = vunpack.i.l.bf16 %v3275_v58  ;;  %v3277_v41 = vunpack.i.h.bf16 %v3275_v58 }
 0x16a   : > { %v1845_v63 = vsel %vm1820_vm7, %v1812_v31, %v3271_v16  ;;  %v1846_v25 = vsel %vm1820_vm7, %v1813_v49, %v3272_v38  ;;  %v5090_v49 = vld [vmem:[#allocation31_spill] sm:$0xff] }
 0x16b   : > { %v4543_v54 = vpop.permute.xlu1 %3279  ;;  %v1831_v61 = vsel %vm1820_vm7, %v1798_v42, %v3276_v27  ;;  %v1832_v13 = vsel %vm1820_vm7, %v1799_v36, %v3277_v41  ;;  %v3047_v36 = vunpack.i.h.bf16 %v5090_v49  ;;  %v3046_v41 = vunpack.i.l.bf16 %v5090_v49 }
 0x16c   : > { %v3285_v56 = vpop.permute.xlu0 %3284  ;;  %v3282_v37 = vunpack.i.h.bf16 %v4543_v54  ;;  %v3281_v40 = vunpack.i.l.bf16 %v4543_v54 }
 0x16d   : > { %v3287_v60 = vunpack.i.h.bf16 %v3285_v56  ;;  %v3286_v21 = vunpack.i.l.bf16 %v3285_v56 }
 0x16e   : > { %v1847_v35 = vsel %vm1820_vm7, %v1814_v48, %v3281_v40  ;;  %v1848_v20 = vsel %vm1820_vm7, %v1815_v19, %v3282_v37  ;;  %v5091_v48 = vld [vmem:[#allocation32_spill] sm:$0xff]  ;;  %v5094_v37 = vld [vmem:[#allocation23_spill] sm:$0xff] }
 0x16f   : > { %v3290_v24 = vpop.permute.xlu1 %3289  ;;  %v1862_v50 = vsel %vm1853_vm8, %v1829_v46, %v3286_v21  ;;  %v1863_v26 = vsel %vm1853_vm8, %v1830_v43, %v3287_v60  ;;  %v3052_v60 = vunpack.i.h.bf16 %v5091_v48  ;;  %v3051_v21 = vunpack.i.l.bf16 %v5091_v48 }
 0x170   : > { %v3295_v14 = vpop.permute.xlu0 %3294  ;;  %v3291_v53 = vunpack.i.l.bf16 %v3290_v24  ;;  %v3292_v62 = vunpack.i.h.bf16 %v3290_v24 }
 0x171   : > { %v3297_v57 = vunpack.i.h.bf16 %v3295_v14  ;;  %v3296_v23 = vunpack.i.l.bf16 %v3295_v14 }
 0x172   : > { %v1878_v2 = vsel %vm1853_vm8, %v1845_v63, %v3291_v53  ;;  %v1879_v58 = vsel %vm1853_vm8, %v1846_v25, %v3292_v62  ;;  %v5092_v63 = vld [vmem:[#allocation21_spill] sm:$0xff] }
 0x173   : > { %v3300_v11 = vpop.permute.xlu1 %3299  ;;  %v1864_v1 = vsel %vm1853_vm8, %v1831_v61, %v3296_v23  ;;  %v1865_v54 = vsel %vm1853_vm8, %v1832_v13, %v3297_v57  ;;  %v1767_v25 = vsel %vm1754_vm5, %v5092_v63, %v3046_v41  ;;  %v5093_v61 = vld [vmem:[#allocation22_spill] sm:$0xff] }
 0x174   : > { %v3305_v29 = vpop.permute.xlu0 %3304  ;;  %v3302_v39 = vunpack.i.h.bf16 %v3300_v11  ;;  %v3301_v8 = vunpack.i.l.bf16 %v3300_v11  ;;  %v1768_v62 = vsel %vm1754_vm5, %v5093_v61, %v3047_v36 }
 0x175   : > { %v3307_v4 = vunpack.i.h.bf16 %v3305_v29  ;;  %v3306_v45 = vunpack.i.l.bf16 %v3305_v29 }
 0x176   : > { %v1880_v51 = vsel %vm1853_vm8, %v1847_v35, %v3301_v8  ;;  %v1881_v6 = vsel %vm1853_vm8, %v1848_v20, %v3302_v39 }
 0x177   : > { %v1895_v9 = vsel %vm1886_vm9, %v1862_v50, %v3306_v45  ;;  %v1896_v17 = vsel %vm1886_vm9, %v1863_v26, %v3307_v4  ;;  %v3310_v7 = vpop.permute.xlu1 %3309  ;;  %v1769_v4 = vsel %vm1754_vm5, %v5094_v37, %v3051_v21  ;;  %v5095_v45 = vld [vmem:[#allocation24_spill] sm:$0xff]  ;;  %v5096_v26 = vld [vmem:[#allocation27_spill] sm:$0xff] }
 0x178   : > { %v1923_v30 = vpack.c.bf16 %v1896_v17, %v1895_v9  ;;  %v3312_v18 = vunpack.i.h.bf16 %v3310_v7  ;;  %v3311_v3 = vunpack.i.l.bf16 %v3310_v7  ;;  %v3315_v32 = vpop.permute.xlu0 %3314  ;;  %v1770_v50 = vsel %vm1754_vm5, %v5095_v45, %v3052_v60 }
 0x179   : > { %v3317_v15 = vunpack.i.h.bf16 %v3315_v32  ;;  %v3316_v28 = vunpack.i.l.bf16 %v3315_v32 }
 0x17a   : > { %v1911_v47 = vsel %vm1886_vm9, %v1878_v2, %v3311_v3  ;;  %v1912_v56 = vsel %vm1886_vm9, %v1879_v58, %v3312_v18  ;;  %2723 = vmatprep.mubr.msk.bf16.mxu0 %vm1955_vm10, %v1923_v30  ;;  %v5097_v2 = vld [vmem:[#allocation28_spill] sm:$0xff]  ;;  %v5098_v30 = vld [vmem:[#allocation29_spill] sm:$0xff]  ;;  %v5099_v3 = vld [vmem:[#allocation30_spill] sm:$0xff] }
 0x17b   : > { %v1931_v52 = vpack.c.bf16 %v1912_v56, %v1911_v47  ;;  %v1897_v55 = vsel %vm1886_vm9, %v1864_v1, %v3316_v28  ;;  %v1898_v44 = vsel %vm1886_vm9, %v1865_v54, %v3317_v15  ;;  %v3320_v34 = vpop.permute.xlu1 %3319 }
 0x17c   : > { %v1924_v22 = vpack.c.bf16 %v1898_v44, %v1897_v55  ;;  %v3322_v0 = vunpack.i.h.bf16 %v3320_v34  ;;  %v3321_v59 = vunpack.i.l.bf16 %v3320_v34  ;;  %v3325_v10 = vpop.permute.xlu0 %3324 }
 0x17d   : > { %2739 = vmatprep.mubr.msk.bf16.mxu1 %vm1955_vm10, %v1931_v52  ;;  %v3326_v19 = vunpack.i.l.bf16 %v3325_v10  ;;  %v3327_v43 = vunpack.i.h.bf16 %v3325_v10 }
 0x17e   : > { %v1913_v12 = vsel %vm1886_vm9, %v1880_v51, %v3321_v59  ;;  %v1914_v5 = vsel %vm1886_vm9, %v1881_v6, %v3322_v0  ;;  %2724 = vmatmul.mubr.msk.bf16.gmra.mxu0 %vm1955_vm10, %v1924_v22 }
 0x17f   : > { %v1932_v24 = vpack.c.bf16 %v1914_v5, %v1913_v12  ;;  %v3330_v33 = vpop.permute.xlu1 %3329  ;;  %v1783_v57 = vsel %vm1754_vm5, %v5096_v26, %v3326_v19  ;;  %v1784_v9 = vsel %vm1754_vm5, %v5097_v2, %v3327_v43 }
 0x180   : > { %v3335_v38 = vpop.permute.xlu0 %3334  ;;  %v3332_v53 = vunpack.i.h.bf16 %v3330_v33  ;;  %v3331_v11 = vunpack.i.l.bf16 %v3330_v33 }
 0x181   : > { %2740 = vmatmul.mubr.msk.bf16.gmra.mxu1 %vm1955_vm10, %v1932_v24  ;;  %v3336_v29 = vunpack.i.l.bf16 %v3335_v38  ;;  %v3337_v23 = vunpack.i.h.bf16 %v3335_v38 }
 0x182   : > { %v1785_v18 = vsel %vm1754_vm5, %v5098_v30, %v3331_v11  ;;  %v1786_v32 = vsel %vm1754_vm5, %v5099_v3, %v3332_v53 }
 0x183   : > { %v3340_v16 = vpop.permute.xlu1 %3339  ;;  %v1800_v15 = vsel %vm1787_vm6, %v1767_v25, %v3336_v29  ;;  %v1801_v56 = vsel %vm1787_vm6, %v1768_v62, %v3337_v23 }
 0x184   : > { %v3345_v27 = vpop.permute.xlu0 %3344  ;;  %v3342_v17 = vunpack.i.h.bf16 %v3340_v16  ;;  %v3341_v7 = vunpack.i.l.bf16 %v3340_v16 }
 0x185   : > { %v3347_v58 = vunpack.i.h.bf16 %v3345_v27  ;;  %v3346_v39 = vunpack.i.l.bf16 %v3345_v27 }
 0x186   : > { %v1816_v34 = vsel %vm1787_vm6, %v1783_v57, %v3341_v7  ;;  %v1817_v20 = vsel %vm1787_vm6, %v1784_v9, %v3342_v17 }
 0x187   : > { %v3350_v14 = vpop.permute.xlu1 %3349  ;;  %v1803_v22 = vsel %vm1787_vm6, %v1770_v50, %v3347_v58  ;;  %v1802_v59 = vsel %vm1787_vm6, %v1769_v4, %v3346_v39 }
 0x188   : > { %v3355_v31 = vpop.permute.xlu0 %3354  ;;  %v3351_v8 = vunpack.i.l.bf16 %v3350_v14  ;;  %v3352_v28 = vunpack.i.h.bf16 %v3350_v14 }
 0x189   : > { %v3357_v1 = vunpack.i.h.bf16 %v3355_v31  ;;  %v3356_v54 = vunpack.i.l.bf16 %v3355_v31 }
 0x18a   : > { %v1818_v10 = vsel %vm1787_vm6, %v1785_v18, %v3351_v8  ;;  %v1819_v12 = vsel %vm1787_vm6, %v1786_v32, %v3352_v28 }
 0x18b   : > { %v3360_v42 = vpop.permute.xlu1 %3359  ;;  %v1833_v5 = vsel %vm1820_vm7, %v1800_v15, %v3356_v54  ;;  %v1834_v24 = vsel %vm1820_vm7, %v1801_v56, %v3357_v1 }
 0x18c   : > { %v3365_v46 = vpop.permute.xlu0 %3364  ;;  %v3362_v35 = vunpack.i.h.bf16 %v3360_v42  ;;  %v3361_v52 = vunpack.i.l.bf16 %v3360_v42 }
 0x18d   : > { %v3366_v55 = vunpack.i.l.bf16 %v3365_v46  ;;  %v3367_v0 = vunpack.i.h.bf16 %v3365_v46 }
 0x18e   : > { %v1849_v16 = vsel %vm1820_vm7, %v1816_v34, %v3361_v52  ;;  %v1850_v27 = vsel %vm1820_vm7, %v1817_v20, %v3362_v35 }
 0x18f   : > { %v4603_v13 = vpop.permute.xlu1 %3369  ;;  %v1835_v14 = vsel %vm1820_vm7, %v1802_v59, %v3366_v55  ;;  %v1836_v36 = vsel %vm1820_vm7, %v1803_v22, %v3367_v0 }
 0x190   : > { %v3375_v40 = vpop.permute.xlu0 %3374  ;;  %v3372_v41 = vunpack.i.h.bf16 %v4603_v13  ;;  %v3371_v43 = vunpack.i.l.bf16 %v4603_v13 }
 0x191   : > { %v3377_v51 = vunpack.i.h.bf16 %v3375_v40  ;;  %v3376_v6 = vunpack.i.l.bf16 %v3375_v40 }
 0x192   : > { %v1851_v9 = vsel %vm1820_vm7, %v1818_v10, %v3371_v43  ;;  %v1852_v18 = vsel %vm1820_vm7, %v1819_v12, %v3372_v41 }
 0x193   : > { %v3380_v47 = vpop.permute.xlu1 %3379  ;;  %v1866_v60 = vsel %vm1853_vm8, %v1833_v5, %v3376_v6  ;;  %v1867_v21 = vsel %vm1853_vm8, %v1834_v24, %v3377_v51 }
 0x194   : > { %v3385_v44 = vpop.permute.xlu0 %3384  ;;  %v3381_v33 = vunpack.i.l.bf16 %v3380_v47  ;;  %v3382_v31 = vunpack.i.h.bf16 %v3380_v47 }
 0x195   : > { %v3387_v19 = vunpack.i.h.bf16 %v3385_v44  ;;  %v3386_v46 = vunpack.i.l.bf16 %v3385_v44 }
 0x196   : > { %v1882_v53 = vsel %vm1853_vm8, %v1849_v16, %v3381_v33  ;;  %v1883_v61 = vsel %vm1853_vm8, %v1850_v27, %v3382_v31 }
 0x197   : > { %v3390_v38 = vpop.permute.xlu1 %3389  ;;  %v1868_v23 = vsel %vm1853_vm8, %v1835_v14, %v3386_v46  ;;  %v1869_v13 = vsel %vm1853_vm8, %v1836_v36, %v3387_v19 }
 0x198   : > { %v3395_v49 = vpop.permute.xlu0 %3394  ;;  %v3392_v45 = vunpack.i.h.bf16 %v3390_v38  ;;  %v3391_v50 = vunpack.i.l.bf16 %v3390_v38 }
 0x199   : > { %v3397_v42 = vunpack.i.h.bf16 %v3395_v49  ;;  %v3396_v48 = vunpack.i.l.bf16 %v3395_v49 }
 0x19a   : > { %v1884_v8 = vsel %vm1853_vm8, %v1851_v9, %v3391_v50  ;;  %v1885_v15 = vsel %vm1853_vm8, %v1852_v18, %v3392_v45 }
 0x19b   : > { %v1899_v11 = vsel %vm1886_vm9, %v1866_v60, %v3396_v48  ;;  %v1900_v63 = vsel %vm1886_vm9, %v1867_v21, %v3397_v42  ;;  %v3400_v25 = vpop.permute.xlu1 %3399 }
 0x19c   : > { %v1925_v62 = vpack.c.bf16 %v1900_v63, %v1899_v11  ;;  %v3402_v29 = vunpack.i.h.bf16 %v3400_v25  ;;  %v3401_v37 = vunpack.i.l.bf16 %v3400_v25  ;;  %v3405_v4 = vpop.permute.xlu0 %3404 }
 0x19d   : > { %v3407_v26 = vunpack.i.h.bf16 %v3405_v4  ;;  %v3406_v57 = vunpack.i.l.bf16 %v3405_v4 }
 0x19e   : > { %v1915_v40 = vsel %vm1886_vm9, %v1882_v53, %v3401_v37  ;;  %v1916_v2 = vsel %vm1886_vm9, %v1883_v61, %v3402_v29  ;;  %2727 = vmatprep.mubr.msk.bf16.mxu0 %vm1955_vm10, %v1925_v62 }
 0x19f   : > { %v1933_v17 = vpack.c.bf16 %v1916_v2, %v1915_v40  ;;  %v1901_v7 = vsel %vm1886_vm9, %v1868_v23, %v3406_v57  ;;  %v1902_v58 = vsel %vm1886_vm9, %v1869_v13, %v3407_v26  ;;  %v3410_v30 = vpop.permute.xlu1 %3409 }
 0x1a0   : > { %v1926_v3 = vpack.c.bf16 %v1902_v58, %v1901_v7  ;;  %v3412_v32 = vunpack.i.h.bf16 %v3410_v30  ;;  %v3411_v39 = vunpack.i.l.bf16 %v3410_v30 }
 0x1a1   : > { %2743 = vmatprep.mubr.msk.bf16.mxu1 %vm1955_vm10, %v1933_v17 }
 0x1a2   : > { %v1917_v28 = vsel %vm1886_vm9, %v1884_v8, %v3411_v39  ;;  %v1918_v1 = vsel %vm1886_vm9, %v1885_v15, %v3412_v32  ;;  %2728 = vmatmul.mubr.msk.bf16.gmra.mxu0 %vm1955_vm10, %v1926_v3 }
 0x1a3   : > { %v1934_v54 = vpack.c.bf16 %v1918_v1, %v1917_v28 }
 0x1a5   : > { %2744 = vmatmul.mubr.msk.bf16.gmra.mxu1 %vm1955_vm10, %v1934_v54 }
 0x1f6   : > { %v2717_v47 = vpop.f32.mrf.mxu0 }
 0x1f7   : > { %2171 = vst.msk [vmem:[%s4659_s12 + $0x10] sm:$0xff] %vm1886_vm9, %v2717_v47  ;;  %2237 = vrot.lane.b32.xlu0 %v2717_v47, %s3441_s13  ;;  %v2435_v20 = vmul.f32 %v2717_v47, %v2717_v47  ;;  %v2365_v6 = vsel %vm2361_vm11, %v2717_v47, 0.0 }
 0x1f8   : > { %v2042_v56 = vpop.f32.mrf.mxu0 }
 0x1f9   : > { %2169 = vst.msk [vmem:[%s4659_s12] sm:$0xff] %vm1886_vm9, %v2042_v56  ;;  %v4666_v35 = vpop.f32.mrf.mxu1  ;;  %v2433_v55 = vmul.f32 %v2042_v56, %v2042_v56  ;;  %v2362_v22 = vsel %vm2361_vm11, %v2042_v56, 0.0  ;;  %v2468_v27 = vsel %vm2361_vm11, %v2435_v20, 0.0 }
 0x1fa   : > { %v2718_v52 = vpop.f32.mrf.mxu0  ;;  %2187 = vst.msk [vmem:[%s4659_s12 + $0x90] sm:$0xff] %vm1886_vm9, %v4666_v35 }
 0x1fb   : > { %2172 = vst.msk [vmem:[%s4659_s12 + $0x18] sm:$0xff] %vm1886_vm9, %v2718_v52  ;;  %2269 = vrot.lane.b32.xlu0 %v4666_v35, %s3441_s13  ;;  %2239 = vrot.lane.b32.xlu1 %v2718_v52, %s3441_s13  ;;  %v4676_v44 = vpop.f32.mrf.mxu1  ;;  %v2465_v12 = vsel %vm2361_vm11, %v2433_v55, 0.0  ;;  %v2436_v5 = vmul.f32 %v2718_v52, %v2718_v52  ;;  %v2367_v14 = vsel %vm2361_vm11, %v2718_v52, 0.0 }
 0x1fc   : > { %v2045_v34 = vpop.f32.mrf.mxu0  ;;  %2185 = vst.msk [vmem:[%s4659_s12 + $0x80] sm:$0xff] %vm1886_vm9, %v4676_v44 }
 0x1fd   : > { %2170 = vst.msk [vmem:[%s4659_s12 + $0x8] sm:$0xff] %vm1886_vm9, %v2045_v34  ;;  %v2363_v0 = vsel %vm2361_vm11, %v2045_v34, 0.0  ;;  %v2434_v59 = vmul.f32 %v2045_v34, %v2045_v34  ;;  %v4685_v10 = vpop.f32.mrf.mxu1  ;;  %v2470_v36 = vsel %vm2361_vm11, %v2436_v5, 0.0 }
 0x1fe   : > { %v2364_v51 = vadd.f32 %v2363_v0, %v2362_v22  ;;  %2188 = vst.msk [vmem:[%s4659_s12 + $0x98] sm:$0xff] %vm1886_vm9, %v4685_v10 }
 0x1ff   : > { %v2466_v24 = vsel %vm2361_vm11, %v2434_v59, 0.0  ;;  %2233 = vrot.lane.b32.xlu0 %v2042_v56, %s3441_s13  ;;  %2271 = vrot.lane.b32.xlu1 %v4685_v10, %s3441_s13  ;;  %v4696_v33 = vpop.f32.mrf.mxu1 }
 0x200   : > { %v2366_v38 = vadd.f32 %v2365_v6, %v2364_v51  ;;  %v2467_v16 = vadd.f32 %v2466_v24, %v2465_v12  ;;  %2186 = vst.msk [vmem:[%s4659_s12 + $0x88] sm:$0xff] %vm1886_vm9, %v4696_v33 }
 0x202   : > { %v2469_v31 = vadd.f32 %v2468_v27, %v2467_v16  ;;  %v2368_v49 = vadd.f32 %v2367_v14, %v2366_v38 }
 0x203   : > { %2265 = vrot.lane.b32.xlu0 %v4676_v44, %s3441_s13  ;;  %2235 = vrot.lane.b32.xlu1 %v2045_v34, %s3441_s13 }
 0x204   : > { %v2471_v41 = vadd.f32 %v2470_v36, %v2469_v31 }
 0x207   : > { %2267 = vrot.lane.b32.xlu1 %v4696_v33, %s3441_s13 }
 0x21a   : > { %v2721_v42 = vpop.f32.mrf.mxu0 }
 0x21b   : > { %2175 = vst.msk [vmem:[%s4659_s12 + $0x30] sm:$0xff] %vm1886_vm9, %v2721_v42  ;;  %2245 = vrot.lane.b32.xlu0 %v2721_v42, %s3441_s13  ;;  %v2439_v25 = vmul.f32 %v2721_v42, %v2721_v42  ;;  %v2373_v45 = vsel %vm2361_vm11, %v2721_v42, 0.0 }
 0x21c   : > { %v2058_v48 = vpop.f32.mrf.mxu0 }
 0x21d   : > { %2173 = vst.msk [vmem:[%s4659_s12 + $0x20] sm:$0xff] %vm1886_vm9, %v2058_v48  ;;  %v2369_v60 = vsel %vm2361_vm11, %v2058_v48, 0.0  ;;  %v2437_v21 = vmul.f32 %v2058_v48, %v2058_v48  ;;  %v4715_v19 = vpop.f32.mrf.mxu1  ;;  %v2476_v13 = vsel %vm2361_vm11, %v2439_v25, 0.0 }
 0x21e   : > { %v2722_v46 = vpop.f32.mrf.mxu0  ;;  %2191 = vst.msk [vmem:[%s4659_s12 + $0xb0] sm:$0xff] %vm1886_vm9, %v4715_v19  ;;  %v2370_v11 = vadd.f32 %v2369_v60, %v2368_v49 }
 0x21f   : > { %v2472_v43 = vsel %vm2361_vm11, %v2437_v21, 0.0  ;;  %2176 = vst.msk [vmem:[%s4659_s12 + $0x38] sm:$0xff] %vm1886_vm9, %v2722_v46  ;;  %2277 = vrot.lane.b32.xlu0 %v4715_v19, %s3441_s13  ;;  %2247 = vrot.lane.b32.xlu1 %v2722_v46, %s3441_s13  ;;  %v4726_v53 = vpop.f32.mrf.mxu1  ;;  %v2440_v32 = vmul.f32 %v2722_v46, %v2722_v46  ;;  %v2375_v8 = vsel %vm2361_vm11, %v2722_v46, 0.0 }
 0x220   : > { %v2061_v63 = vpop.f32.mrf.mxu0  ;;  %2189 = vst.msk [vmem:[%s4659_s12 + $0xa0] sm:$0xff] %vm1886_vm9, %v4726_v53  ;;  %v2473_v37 = vadd.f32 %v2472_v43, %v2471_v41 }
 0x221   : > { %2174 = vst.msk [vmem:[%s4659_s12 + $0x28] sm:$0xff] %vm1886_vm9, %v2061_v63  ;;  %v2371_v61 = vsel %vm2361_vm11, %v2061_v63, 0.0  ;;  %v2438_v62 = vmul.f32 %v2061_v63, %v2061_v63  ;;  %v4734_v29 = vpop.f32.mrf.mxu1  ;;  %v2478_v54 = vsel %vm2361_vm11, %v2440_v32, 0.0 }
 0x222   : > { %v2372_v4 = vadd.f32 %v2371_v61, %v2370_v11  ;;  %2192 = vst.msk [vmem:[%s4659_s12 + $0xb8] sm:$0xff] %vm1886_vm9, %v4734_v29 }
 0x223   : > { %v2474_v50 = vsel %vm2361_vm11, %v2438_v62, 0.0  ;;  %2241 = vrot.lane.b32.xlu0 %v2058_v48, %s3441_s13  ;;  %2279 = vrot.lane.b32.xlu1 %v4734_v29, %s3441_s13  ;;  %v4744_v26 = vpop.f32.mrf.mxu1 }
 0x224   : > { %v2374_v57 = vadd.f32 %v2373_v45, %v2372_v4  ;;  %v2475_v23 = vadd.f32 %v2474_v50, %v2473_v37  ;;  %2190 = vst.msk [vmem:[%s4659_s12 + $0xa8] sm:$0xff] %vm1886_vm9, %v4744_v26 }
 0x226   : > { %v2477_v40 = vadd.f32 %v2476_v13, %v2475_v23  ;;  %v2376_v1 = vadd.f32 %v2375_v8, %v2374_v57 }
 0x227   : > { %2273 = vrot.lane.b32.xlu0 %v4726_v53, %s3441_s13  ;;  %2243 = vrot.lane.b32.xlu1 %v2061_v63, %s3441_s13 }
 0x228   : > { %v2479_v55 = vadd.f32 %v2478_v54, %v2477_v40 }
 0x22b   : > { %2275 = vrot.lane.b32.xlu1 %v4744_v26, %s3441_s13 }
 0x23e   : > { %v2725_v2 = vpop.f32.mrf.mxu0 }
 0x23f   : > { %2179 = vst.msk [vmem:[%s4659_s12 + $0x50] sm:$0xff] %vm1886_vm9, %v2725_v2  ;;  %2253 = vrot.lane.b32.xlu0 %v2725_v2, %s3441_s13  ;;  %v2443_v0 = vmul.f32 %v2725_v2, %v2725_v2  ;;  %v2381_v51 = vsel %vm2361_vm11, %v2725_v2, 0.0  ;;  %v2449_v2 = vmul.f32 %v4676_v44, %v4676_v44 }
 0x240   : > { %v2074_v9 = vpop.f32.mrf.mxu0 }
 0x241   : > { %2177 = vst.msk [vmem:[%s4659_s12 + $0x40] sm:$0xff] %vm1886_vm9, %v2074_v9  ;;  %v4760_v17 = vpop.f32.mrf.mxu1  ;;  %v2441_v39 = vmul.f32 %v2074_v9, %v2074_v9  ;;  %v2377_v15 = vsel %vm2361_vm11, %v2074_v9, 0.0  ;;  %v2484_v5 = vsel %vm2361_vm11, %v2443_v0, 0.0  ;;  %v2397_v0 = vsel %vm2361_vm11, %v4666_v35, 0.0 }
 0x242   : > { %v2726_v7 = vpop.f32.mrf.mxu0  ;;  %2195 = vst.msk [vmem:[%s4659_s12 + $0xd0] sm:$0xff] %vm1886_vm9, %v4760_v17  ;;  %v2378_v52 = vadd.f32 %v2377_v15, %v2376_v1  ;;  %v2393_v15 = vsel %vm2361_vm11, %v4676_v44, 0.0  ;;  %v2395_v44 = vsel %vm2361_vm11, %v4696_v33, 0.0 }
 0x243   : > { %2180 = vst.msk [vmem:[%s4659_s12 + $0x58] sm:$0xff] %vm1886_vm9, %v2726_v7  ;;  %2285 = vrot.lane.b32.xlu0 %v4760_v17, %s3441_s13  ;;  %2255 = vrot.lane.b32.xlu1 %v2726_v7, %s3441_s13  ;;  %v4770_v58 = vpop.f32.mrf.mxu1  ;;  %v2480_v47 = vsel %vm2361_vm11, %v2441_v39, 0.0  ;;  %v2444_v24 = vmul.f32 %v2726_v7, %v2726_v7  ;;  %v2383_v27 = vsel %vm2361_vm11, %v2726_v7, 0.0 }
 0x244   : > { %v2077_v30 = vpop.f32.mrf.mxu0  ;;  %2193 = vst.msk [vmem:[%s4659_s12 + $0xc0] sm:$0xff] %vm1886_vm9, %v4770_v58  ;;  %v2481_v20 = vadd.f32 %v2480_v47, %v2479_v55 }
 0x245   : > { %2178 = vst.msk [vmem:[%s4659_s12 + $0x48] sm:$0xff] %vm1886_vm9, %v2077_v30  ;;  %v4777_v18 = vpop.f32.mrf.mxu1  ;;  %v2442_v28 = vmul.f32 %v2077_v30, %v2077_v30  ;;  %v2379_v56 = vsel %vm2361_vm11, %v2077_v30, 0.0  ;;  %v2486_v42 = vsel %vm2361_vm11, %v2444_v24, 0.0  ;;  %v2453_v24 = vmul.f32 %v4726_v53, %v4726_v53 }
 0x246   : > { %2196 = vst.msk [vmem:[%s4659_s12 + $0xd8] sm:$0xff] %vm1886_vm9, %v4777_v18  ;;  %v2380_v22 = vadd.f32 %v2379_v56, %v2378_v52  ;;  %v2451_v56 = vmul.f32 %v4666_v35, %v4666_v35  ;;  %v2496_v52 = vsel %vm2361_vm11, %v2449_v2, 0.0 }
 0x247   : > { %2249 = vrot.lane.b32.xlu0 %v2074_v9, %s3441_s13  ;;  %2287 = vrot.lane.b32.xlu1 %v4777_v18, %s3441_s13  ;;  %v4785_v3 = vpop.f32.mrf.mxu1  ;;  %v2482_v34 = vsel %vm2361_vm11, %v2442_v28, 0.0  ;;  %v2450_v28 = vmul.f32 %v4696_v33, %v4696_v33 }
 0x248   : > { %2194 = vst.msk [vmem:[%s4659_s12 + $0xc8] sm:$0xff] %vm1886_vm9, %v4785_v3  ;;  %v2483_v59 = vadd.f32 %v2482_v34, %v2481_v20  ;;  %v2382_v6 = vadd.f32 %v2381_v51, %v2380_v22 }
 0x249   : > { %v2498_v51 = vsel %vm2361_vm11, %v2450_v28, 0.0 }
 0x24a   : > { %v2485_v38 = vadd.f32 %v2484_v5, %v2483_v59  ;;  %v2384_v41 = vadd.f32 %v2383_v27, %v2382_v6  ;;  %v2452_v59 = vmul.f32 %v4685_v10, %v4685_v10  ;;  %v2399_v5 = vsel %vm2361_vm11, %v4685_v10, 0.0 }
 0x24b   : > { %2281 = vrot.lane.b32.xlu0 %v4770_v58, %s3441_s13  ;;  %2251 = vrot.lane.b32.xlu1 %v2077_v30, %s3441_s13  ;;  %v2454_v10 = vmul.f32 %v4744_v26, %v4744_v26 }
 0x24c   : > { %v2487_v43 = vadd.f32 %v2486_v42, %v2485_v38  ;;  %v2455_v42 = vmul.f32 %v4715_v19, %v4715_v19 }
 0x24f   : > { %2283 = vrot.lane.b32.xlu1 %v4785_v3, %s3441_s13 }
 0x262   : > { %v2729_v12 = vpop.f32.mrf.mxu0 }
 0x263   : > { %2183 = vst.msk [vmem:[%s4659_s12 + $0x70] sm:$0xff] %vm1886_vm9, %v2729_v12  ;;  %2261 = vrot.lane.b32.xlu0 %v2729_v12, %s3441_s13  ;;  %v2447_v11 = vmul.f32 %v2729_v12, %v2729_v12  ;;  %v2389_v45 = vsel %vm2361_vm11, %v2729_v12, 0.0  ;;  %v2500_v12 = vsel %vm2361_vm11, %v2451_v56, 0.0 }
 0x264   : > { %v2090_v16 = vpop.f32.mrf.mxu0 }
 0x265   : > { %2181 = vst.msk [vmem:[%s4659_s12 + $0x60] sm:$0xff] %vm1886_vm9, %v2090_v16  ;;  %v2385_v14 = vsel %vm2361_vm11, %v2090_v16, 0.0  ;;  %v2445_v31 = vmul.f32 %v2090_v16, %v2090_v16  ;;  %v4810_v49 = vpop.f32.mrf.mxu1  ;;  %v2492_v9 = vsel %vm2361_vm11, %v2447_v11, 0.0 }
 0x266   : > { %v2730_v36 = vpop.f32.mrf.mxu0  ;;  %2199 = vst.msk [vmem:[%s4659_s12 + $0xf0] sm:$0xff] %vm1886_vm9, %v4810_v49  ;;  %v2386_v46 = vadd.f32 %v2385_v14, %v2384_v41  ;;  %v2502_v14 = vsel %vm2361_vm11, %v2452_v59, 0.0 }
 0x267   : > { %v2488_v48 = vsel %vm2361_vm11, %v2445_v31, 0.0  ;;  %2184 = vst.msk [vmem:[%s4659_s12 + $0x78] sm:$0xff] %vm1886_vm9, %v2730_v36  ;;  %2257 = vrot.lane.b32.xlu0 %v2090_v16, %s3441_s13  ;;  %2263 = vrot.lane.b32.xlu1 %v2730_v36, %s3441_s13  ;;  %v4821_v60 = vpop.f32.mrf.mxu1  ;;  %v2448_v50 = vmul.f32 %v2730_v36, %v2730_v36  ;;  %v2391_v7 = vsel %vm2361_vm11, %v2730_v36, 0.0  ;;  %v2401_v31 = vsel %vm2361_vm11, %v4726_v53, 0.0 }
 0x268   : > { %v2093_v21 = vpop.f32.mrf.mxu0  ;;  %2197 = vst.msk [vmem:[%s4659_s12 + $0xe0] sm:$0xff] %vm1886_vm9, %v4821_v60  ;;  %v2489_v4 = vadd.f32 %v2488_v48, %v2487_v43  ;;  %v2504_v48 = vsel %vm2361_vm11, %v2453_v24, 0.0  ;;  %v2405_v53 = vsel %vm2361_vm11, %v4715_v19, 0.0  ;;  %v2409_v19 = vsel %vm2361_vm11, %v4770_v58, 0.0 }
 0x269   : > { %2182 = vst.msk [vmem:[%s4659_s12 + $0x68] sm:$0xff] %vm1886_vm9, %v2093_v21  ;;  %v2387_v63 = vsel %vm2361_vm11, %v2093_v21, 0.0  ;;  %v2446_v25 = vmul.f32 %v2093_v21, %v2093_v21  ;;  %v2238_v61 = vpop.permute.xlu0 %2237  ;;  %v4835_v62 = vpop.f32.mrf.mxu1  ;;  %v2494_v1 = vsel %vm2361_vm11, %v2448_v50, 0.0 }
 0x26a   : > { %v2388_v37 = vadd.f32 %v2387_v63, %v2386_v46  ;;  %2331 = vst.msk [vmem:[%s4827_s19 + $0x10] sm:$0xff] %vm1886_vm9, %v2238_v61  ;;  %2200 = vst.msk [vmem:[%s4659_s12 + $0xf8] sm:$0xff] %vm1886_vm9, %v4835_v62  ;;  %v2456_v63 = vmul.f32 %v4734_v29, %v4734_v29 }
 0x26b   : > { %v2490_v57 = vsel %vm2361_vm11, %v2446_v25, 0.0  ;;  %2289 = vrot.lane.b32.xlu0 %v4821_v60, %s3441_s13  ;;  %2259 = vrot.lane.b32.xlu1 %v2093_v21, %s3441_s13  ;;  %v4847_v23 = vpop.f32.mrf.mxu1  ;;  %v2403_v21 = vsel %vm2361_vm11, %v4744_v26, 0.0  ;;  %v2506_v25 = vsel %vm2361_vm11, %v2454_v10, 0.0  ;;  %v2407_v26 = vsel %vm2361_vm11, %v4734_v29, 0.0 }
 0x26c   : > { %v2390_v13 = vadd.f32 %v2389_v45, %v2388_v37  ;;  %v2491_v40 = vadd.f32 %v2490_v57, %v2489_v4  ;;  %2198 = vst.msk [vmem:[%s4659_s12 + $0xe8] sm:$0xff] %vm1886_vm9, %v4847_v23  ;;  %v2508_v4 = vsel %vm2361_vm11, %v2455_v42, 0.0  ;;  %v2457_v45 = vmul.f32 %v4770_v58, %v4770_v58 }
 0x26d   : > { %v2270_v30 = vpop.permute.xlu0 %2269  ;;  %v2240_v32 = vpop.permute.xlu1 %2239  ;;  %v2460_v58 = vmul.f32 %v4777_v18, %v4777_v18 }
 0x26e   : > { %v2392_v39 = vadd.f32 %v2391_v7, %v2390_v13  ;;  %v2493_v8 = vadd.f32 %v2492_v9, %v2491_v40  ;;  %2347 = vst.msk [vmem:[%s4827_s19 + $0x90] sm:$0xff] %vm1886_vm9, %v2270_v30  ;;  %2332 = vst.msk [vmem:[%s4827_s19 + $0x18] sm:$0xff] %vm1886_vm9, %v2240_v32  ;;  %v2510_v13 = vsel %vm2361_vm11, %v2456_v63, 0.0  ;;  %v2458_v40 = vmul.f32 %v4785_v3, %v4785_v3 }
 0x26f   : > { %2293 = vrot.lane.b32.xlu0 %v4810_v49, %s3441_s13  ;;  %2291 = vrot.lane.b32.xlu1 %v4847_v23, %s3441_s13  ;;  %v2459_v7 = vmul.f32 %v4760_v17, %v4760_v17  ;;  %v2512_v29 = vsel %vm2361_vm11, %v2457_v45, 0.0  ;;  %v2411_v30 = vsel %vm2361_vm11, %v4785_v3, 0.0  ;;  %v2461_v3 = vmul.f32 %v4821_v60, %v4821_v60 }
 0x270   : > { %v2394_v54 = vadd.f32 %v2393_v15, %v2392_v39  ;;  %v2495_v47 = vadd.f32 %v2494_v1, %v2493_v8  ;;  %v2413_v8 = vsel %vm2361_vm11, %v4760_v17, 0.0  ;;  %v2514_v15 = vsel %vm2361_vm11, %v2458_v40, 0.0 }
 0x271   : > { %v2234_v55 = vpop.permute.xlu0 %2233  ;;  %v2272_v34 = vpop.permute.xlu1 %2271  ;;  %v2417_v17 = vsel %vm2361_vm11, %v4821_v60, 0.0  ;;  %v2464_v60 = vmul.f32 %v4835_v62, %v4835_v62 }
 0x272   : > { %v2396_v20 = vadd.f32 %v2395_v44, %v2394_v54  ;;  %v2497_v22 = vadd.f32 %v2496_v52, %v2495_v47  ;;  %2329 = vst.msk [vmem:[%s4827_s19] sm:$0xff] %vm1886_vm9, %v2234_v55  ;;  %2348 = vst.msk [vmem:[%s4827_s19 + $0x98] sm:$0xff] %vm1886_vm9, %v2272_v34  ;;  %v2516_v54 = vsel %vm2361_vm11, %v2459_v7, 0.0  ;;  %v2415_v47 = vsel %vm2361_vm11, %v4777_v18, 0.0 }
 0x273   : > { %2295 = vrot.lane.b32.xlu1 %v4835_v62, %s3441_s13  ;;  %v2518_v44 = vsel %vm2361_vm11, %v2460_v58, 0.0  ;;  %v2462_v55 = vmul.f32 %v4847_v23, %v4847_v23  ;;  %v2520_v18 = vsel %vm2361_vm11, %v2461_v3, 0.0 }
 0x274   : > { %v2398_v33 = vadd.f32 %v2397_v0, %v2396_v20  ;;  %v2499_v6 = vadd.f32 %v2498_v51, %v2497_v22  ;;  %v2463_v22 = vmul.f32 %v4810_v49, %v4810_v49  ;;  %v2419_v0 = vsel %vm2361_vm11, %v4847_v23, 0.0 }
 0x275   : > { %v2266_v38 = vpop.permute.xlu0 %2265  ;;  %v2236_v35 = vpop.permute.xlu1 %2235 }
 0x276   : > { %v2400_v16 = vadd.f32 %v2399_v5, %v2398_v33  ;;  %v2501_v27 = vadd.f32 %v2500_v12, %v2499_v6  ;;  %2345 = vst.msk [vmem:[%s4827_s19 + $0x80] sm:$0xff] %vm1886_vm9, %v2266_v38  ;;  %2330 = vst.msk [vmem:[%s4827_s19 + $0x8] sm:$0xff] %vm1886_vm9, %v2236_v35  ;;  %v2421_v33 = vsel %vm2361_vm11, %v4810_v49, 0.0  ;;  %v2522_v6 = vsel %vm2361_vm11, %v2462_v55, 0.0 }
 0x277   : > { %v2524_v24 = vsel %vm2361_vm11, %v2463_v22, 0.0  ;;  %v2423_v38 = vsel %vm2361_vm11, %v4835_v62, 0.0  ;;  %v2526_v49 = vsel %vm2361_vm11, %v2464_v60, 0.0 }
 0x278   : > { %v2402_v36 = vadd.f32 %v2401_v31, %v2400_v16  ;;  %v2503_v41 = vadd.f32 %v2502_v14, %v2501_v27 }
 0x279   : > { %v2268_v46 = vpop.permute.xlu1 %2267 }
 0x27a   : > { %v2505_v43 = vadd.f32 %v2504_v48, %v2503_v41  ;;  %v2404_v11 = vadd.f32 %v2403_v21, %v2402_v36  ;;  %2346 = vst.msk [vmem:[%s4827_s19 + $0x88] sm:$0xff] %vm1886_vm9, %v2268_v46 }
 0x27c   : > { %v2406_v61 = vadd.f32 %v2405_v53, %v2404_v11  ;;  %v2507_v37 = vadd.f32 %v2506_v25, %v2505_v43 }
 0x27e   : > { %v2408_v50 = vadd.f32 %v2407_v26, %v2406_v61  ;;  %v2509_v57 = vadd.f32 %v2508_v4, %v2507_v37 }
 0x280   : > { %v2410_v2 = vadd.f32 %v2409_v19, %v2408_v50  ;;  %v2511_v9 = vadd.f32 %v2510_v13, %v2509_v57 }
 0x282   : > { %v2412_v32 = vadd.f32 %v2411_v30, %v2410_v2  ;;  %v2513_v39 = vadd.f32 %v2512_v29, %v2511_v9 }
 0x284   : > { %v2414_v28 = vadd.f32 %v2413_v8, %v2412_v32  ;;  %v2515_v1 = vadd.f32 %v2514_v15, %v2513_v39 }
 0x286   : > { %v2416_v56 = vadd.f32 %v2415_v47, %v2414_v28  ;;  %v2517_v52 = vadd.f32 %v2516_v54, %v2515_v1 }
 0x288   : > { %v2418_v34 = vadd.f32 %v2417_v17, %v2416_v56  ;;  %v2519_v20 = vadd.f32 %v2518_v44, %v2517_v52 }
 0x28a   : > { %v2420_v59 = vadd.f32 %v2419_v0, %v2418_v34  ;;  %v2521_v51 = vadd.f32 %v2520_v18, %v2519_v20 }
 0x28c   : > { %v2422_v12 = vadd.f32 %v2421_v33, %v2420_v59  ;;  %v2523_v5 = vadd.f32 %v2522_v6, %v2521_v51 }
 0x28d   : > { %v2246_v23 = vpop.permute.xlu0 %2245 }
 0x28e   : > { %v2424_v35 = vadd.f32 %v2423_v38, %v2422_v12  ;;  %v2525_v16 = vadd.f32 %v2524_v24, %v2523_v5  ;;  %2335 = vst.msk [vmem:[%s4827_s19 + $0x30] sm:$0xff] %vm1886_vm9, %v2246_v23 }
 0x290   : > { %v2425_v27 = vrot.slane %v2424_v35, 4  ;;  %v2527_v14 = vadd.f32 %v2526_v49, %v2525_v16 }
 0x291   : > { %v2278_v31 = vpop.permute.xlu0 %2277  ;;  %v2248_v10 = vpop.permute.xlu1 %2247 }
 0x292   : > { %v2426_v36 = vadd.f32 %v2425_v27, %v2424_v35  ;;  %v2528_v41 = vrot.slane %v2527_v14, 4  ;;  %2351 = vst.msk [vmem:[%s4827_s19 + $0xb0] sm:$0xff] %vm1886_vm9, %v2278_v31  ;;  %2336 = vst.msk [vmem:[%s4827_s19 + $0x38] sm:$0xff] %vm1886_vm9, %v2248_v10 }
 0x294   : > { %v2427_v62 = vrot.slane %v2426_v36, 2  ;;  %v2529_v42 = vadd.f32 %v2528_v41, %v2527_v14 }
 0x295   : > { %v2242_v48 = vpop.permute.xlu0 %2241  ;;  %v2280_v21 = vpop.permute.xlu1 %2279 }
 0x296   : > { %v2428_v46 = vadd.f32 %v2427_v62, %v2426_v36  ;;  %v2530_v43 = vrot.slane %v2529_v42, 2  ;;  %2333 = vst.msk [vmem:[%s4827_s19 + $0x20] sm:$0xff] %vm1886_vm9, %v2242_v48  ;;  %2352 = vst.msk [vmem:[%s4827_s19 + $0xb8] sm:$0xff] %vm1886_vm9, %v2280_v21 }
 0x298   : > { %v2429_v11 = vrot.slane %v2428_v46, 1  ;;  %v2531_v53 = vadd.f32 %v2530_v43, %v2529_v42 }
 0x299   : > { %v2274_v63 = vpop.permute.xlu0 %2273  ;;  %v2244_v25 = vpop.permute.xlu1 %2243 }
 0x29a   : > { %v2430_v61 = vadd.f32 %v2429_v11, %v2428_v46  ;;  %v2532_v37 = vrot.slane %v2531_v53, 1  ;;  %2349 = vst.msk [vmem:[%s4827_s19 + $0xa0] sm:$0xff] %vm1886_vm9, %v2274_v63  ;;  %2334 = vst.msk [vmem:[%s4827_s19 + $0x28] sm:$0xff] %vm1886_vm9, %v2244_v25 }
 0x29c   : > { %2432 = vst.msk [vmem:[%s220_s22] sm:$0x1] %vm2431_vm12, %v2430_v61  ;;  %v2533_v4 = vadd.f32 %v2532_v37, %v2531_v53 }
 0x29d   : > { %v2276_v26 = vpop.permute.xlu1 %2275 }
 0x29e   : > { %2534 = vst.msk [vmem:[%s220_s22 + $0x1] sm:$0x1] %vm2431_vm12, %v2533_v4 }
 0x29f   : > { %2350 = vst.msk [vmem:[%s4827_s19 + $0xa8] sm:$0xff] %vm1886_vm9, %v2276_v26 }
 0x2b1   : > { %v2254_v45 = vpop.permute.xlu0 %2253 }
 0x2b2   : > { %2339 = vst.msk [vmem:[%s4827_s19 + $0x50] sm:$0xff] %vm1886_vm9, %v2254_v45 }
 0x2b5   : > { %v2286_v50 = vpop.permute.xlu0 %2285  ;;  %v2256_v57 = vpop.permute.xlu1 %2255 }
 0x2b6   : > { %2355 = vst.msk [vmem:[%s4827_s19 + $0xd0] sm:$0xff] %vm1886_vm9, %v2286_v50  ;;  %2340 = vst.msk [vmem:[%s4827_s19 + $0x58] sm:$0xff] %vm1886_vm9, %v2256_v57 }
 0x2b9   : > { %v2250_v13 = vpop.permute.xlu0 %2249  ;;  %v2288_v19 = vpop.permute.xlu1 %2287 }
 0x2ba   : > { %2337 = vst.msk [vmem:[%s4827_s19 + $0x40] sm:$0xff] %vm1886_vm9, %v2250_v13  ;;  %2356 = vst.msk [vmem:[%s4827_s19 + $0xd8] sm:$0xff] %vm1886_vm9, %v2288_v19 }
 0x2bd   : > { %v2282_v40 = vpop.permute.xlu0 %2281  ;;  %v2252_v2 = vpop.permute.xlu1 %2251 }
 0x2be   : > { %2353 = vst.msk [vmem:[%s4827_s19 + $0xc0] sm:$0xff] %vm1886_vm9, %v2282_v40  ;;  %2338 = vst.msk [vmem:[%s4827_s19 + $0x48] sm:$0xff] %vm1886_vm9, %v2252_v2 }
 0x2c1   : > { %v2284_v9 = vpop.permute.xlu1 %2283 }
 0x2c2   : > { %2354 = vst.msk [vmem:[%s4827_s19 + $0xc8] sm:$0xff] %vm1886_vm9, %v2284_v9 }
 0x2d5   : > { %v2262_v7 = vpop.permute.xlu0 %2261 }
 0x2d6   : > { %2343 = vst.msk [vmem:[%s4827_s19 + $0x70] sm:$0xff] %vm1886_vm9, %v2262_v7 }
 0x2d9   : > { %v2258_v29 = vpop.permute.xlu0 %2257  ;;  %v2264_v30 = vpop.permute.xlu1 %2263 }
 0x2da   : > { %2341 = vst.msk [vmem:[%s4827_s19 + $0x60] sm:$0xff] %vm1886_vm9, %v2258_v29  ;;  %2344 = vst.msk [vmem:[%s4827_s19 + $0x78] sm:$0xff] %vm1886_vm9, %v2264_v30 }
 0x2dd   : > { %v2290_v32 = vpop.permute.xlu0 %2289  ;;  %v2260_v39 = vpop.permute.xlu1 %2259 }
 0x2de   : > { %2357 = vst.msk [vmem:[%s4827_s19 + $0xe0] sm:$0xff] %vm1886_vm9, %v2290_v32  ;;  %2342 = vst.msk [vmem:[%s4827_s19 + $0x68] sm:$0xff] %vm1886_vm9, %v2260_v39 }
 0x2e1   : > { %v2294_v8 = vpop.permute.xlu0 %2293  ;;  %v2292_v58 = vpop.permute.xlu1 %2291 }
 0x2e2   : > { %2359 = vst.msk [vmem:[%s4827_s19 + $0xf0] sm:$0xff] %vm1886_vm9, %v2294_v8  ;;  %2358 = vst.msk [vmem:[%s4827_s19 + $0xe8] sm:$0xff] %vm1886_vm9, %v2292_v58 }
 0x2e5   : > { %v2296_v15 = vpop.permute.xlu1 %2295 }
 0x2e6   : > { %2360 = vst.msk [vmem:[%s4827_s19 + $0xf8] sm:$0xff] %vm1886_vm9, %v2296_v15 }
 0x2e7 PF: > { %s15_s15 = sadd.s32 1, %s3430_s15  }
 0x2e8   : > { %p12_p4 = scmp.ge.s32.totalorder %s15_s15, 4  }
 0x2ea   :  { %14 = sbr.rel (!%p12_p4) target bundleno = 1 (0x1), region = 84 }

</bundles_post_ra>
